<compile_context>
chip_gen: v6e
topology: v6e:2x2x1
jax: 0.10.0
libtpu: 0.0.40
codegen_flags: <defaults>
</compile_context>

<pallas_src>
import functools

import jax
import jax.numpy as jnp
from jax.experimental import pallas as pl
from jax.experimental.pallas import tpu as pltpu

LOG_COV_MAX = 2.0
LOG_COV_MIN = -2.0
BN_EPS = 1e-5

_VMEM = pltpu.MemorySpace.VMEM


def _vmem_specs(n):
    return [pl.BlockSpec(memory_space=_VMEM)] * n


# ----------------------------------------------------------------------------
# Fused Pallas kernels
# ----------------------------------------------------------------------------

def _conv_bn_relu_kernel(a_ref, w_ref, b_ref, g_ref, beta_ref, o_ref, *, nphase):
    """relu(batchnorm(a @ w + b)) with train-mode stats, fused in one body.

    For sub-pixel transposed convs the N dimension holds `nphase` output phases
    (phase-major, cout-minor); BN statistics are folded across phases so they
    match per-channel stats over the full spatial output.
    """
    acc = jnp.dot(a_ref[...].astype(jnp.bfloat16), w_ref[...],
                  preferred_element_type=jnp.float32)
    acc = acc + b_ref[...]                       # (M, nphase*cout) f32

    rows = acc.shape[0]
    cout = acc.shape[1] // nphase

    # single-pass stats: sum and sum-of-squares
    s1 = jnp.sum(acc, axis=0, keepdims=True)
    s2 = jnp.sum(acc * acc, axis=0, keepdims=True)
    if nphase > 1:
        s1 = sum(s1[:, p * cout:(p + 1) * cout] for p in range(nphase))
        s2 = sum(s2[:, p * cout:(p + 1) * cout] for p in range(nphase))

    cnt = float(rows * nphase)
    mean = s1 * (1.0 / cnt)
    var = jnp.maximum(s2 * (1.0 / cnt) - mean * mean, 0.0)   # biased (train mode)
    inv = jax.lax.rsqrt(var + BN_EPS) * g_ref[...]           # (1, cout)
    shift = beta_ref[...] - mean * inv                       # (1, cout)
    if nphase > 1:
        inv = jnp.concatenate([inv] * nphase, axis=1)
        shift = jnp.concatenate([shift] * nphase, axis=1)

    o_ref[...] = jnp.maximum(acc * inv + shift, 0.0)


def _latent_reparam_kernel(a_ref, w_ref, b_ref, eps_ref,
                           zmean_ref, zlcov_ref, z_ref, *, zc):
    """Merged z_mean / z_log_cov convs + clamp + reparameterization epilogue."""
    acc = jnp.dot(a_ref[...].astype(jnp.bfloat16), w_ref[...],
                  preferred_element_type=jnp.float32)
    acc = acc + b_ref[...]                       # (M, 2*zc)
    z_mean = acc[:, :zc]
    z_log_cov = jnp.clip(acc[:, zc:], LOG_COV_MIN, LOG_COV_MAX)
    zmean_ref[...] = z_mean
    zlcov_ref[...] = z_log_cov
    z_ref[...] = eps_ref[...] * jnp.exp(z_log_cov * 0.5) + z_mean


def _recon_heads_kernel(a_ref, w_ref, b_ref, mean_ref, lcov_ref):
    """Merged 1x1 recon_mean / recon_log_cov convs + sigmoid / clamp epilogue."""
    acc = jnp.dot(a_ref[...].astype(jnp.bfloat16), w_ref[...],
                  preferred_element_type=jnp.float32)
    acc = acc + b_ref[...]                       # (M, 6)
    mean_ref[...] = jax.nn.sigmoid(acc[:, 0:3])
    lcov_ref[...] = jnp.clip(acc[:, 3:6], LOG_COV_MIN, LOG_COV_MAX)


# ----------------------------------------------------------------------------
# pallas_call wrappers (single full-VMEM block; shapes here are tiny)
# ----------------------------------------------------------------------------

def fused_conv_bn_relu(cols, layer, nphase=1):
    M = cols.shape[0]
    N = layer['w'].shape[1]
    kernel = functools.partial(_conv_bn_relu_kernel, nphase=nphase)
    return pl.pallas_call(
        kernel,
        out_shape=jax.ShapeDtypeStruct((M, N), jnp.float32),
        in_specs=_vmem_specs(5),
        out_specs=pl.BlockSpec(memory_space=_VMEM),
    )(cols, layer['w'], layer['b'], layer['g'], layer['beta'])


def fused_latent_reparam(cols, layer, eps):
    M = cols.shape[0]
    zc = layer['w'].shape[1] // 2
    kernel = functools.partial(_latent_reparam_kernel, zc=zc)
    return pl.pallas_call(
        kernel,
        out_shape=(jax.ShapeDtypeStruct((M, zc), jnp.float32),
                   jax.ShapeDtypeStruct((M, zc), jnp.float32),
                   jax.ShapeDtypeStruct((M, zc), jnp.float32)),
        in_specs=_vmem_specs(4),
        out_specs=(pl.BlockSpec(memory_space=_VMEM),
                   pl.BlockSpec(memory_space=_VMEM),
                   pl.BlockSpec(memory_space=_VMEM)),
    )(cols, layer['w'], layer['b'], eps)


def fused_recon_heads(x_flat, layer):
    M = x_flat.shape[0]
    return pl.pallas_call(
        _recon_heads_kernel,
        out_shape=(jax.ShapeDtypeStruct((M, 3), jnp.float32),
                   jax.ShapeDtypeStruct((M, 3), jnp.float32)),
        in_specs=_vmem_specs(3),
        out_specs=(pl.BlockSpec(memory_space=_VMEM),
                   pl.BlockSpec(memory_space=_VMEM)),
    )(x_flat, layer['w'], layer['b'])


# ----------------------------------------------------------------------------
# Conv glue (pure data rearrangement; all matmuls run in Pallas)
# ----------------------------------------------------------------------------

def im2col(x_nhwc, kh, kw, stride, padding):
    B, H, W, C = x_nhwc.shape
    x_pad = jnp.pad(x_nhwc, ((0, 0), (padding, padding), (padding, padding), (0, 0)))
    Ho = (H + 2 * padding - kh) // stride + 1
    Wo = (W + 2 * padding - kw) // stride + 1
    cols = []
    for i in range(kh):
        for j in range(kw):
            cols.append(x_pad[:, i:i + stride * Ho:stride, j:j + stride * Wo:stride, :])
    patches = jnp.stack(cols, axis=3)                      # (B,Ho,Wo,kh*kw,C)
    return patches.reshape(B * Ho * Wo, kh * kw * C), (B, Ho, Wo)


def conv_bn_relu_layer(x_nhwc, layer, k, stride, padding):
    cols, (B, Ho, Wo) = im2col(x_nhwc, k, k, stride, padding)
    cout = layer['g'].shape[1]
    out = fused_conv_bn_relu(cols, layer, nphase=1)
    return out.reshape(B, Ho, Wo, cout)


def convT_bn_relu_layer(x_nhwc, layer):
    """ConvTranspose2d(k=4, s=2, p=1) + BN + ReLU via sub-pixel decomposition."""
    B, H, W, _ = x_nhwc.shape
    cout = layer['g'].shape[1]
    cols, _ = im2col(x_nhwc, 3, 3, 1, 1)                   # (B*H*W, 9*Cin)
    out = fused_conv_bn_relu(cols, layer, nphase=4)        # (B*H*W, 4*Cout)
    out = out.reshape(B, H, W, 2, 2, cout)                 # (..., py, px, cout)
    out = jnp.transpose(out, (0, 1, 3, 2, 4, 5)).reshape(B, 2 * H, 2 * W, cout)
    return out


# ----------------------------------------------------------------------------
# Weight preparation (hoisted out of the forward pass, done once)
# ----------------------------------------------------------------------------

def conv_w_to_mat(w):
    # PyTorch Conv2d weight (Cout,Cin,kh,kw) -> (kh*kw*Cin, Cout), im2col order.
    cout = w.shape[0]
    return jnp.transpose(w, (2, 3, 1, 0)).reshape(-1, cout)


def convT_subpixel_wmat(w_t):
    """ConvTranspose2d weight (Cin,Cout,4,4), s=2, p=1 -> (9*Cin, 4*Cout).

    Row order matches im2col(k=3, s=1, p=1): (ty, tx, cin).
    Column order: (py, px, cout), i.e. out[2m+py, 2n+px] phases.
    Uses out[o] += x[i]*w[k] with o = 2*i - 1 + k  =>  k = (3|4) - 2*t.
    """
    cin, cout = w_t.shape[0], w_t.shape[1]
    zero = jnp.zeros((cin, cout), w_t.dtype)
    row_blocks = []
    for ty in range(3):
        for tx in range(3):
            phase_blocks = []
            for py in range(2):
                for px in range(2):
                    ky = (3 - 2 * ty) if py == 0 else (4 - 2 * ty)
                    kx = (3 - 2 * tx) if px == 0 else (4 - 2 * tx)
                    if 0 <= ky <= 3 and 0 <= kx <= 3:
                        phase_blocks.append(w_t[:, :, ky, kx])
                    else:
                        phase_blocks.append(zero)
            row_blocks.append(jnp.concatenate(phase_blocks, axis=1))  # (Cin, 4*Cout)
    return jnp.concatenate(row_blocks, axis=0)                        # (9*Cin, 4*Cout)


def prepare_params(raw):
    """One-time transform of PyTorch-layout params into kernel-ready matrices."""
    f32 = jnp.float32
    bf16 = jnp.bfloat16

    def bn_layer(w_mat, b, g, beta):
        return dict(w=w_mat.astype(bf16),
                    b=b.reshape(1, -1).astype(f32),
                    g=g.reshape(1, -1).astype(f32),
                    beta=beta.reshape(1, -1).astype(f32))

    p = {}
    p['enc1'] = bn_layer(conv_w_to_mat(raw['enc1_w']), raw['enc1_b'],
                         raw['enc1_gamma'], raw['enc1_beta'])
    p['enc2'] = bn_layer(conv_w_to_mat(raw['enc2_w']), raw['enc2_b'],
                         raw['enc2_gamma'], raw['enc2_beta'])
    p['latent'] = dict(
        w=jnp.concatenate([conv_w_to_mat(raw['zmean_w']),
                           conv_w_to_mat(raw['zlcov_w'])], axis=1).astype(bf16),
        b=jnp.concatenate([raw['zmean_b'], raw['zlcov_b']]).reshape(1, -1).astype(f32))
    p['dec1'] = bn_layer(convT_subpixel_wmat(raw['dec1_w']),
                         jnp.tile(raw['dec1_b'], 4),
                         raw['dec1_gamma'], raw['dec1_beta'])
    p['dec2'] = bn_layer(convT_subpixel_wmat(raw['dec2_w']),
                         jnp.tile(raw['dec2_b'], 4),
                         raw['dec2_gamma'], raw['dec2_beta'])
    p['recon'] = dict(
        w=jnp.concatenate([conv_w_to_mat(raw['rmean_w']),
                           conv_w_to_mat(raw['rlcov_w'])], axis=1).astype(bf16),
        b=jnp.concatenate([raw['rmean_b'], raw['rlcov_b']]).reshape(1, -1).astype(f32))
    return p


# ----------------------------------------------------------------------------
# Parameters (deterministic init, PyTorch weight layouts)
# ----------------------------------------------------------------------------

def _conv_init(key, cout, cin, kh, kw):
    kw_, kb_ = jax.random.split(key)
    bound = (cin * kh * kw) ** -0.5
    w = jax.random.uniform(kw_, (cout, cin, kh, kw), jnp.float32, -bound, bound)
    b = jax.random.uniform(kb_, (cout,), jnp.float32, -bound, bound)
    return w, b


def _convT_init(key, cin, cout, kh, kw):
    kw_, kb_ = jax.random.split(key)
    bound = (cout * kh * kw) ** -0.5
    w = jax.random.uniform(kw_, (cin, cout, kh, kw), jnp.float32, -bound, bound)
    b = jax.random.uniform(kb_, (cout,), jnp.float32, -bound, bound)
    return w, b


def init_params(key):
    inter_ch, z_ch = 32, 32
    ks = jax.random.split(key, 8)
    p = {}
    # encoder: Conv(3->32,k4,s2,p1)+BN+ReLU, Conv(32->32,k4,s2,p1)+BN+ReLU
    p['enc1_w'], p['enc1_b'] = _conv_init(ks[0], inter_ch, 3, 4, 4)
    p['enc2_w'], p['enc2_b'] = _conv_init(ks[1], inter_ch, inter_ch, 4, 4)
    p['enc1_gamma'] = jnp.ones((inter_ch,), jnp.float32)
    p['enc1_beta'] = jnp.zeros((inter_ch,), jnp.float32)
    p['enc2_gamma'] = jnp.ones((inter_ch,), jnp.float32)
    p['enc2_beta'] = jnp.zeros((inter_ch,), jnp.float32)
    # latent heads: Conv(32->32,k3,s1,p1)
    p['zmean_w'], p['zmean_b'] = _conv_init(ks[2], z_ch, inter_ch, 3, 3)
    p['zlcov_w'], p['zlcov_b'] = _conv_init(ks[3], z_ch, inter_ch, 3, 3)
    # decoder: ConvT(32->32,k4,s2,p1)+BN+ReLU, ConvT(32->32,k4,s2,p1)+BN+ReLU
    p['dec1_w'], p['dec1_b'] = _convT_init(ks[4], z_ch, inter_ch, 4, 4)
    p['dec2_w'], p['dec2_b'] = _convT_init(ks[5], inter_ch, inter_ch, 4, 4)
    p['dec1_gamma'] = jnp.ones((inter_ch,), jnp.float32)
    p['dec1_beta'] = jnp.zeros((inter_ch,), jnp.float32)
    p['dec2_gamma'] = jnp.ones((inter_ch,), jnp.float32)
    p['dec2_beta'] = jnp.zeros((inter_ch,), jnp.float32)
    # recon heads: Conv(32->3,k1,s1,p0)
    p['rmean_w'], p['rmean_b'] = _conv_init(ks[6], 3, inter_ch, 1, 1)
    p['rlcov_w'], p['rlcov_b'] = _conv_init(ks[7], 3, inter_ch, 1, 1)
    return p


# ----------------------------------------------------------------------------
# VAE forward
# ----------------------------------------------------------------------------

def vae_forward(params, obs_batch_nchw, eps_key):
    x = jnp.transpose(obs_batch_nchw.astype(jnp.float32), (0, 2, 3, 1))  # -> NHWC

    # ---- encoder (fused conv+BN+ReLU) ----
    h = conv_bn_relu_layer(x, params['enc1'], k=4, stride=2, padding=1)   # (B,8,8,32)
    h = conv_bn_relu_layer(h, params['enc2'], k=4, stride=2, padding=1)   # (B,4,4,32)

    # ---- merged latent heads + fused reparameterization ----
    cols, (zB, zH, zW) = im2col(h, 3, 3, 1, 1)                            # (B*16, 288)
    zc = params['latent']['w'].shape[1] // 2
    eps = jax.random.normal(eps_key, (zB * zH * zW, zc), jnp.float32)
    z_mean_f, z_log_cov_f, z_f = fused_latent_reparam(cols, params['latent'], eps)
    z_mean = z_mean_f.reshape(zB, zH, zW, zc)
    z_log_cov = z_log_cov_f.reshape(zB, zH, zW, zc)
    hidden = z_f.reshape(zB, zH, zW, zc)

    # ---- decoder (sub-pixel ConvTranspose + fused BN+ReLU) ----
    d = convT_bn_relu_layer(hidden, params['dec1'])                       # (B,8,8,32)
    d = convT_bn_relu_layer(d, params['dec2'])                            # (B,16,16,32)

    # ---- merged recon heads (1x1 convs -> sigmoid / clamp), fused ----
    B, H, W, C = d.shape
    rm_f, rl_f = fused_recon_heads(d.reshape(-1, C), params['recon'])
    recon_mean = rm_f.reshape(B, H, W, 3)
    recon_log_cov = rl_f.reshape(B, H, W, 3)

    # convert everything back to NCHW to match the PyTorch forward
    to_nchw = lambda t: jnp.transpose(t, (0, 3, 1, 2))
    return (to_nchw(recon_mean), to_nchw(recon_log_cov),
            to_nchw(z_mean), to_nchw(z_log_cov))


if __name__ == "__main__":
    key = jax.random.PRNGKey(0)
    k_x, k_eps = jax.random.split(key)

    raw_params = init_params(jax.random.PRNGKey(42))
    params = prepare_params(raw_params)          # hoisted: weight prep runs once
    params = jax.tree_util.tree_map(jnp.asarray, params)

    x = jax.random.normal(k_x, (2, 3, 16, 16), jnp.float32)

    fwd = jax.jit(vae_forward)
    recon_mean, recon_log_cov, z_mean, z_log_cov = fwd(params, x, k_eps)
    jax.block_until_ready((recon_mean, recon_log_cov, z_mean, z_log_cov))

    assert recon_mean.shape == (2, 3, 16, 16)
    assert recon_log_cov.shape == (2, 3, 16, 16)
    assert z_mean.shape == (2, 32, 4, 4)
    assert z_log_cov.shape == (2, 32, 4, 4)
    assert bool(jnp.all(jnp.isfinite(recon_mean)))
    assert bool(jnp.all((recon_mean >= 0.0) & (recon_mean <= 1.0)))
    assert bool(jnp.all((recon_log_cov >= LOG_COV_MIN) & (recon_log_cov <= LOG_COV_MAX)))
    assert bool(jnp.all((z_log_cov >= LOG_COV_MIN) & (z_log_cov <= LOG_COV_MAX)))
    assert bool(jnp.all(jnp.isfinite(z_mean)))
    print("KERNEL_OK")
</pallas_src>

<mosaic_0001>
module attributes {stable_mosaic.version = 11 : i64} {
  func.func @_conv_bn_relu_kernel(%arg0: memref<128x48xf32, #tpu.memory_space<vmem>>, %arg1: memref<48x32xbf16, #tpu.memory_space<vmem>>, %arg2: memref<1x32xf32, #tpu.memory_space<vmem>>, %arg3: memref<1x32xf32, #tpu.memory_space<vmem>>, %arg4: memref<1x32xf32, #tpu.memory_space<vmem>>, %arg5: memref<128x32xf32, #tpu.memory_space<vmem>>) attributes {dimension_semantics = [], scalar_prefetch = 0 : i64, scratch_operands = 0 : i64, tpu.core_type = #tpu.core_type<tc>} {
    %c0 = arith.constant 0 : index
    %c0_0 = arith.constant 0 : index
    %0 = vector.load %arg0[%c0, %c0_0] : memref<128x48xf32, #tpu.memory_space<vmem>>, vector<128x48xf32>
    %1 = arith.truncf %0 : vector<128x48xf32> to vector<128x48xbf16>
    %c0_1 = arith.constant 0 : index
    %c0_2 = arith.constant 0 : index
    %2 = vector.load %arg1[%c0_1, %c0_2] : memref<48x32xbf16, #tpu.memory_space<vmem>>, vector<48x32xbf16>
    %cst = arith.constant dense<0.000000e+00> : vector<128x32xf32>
    %3 = tpu.matmul %1, %2, %cst {dimension_numbers = #tpu.dot_dimension_numbers<[1], [0], [0], [1], [0, 0, 1, 1], [], []>} : vector<128x48xbf16>, vector<48x32xbf16>, vector<128x32xf32> -> vector<128x32xf32>
    %c0_3 = arith.constant 0 : index
    %c0_4 = arith.constant 0 : index
    %4 = vector.load %arg2[%c0_3, %c0_4] : memref<1x32xf32, #tpu.memory_space<vmem>>, vector<1x32xf32>
    %5 = vector.broadcast %4 : vector<1x32xf32> to vector<128x32xf32>
    %6 = arith.addf %3, %5 : vector<128x32xf32>
    %cst_5 = arith.constant dense<0.000000e+00> : vector<32xf32>
    %7 = vector.multi_reduction <add>, %6, %cst_5 [0] : vector<128x32xf32> to vector<32xf32>
    %8 = vector.shape_cast %7 : vector<32xf32> to vector<1x32xf32>
    %9 = arith.mulf %6, %6 : vector<128x32xf32>
    %cst_6 = arith.constant dense<0.000000e+00> : vector<32xf32>
    %10 = vector.multi_reduction <add>, %9, %cst_6 [0] : vector<128x32xf32> to vector<32xf32>
    %11 = vector.shape_cast %10 : vector<32xf32> to vector<1x32xf32>
    %cst_7 = arith.constant 7.812500e-03 : f32
    %12 = vector.broadcast %cst_7 : f32 to vector<1x32xf32>
    %13 = arith.mulf %8, %12 : vector<1x32xf32>
    %cst_8 = arith.constant 7.812500e-03 : f32
    %14 = vector.broadcast %cst_8 : f32 to vector<1x32xf32>
    %15 = arith.mulf %11, %14 : vector<1x32xf32>
    %16 = arith.mulf %13, %13 : vector<1x32xf32>
    %17 = arith.subf %15, %16 : vector<1x32xf32>
    %cst_9 = arith.constant 0.000000e+00 : f32
    %18 = vector.broadcast %cst_9 : f32 to vector<1x32xf32>
    %19 = arith.maximumf %17, %18 : vector<1x32xf32>
    %cst_10 = arith.constant 9.99999974E-6 : f32
    %20 = vector.broadcast %cst_10 : f32 to vector<1x32xf32>
    %21 = arith.addf %19, %20 : vector<1x32xf32>
    %22 = math.rsqrt %21 : vector<1x32xf32>
    %c0_11 = arith.constant 0 : index
    %c0_12 = arith.constant 0 : index
    %23 = vector.load %arg3[%c0_11, %c0_12] : memref<1x32xf32, #tpu.memory_space<vmem>>, vector<1x32xf32>
    %24 = arith.mulf %22, %23 : vector<1x32xf32>
    %c0_13 = arith.constant 0 : index
    %c0_14 = arith.constant 0 : index
    %25 = vector.load %arg4[%c0_13, %c0_14] : memref<1x32xf32, #tpu.memory_space<vmem>>, vector<1x32xf32>
    %26 = arith.mulf %13, %24 : vector<1x32xf32>
    %27 = arith.subf %25, %26 : vector<1x32xf32>
    %28 = vector.broadcast %24 : vector<1x32xf32> to vector<128x32xf32>
    %29 = arith.mulf %6, %28 : vector<128x32xf32>
    %30 = vector.broadcast %27 : vector<1x32xf32> to vector<128x32xf32>
    %31 = arith.addf %29, %30 : vector<128x32xf32>
    %cst_15 = arith.constant 0.000000e+00 : f32
    %32 = vector.broadcast %cst_15 : f32 to vector<128x32xf32>
    %33 = arith.maximumf %31, %32 : vector<128x32xf32>
    %c0_16 = arith.constant 0 : index
    %c0_17 = arith.constant 0 : index
    %34 = vector.load %arg5[%c0_16, %c0_17] : memref<128x32xf32, #tpu.memory_space<vmem>>, vector<128x32xf32>
    tpu.vector_store %arg5[%c0_16, %c0_17], %33 {strides = array<i32>} : memref<128x32xf32, #tpu.memory_space<vmem>>, vector<128x32xf32>,
    return
  }
}

module attributes {stable_mosaic.version = 11 : i64} {
  func.func @_conv_bn_relu_kernel(%arg0: memref<32x512xf32, #tpu.memory_space<vmem>>, %arg1: memref<512x32xbf16, #tpu.memory_space<vmem>>, %arg2: memref<1x32xf32, #tpu.memory_space<vmem>>, %arg3: memref<1x32xf32, #tpu.memory_space<vmem>>, %arg4: memref<1x32xf32, #tpu.memory_space<vmem>>, %arg5: memref<32x32xf32, #tpu.memory_space<vmem>>) attributes {dimension_semantics = [], scalar_prefetch = 0 : i64, scratch_operands = 0 : i64, tpu.core_type = #tpu.core_type<tc>} {
    %c0 = arith.constant 0 : index
    %c0_0 = arith.constant 0 : index
    %0 = vector.load %arg0[%c0, %c0_0] : memref<32x512xf32, #tpu.memory_space<vmem>>, vector<32x512xf32>
    %1 = arith.truncf %0 : vector<32x512xf32> to vector<32x512xbf16>
    %c0_1 = arith.constant 0 : index
    %c0_2 = arith.constant 0 : index
    %2 = vector.load %arg1[%c0_1, %c0_2] : memref<512x32xbf16, #tpu.memory_space<vmem>>, vector<512x32xbf16>
    %cst = arith.constant dense<0.000000e+00> : vector<32x32xf32>
    %3 = tpu.matmul %1, %2, %cst {dimension_numbers = #tpu.dot_dimension_numbers<[1], [0], [0], [1], [0, 0, 1, 1], [], []>} : vector<32x512xbf16>, vector<512x32xbf16>, vector<32x32xf32> -> vector<32x32xf32>
    %c0_3 = arith.constant 0 : index
    %c0_4 = arith.constant 0 : index
    %4 = vector.load %arg2[%c0_3, %c0_4] : memref<1x32xf32, #tpu.memory_space<vmem>>, vector<1x32xf32>
    %5 = vector.broadcast %4 : vector<1x32xf32> to vector<32x32xf32>
    %6 = arith.addf %3, %5 : vector<32x32xf32>
    %cst_5 = arith.constant dense<0.000000e+00> : vector<32xf32>
    %7 = vector.multi_reduction <add>, %6, %cst_5 [0] : vector<32x32xf32> to vector<32xf32>
    %8 = vector.shape_cast %7 : vector<32xf32> to vector<1x32xf32>
    %9 = arith.mulf %6, %6 : vector<32x32xf32>
    %cst_6 = arith.constant dense<0.000000e+00> : vector<32xf32>
    %10 = vector.multi_reduction <add>, %9, %cst_6 [0] : vector<32x32xf32> to vector<32xf32>
    %11 = vector.shape_cast %10 : vector<32xf32> to vector<1x32xf32>
    %cst_7 = arith.constant 3.125000e-02 : f32
    %12 = vector.broadcast %cst_7 : f32 to vector<1x32xf32>
    %13 = arith.mulf %8, %12 : vector<1x32xf32>
    %cst_8 = arith.constant 3.125000e-02 : f32
    %14 = vector.broadcast %cst_8 : f32 to vector<1x32xf32>
    %15 = arith.mulf %11, %14 : vector<1x32xf32>
    %16 = arith.mulf %13, %13 : vector<1x32xf32>
    %17 = arith.subf %15, %16 : vector<1x32xf32>
    %cst_9 = arith.constant 0.000000e+00 : f32
    %18 = vector.broadcast %cst_9 : f32 to vector<1x32xf32>
    %19 = arith.maximumf %17, %18 : vector<1x32xf32>
    %cst_10 = arith.constant 9.99999974E-6 : f32
    %20 = vector.broadcast %cst_10 : f32 to vector<1x32xf32>
    %21 = arith.addf %19, %20 : vector<1x32xf32>
    %22 = math.rsqrt %21 : vector<1x32xf32>
    %c0_11 = arith.constant 0 : index
    %c0_12 = arith.constant 0 : index
    %23 = vector.load %arg3[%c0_11, %c0_12] : memref<1x32xf32, #tpu.memory_space<vmem>>, vector<1x32xf32>
    %24 = arith.mulf %22, %23 : vector<1x32xf32>
    %c0_13 = arith.constant 0 : index
    %c0_14 = arith.constant 0 : index
    %25 = vector.load %arg4[%c0_13, %c0_14] : memref<1x32xf32, #tpu.memory_space<vmem>>, vector<1x32xf32>
    %26 = arith.mulf %13, %24 : vector<1x32xf32>
    %27 = arith.subf %25, %26 : vector<1x32xf32>
    %28 = vector.broadcast %24 : vector<1x32xf32> to vector<32x32xf32>
    %29 = arith.mulf %6, %28 : vector<32x32xf32>
    %30 = vector.broadcast %27 : vector<1x32xf32> to vector<32x32xf32>
    %31 = arith.addf %29, %30 : vector<32x32xf32>
    %cst_15 = arith.constant 0.000000e+00 : f32
    %32 = vector.broadcast %cst_15 : f32 to vector<32x32xf32>
    %33 = arith.maximumf %31, %32 : vector<32x32xf32>
    %c0_16 = arith.constant 0 : index
    %c0_17 = arith.constant 0 : index
    %34 = vector.load %arg5[%c0_16, %c0_17] : memref<32x32xf32, #tpu.memory_space<vmem>>, vector<32x32xf32>
    tpu.vector_store %arg5[%c0_16, %c0_17], %33 {strides = array<i32>} : memref<32x32xf32, #tpu.memory_space<vmem>>, vector<32x32xf32>,
    return
  }
}

module attributes {stable_mosaic.version = 11 : i64} {
  func.func @_latent_reparam_kernel(%arg0: memref<32x288xf32, #tpu.memory_space<vmem>>, %arg1: memref<288x64xbf16, #tpu.memory_space<vmem>>, %arg2: memref<1x64xf32, #tpu.memory_space<vmem>>, %arg3: memref<32x32xf32, #tpu.memory_space<vmem>>, %arg4: memref<32x32xf32, #tpu.memory_space<vmem>>, %arg5: memref<32x32xf32, #tpu.memory_space<vmem>>, %arg6: memref<32x32xf32, #tpu.memory_space<vmem>>) attributes {dimension_semantics = [], scalar_prefetch = 0 : i64, scratch_operands = 0 : i64, tpu.core_type = #tpu.core_type<tc>} {
    %c0 = arith.constant 0 : index
    %c0_0 = arith.constant 0 : index
    %0 = vector.load %arg0[%c0, %c0_0] : memref<32x288xf32, #tpu.memory_space<vmem>>, vector<32x288xf32>
    %1 = arith.truncf %0 : vector<32x288xf32> to vector<32x288xbf16>
    %c0_1 = arith.constant 0 : index
    %c0_2 = arith.constant 0 : index
    %2 = vector.load %arg1[%c0_1, %c0_2] : memref<288x64xbf16, #tpu.memory_space<vmem>>, vector<288x64xbf16>
    %cst = arith.constant dense<0.000000e+00> : vector<32x64xf32>
    %3 = tpu.matmul %1, %2, %cst {dimension_numbers = #tpu.dot_dimension_numbers<[1], [0], [0], [1], [0, 0, 1, 1], [], []>} : vector<32x288xbf16>, vector<288x64xbf16>, vector<32x64xf32> -> vector<32x64xf32>
    %c0_3 = arith.constant 0 : index
    %c0_4 = arith.constant 0 : index
    %4 = vector.load %arg2[%c0_3, %c0_4] : memref<1x64xf32, #tpu.memory_space<vmem>>, vector<1x64xf32>
    %5 = vector.broadcast %4 : vector<1x64xf32> to vector<32x64xf32>
    %6 = arith.addf %3, %5 : vector<32x64xf32>
    %7 = vector.extract_strided_slice %6 {offsets = [0, 0], sizes = [32, 32], strides = [1, 1]} : vector<32x64xf32> to vector<32x32xf32>
    %8 = vector.extract_strided_slice %6 {offsets = [0, 32], sizes = [32, 32], strides = [1, 1]} : vector<32x64xf32> to vector<32x32xf32>
    %cst_5 = arith.constant -2.000000e+00 : f32
    %cst_6 = arith.constant 2.000000e+00 : f32
    %9 = vector.broadcast %cst_5 : f32 to vector<32x32xf32>
    %10 = arith.maximumf %9, %8 : vector<32x32xf32>
    %11 = vector.broadcast %cst_6 : f32 to vector<32x32xf32>
    %12 = arith.minimumf %11, %10 : vector<32x32xf32>
    %c0_7 = arith.constant 0 : index
    %c0_8 = arith.constant 0 : index
    %13 = vector.load %arg4[%c0_7, %c0_8] : memref<32x32xf32, #tpu.memory_space<vmem>>, vector<32x32xf32>
    tpu.vector_store %arg4[%c0_7, %c0_8], %7 {strides = array<i32>} : memref<32x32xf32, #tpu.memory_space<vmem>>, vector<32x32xf32>,
    %c0_9 = arith.constant 0 : index
    %c0_10 = arith.constant 0 : index
    %14 = vector.load %arg5[%c0_9, %c0_10] : memref<32x32xf32, #tpu.memory_space<vmem>>, vector<32x32xf32>
    tpu.vector_store %arg5[%c0_9, %c0_10], %12 {strides = array<i32>} : memref<32x32xf32, #tpu.memory_space<vmem>>, vector<32x32xf32>,
    %c0_11 = arith.constant 0 : index
    %c0_12 = arith.constant 0 : index
    %15 = vector.load %arg3[%c0_11, %c0_12] : memref<32x32xf32, #tpu.memory_space<vmem>>, vector<32x32xf32>
    %cst_13 = arith.constant 5.000000e-01 : f32
    %16 = vector.broadcast %cst_13 : f32 to vector<32x32xf32>
    %17 = arith.mulf %12, %16 : vector<32x32xf32>
    %18 = math.exp %17 : vector<32x32xf32>
    %19 = arith.mulf %15, %18 : vector<32x32xf32>
    %20 = arith.addf %19, %7 : vector<32x32xf32>
    %c0_14 = arith.constant 0 : index
    %c0_15 = arith.constant 0 : index
    %21 = vector.load %arg6[%c0_14, %c0_15] : memref<32x32xf32, #tpu.memory_space<vmem>>, vector<32x32xf32>
    tpu.vector_store %arg6[%c0_14, %c0_15], %20 {strides = array<i32>} : memref<32x32xf32, #tpu.memory_space<vmem>>, vector<32x32xf32>,
    return
  }
}

module attributes {stable_mosaic.version = 11 : i64} {
  func.func @_conv_bn_relu_kernel(%arg0: memref<32x288xf32, #tpu.memory_space<vmem>>, %arg1: memref<288x128xbf16, #tpu.memory_space<vmem>>, %arg2: memref<1x128xf32, #tpu.memory_space<vmem>>, %arg3: memref<1x32xf32, #tpu.memory_space<vmem>>, %arg4: memref<1x32xf32, #tpu.memory_space<vmem>>, %arg5: memref<32x128xf32, #tpu.memory_space<vmem>>) attributes {dimension_semantics = [], scalar_prefetch = 0 : i64, scratch_operands = 0 : i64, tpu.core_type = #tpu.core_type<tc>} {
    %c0 = arith.constant 0 : index
    %c0_0 = arith.constant 0 : index
    %0 = vector.load %arg0[%c0, %c0_0] : memref<32x288xf32, #tpu.memory_space<vmem>>, vector<32x288xf32>
    %1 = arith.truncf %0 : vector<32x288xf32> to vector<32x288xbf16>
    %c0_1 = arith.constant 0 : index
    %c0_2 = arith.constant 0 : index
    %2 = vector.load %arg1[%c0_1, %c0_2] : memref<288x128xbf16, #tpu.memory_space<vmem>>, vector<288x128xbf16>
    %cst = arith.constant dense<0.000000e+00> : vector<32x128xf32>
    %3 = tpu.matmul %1, %2, %cst {dimension_numbers = #tpu.dot_dimension_numbers<[1], [0], [0], [1], [0, 0, 1, 1], [], []>} : vector<32x288xbf16>, vector<288x128xbf16>, vector<32x128xf32> -> vector<32x128xf32>
    %c0_3 = arith.constant 0 : index
    %c0_4 = arith.constant 0 : index
    %4 = vector.load %arg2[%c0_3, %c0_4] : memref<1x128xf32, #tpu.memory_space<vmem>>, vector<1x128xf32>
    %5 = vector.broadcast %4 : vector<1x128xf32> to vector<32x128xf32>
    %6 = arith.addf %3, %5 : vector<32x128xf32>
    %cst_5 = arith.constant dense<0.000000e+00> : vector<128xf32>
    %7 = vector.multi_reduction <add>, %6, %cst_5 [0] : vector<32x128xf32> to vector<128xf32>
    %8 = vector.shape_cast %7 : vector<128xf32> to vector<1x128xf32>
    %9 = arith.mulf %6, %6 : vector<32x128xf32>
    %cst_6 = arith.constant dense<0.000000e+00> : vector<128xf32>
    %10 = vector.multi_reduction <add>, %9, %cst_6 [0] : vector<32x128xf32> to vector<128xf32>
    %11 = vector.shape_cast %10 : vector<128xf32> to vector<1x128xf32>
    %12 = vector.extract_strided_slice %8 {offsets = [0, 0], sizes = [1, 32], strides = [1, 1]} : vector<1x128xf32> to vector<1x32xf32>
    %cst_7 = arith.constant 0.000000e+00 : f32
    %13 = vector.broadcast %cst_7 : f32 to vector<1x32xf32>
    %14 = arith.addf %13, %12 : vector<1x32xf32>
    %15 = vector.extract_strided_slice %8 {offsets = [0, 32], sizes = [1, 32], strides = [1, 1]} : vector<1x128xf32> to vector<1x32xf32>
    %16 = arith.addf %14, %15 : vector<1x32xf32>
    %17 = vector.extract_strided_slice %8 {offsets = [0, 64], sizes = [1, 32], strides = [1, 1]} : vector<1x128xf32> to vector<1x32xf32>
    %18 = arith.addf %16, %17 : vector<1x32xf32>
    %19 = vector.extract_strided_slice %8 {offsets = [0, 96], sizes = [1, 32], strides = [1, 1]} : vector<1x128xf32> to vector<1x32xf32>
    %20 = arith.addf %18, %19 : vector<1x32xf32>
    %21 = vector.extract_strided_slice %11 {offsets = [0, 0], sizes = [1, 32], strides = [1, 1]} : vector<1x128xf32> to vector<1x32xf32>
    %cst_8 = arith.constant 0.000000e+00 : f32
    %22 = vector.broadcast %cst_8 : f32 to vector<1x32xf32>
    %23 = arith.addf %22, %21 : vector<1x32xf32>
    %24 = vector.extract_strided_slice %11 {offsets = [0, 32], sizes = [1, 32], strides = [1, 1]} : vector<1x128xf32> to vector<1x32xf32>
    %25 = arith.addf %23, %24 : vector<1x32xf32>
    %26 = vector.extract_strided_slice %11 {offsets = [0, 64], sizes = [1, 32], strides = [1, 1]} : vector<1x128xf32> to vector<1x32xf32>
    %27 = arith.addf %25, %26 : vector<1x32xf32>
    %28 = vector.extract_strided_slice %11 {offsets = [0, 96], sizes = [1, 32], strides = [1, 1]} : vector<1x128xf32> to vector<1x32xf32>
    %29 = arith.addf %27, %28 : vector<1x32xf32>
    %cst_9 = arith.constant 7.812500e-03 : f32
    %30 = vector.broadcast %cst_9 : f32 to vector<1x32xf32>
    %31 = arith.mulf %20, %30 : vector<1x32xf32>
    %cst_10 = arith.constant 7.812500e-03 : f32
    %32 = vector.broadcast %cst_10 : f32 to vector<1x32xf32>
    %33 = arith.mulf %29, %32 : vector<1x32xf32>
    %34 = arith.mulf %31, %31 : vector<1x32xf32>
    %35 = arith.subf %33, %34 : vector<1x32xf32>
    %cst_11 = arith.constant 0.000000e+00 : f32
    %36 = vector.broadcast %cst_11 : f32 to vector<1x32xf32>
    %37 = arith.maximumf %35, %36 : vector<1x32xf32>
    %cst_12 = arith.constant 9.99999974E-6 : f32
    %38 = vector.broadcast %cst_12 : f32 to vector<1x32xf32>
    %39 = arith.addf %37, %38 : vector<1x32xf32>
    %40 = math.rsqrt %39 : vector<1x32xf32>
    %c0_13 = arith.constant 0 : index
    %c0_14 = arith.constant 0 : index
    %41 = vector.load %arg3[%c0_13, %c0_14] : memref<1x32xf32, #tpu.memory_space<vmem>>, vector<1x32xf32>
    %42 = arith.mulf %40, %41 : vector<1x32xf32>
    %c0_15 = arith.constant 0 : index
    %c0_16 = arith.constant 0 : index
    %43 = vector.load %arg4[%c0_15, %c0_16] : memref<1x32xf32, #tpu.memory_space<vmem>>, vector<1x32xf32>
    %44 = arith.mulf %31, %42 : vector<1x32xf32>
    %45 = arith.subf %43, %44 : vector<1x32xf32>
    %46 = tpu.concatenate %42, %42, %42, %42 in 1 : vector<1x32xf32>, vector<1x32xf32>, vector<1x32xf32>, vector<1x32xf32> -> vector<1x128xf32>
    %47 = tpu.concatenate %45, %45, %45, %45 in 1 : vector<1x32xf32>, vector<1x32xf32>, vector<1x32xf32>, vector<1x32xf32> -> vector<1x128xf32>
    %48 = vector.broadcast %46 : vector<1x128xf32> to vector<32x128xf32>
    %49 = arith.mulf %6, %48 : vector<32x128xf32>
    %50 = vector.broadcast %47 : vector<1x128xf32> to vector<32x128xf32>
    %51 = arith.addf %49, %50 : vector<32x128xf32>
    %cst_17 = arith.constant 0.000000e+00 : f32
    %52 = vector.broadcast %cst_17 : f32 to vector<32x128xf32>
    %53 = arith.maximumf %51, %52 : vector<32x128xf32>
    %c0_18 = arith.constant 0 : index
    %c0_19 = arith.constant 0 : index
    %54 = vector.load %arg5[%c0_18, %c0_19] : memref<32x128xf32, #tpu.memory_space<vmem>>, vector<32x128xf32>
    tpu.vector_store %arg5[%c0_18, %c0_19], %53 {strides = array<i32>} : memref<32x128xf32, #tpu.memory_space<vmem>>, vector<32x128xf32>,
    return
  }
}

module attributes {stable_mosaic.version = 11 : i64} {
  func.func @_conv_bn_relu_kernel(%arg0: memref<128x288xf32, #tpu.memory_space<vmem>>, %arg1: memref<288x128xbf16, #tpu.memory_space<vmem>>, %arg2: memref<1x128xf32, #tpu.memory_space<vmem>>, %arg3: memref<1x32xf32, #tpu.memory_space<vmem>>, %arg4: memref<1x32xf32, #tpu.memory_space<vmem>>, %arg5: memref<128x128xf32, #tpu.memory_space<vmem>>) attributes {dimension_semantics = [], scalar_prefetch = 0 : i64, scratch_operands = 0 : i64, tpu.core_type = #tpu.core_type<tc>} {
    %c0 = arith.constant 0 : index
    %c0_0 = arith.constant 0 : index
    %0 = vector.load %arg0[%c0, %c0_0] : memref<128x288xf32, #tpu.memory_space<vmem>>, vector<128x288xf32>
    %1 = arith.truncf %0 : vector<128x288xf32> to vector<128x288xbf16>
    %c0_1 = arith.constant 0 : index
    %c0_2 = arith.constant 0 : index
    %2 = vector.load %arg1[%c0_1, %c0_2] : memref<288x128xbf16, #tpu.memory_space<vmem>>, vector<288x128xbf16>
    %cst = arith.constant dense<0.000000e+00> : vector<128x128xf32>
    %3 = tpu.matmul %1, %2, %cst {dimension_numbers = #tpu.dot_dimension_numbers<[1], [0], [0], [1], [0, 0, 1, 1], [], []>} : vector<128x288xbf16>, vector<288x128xbf16>, vector<128x128xf32> -> vector<128x128xf32>
    %c0_3 = arith.constant 0 : index
    %c0_4 = arith.constant 0 : index
    %4 = vector.load %arg2[%c0_3, %c0_4] : memref<1x128xf32, #tpu.memory_space<vmem>>, vector<1x128xf32>
    %5 = vector.broadcast %4 : vector<1x128xf32> to vector<128x128xf32>
    %6 = arith.addf %3, %5 : vector<128x128xf32>
    %cst_5 = arith.constant dense<0.000000e+00> : vector<128xf32>
    %7 = vector.multi_reduction <add>, %6, %cst_5 [0] : vector<128x128xf32> to vector<128xf32>
    %8 = vector.shape_cast %7 : vector<128xf32> to vector<1x128xf32>
    %9 = arith.mulf %6, %6 : vector<128x128xf32>
    %cst_6 = arith.constant dense<0.000000e+00> : vector<128xf32>
    %10 = vector.multi_reduction <add>, %9, %cst_6 [0] : vector<128x128xf32> to vector<128xf32>
    %11 = vector.shape_cast %10 : vector<128xf32> to vector<1x128xf32>
    %12 = vector.extract_strided_slice %8 {offsets = [0, 0], sizes = [1, 32], strides = [1, 1]} : vector<1x128xf32> to vector<1x32xf32>
    %cst_7 = arith.constant 0.000000e+00 : f32
    %13 = vector.broadcast %cst_7 : f32 to vector<1x32xf32>
    %14 = arith.addf %13, %12 : vector<1x32xf32>
    %15 = vector.extract_strided_slice %8 {offsets = [0, 32], sizes = [1, 32], strides = [1, 1]} : vector<1x128xf32> to vector<1x32xf32>
    %16 = arith.addf %14, %15 : vector<1x32xf32>
    %17 = vector.extract_strided_slice %8 {offsets = [0, 64], sizes = [1, 32], strides = [1, 1]} : vector<1x128xf32> to vector<1x32xf32>
    %18 = arith.addf %16, %17 : vector<1x32xf32>
    %19 = vector.extract_strided_slice %8 {offsets = [0, 96], sizes = [1, 32], strides = [1, 1]} : vector<1x128xf32> to vector<1x32xf32>
    %20 = arith.addf %18, %19 : vector<1x32xf32>
    %21 = vector.extract_strided_slice %11 {offsets = [0, 0], sizes = [1, 32], strides = [1, 1]} : vector<1x128xf32> to vector<1x32xf32>
    %cst_8 = arith.constant 0.000000e+00 : f32
    %22 = vector.broadcast %cst_8 : f32 to vector<1x32xf32>
    %23 = arith.addf %22, %21 : vector<1x32xf32>
    %24 = vector.extract_strided_slice %11 {offsets = [0, 32], sizes = [1, 32], strides = [1, 1]} : vector<1x128xf32> to vector<1x32xf32>
    %25 = arith.addf %23, %24 : vector<1x32xf32>
    %26 = vector.extract_strided_slice %11 {offsets = [0, 64], sizes = [1, 32], strides = [1, 1]} : vector<1x128xf32> to vector<1x32xf32>
    %27 = arith.addf %25, %26 : vector<1x32xf32>
    %28 = vector.extract_strided_slice %11 {offsets = [0, 96], sizes = [1, 32], strides = [1, 1]} : vector<1x128xf32> to vector<1x32xf32>
    %29 = arith.addf %27, %28 : vector<1x32xf32>
    %cst_9 = arith.constant 0.001953125 : f32
    %30 = vector.broadcast %cst_9 : f32 to vector<1x32xf32>
    %31 = arith.mulf %20, %30 : vector<1x32xf32>
    %cst_10 = arith.constant 0.001953125 : f32
    %32 = vector.broadcast %cst_10 : f32 to vector<1x32xf32>
    %33 = arith.mulf %29, %32 : vector<1x32xf32>
    %34 = arith.mulf %31, %31 : vector<1x32xf32>
    %35 = arith.subf %33, %34 : vector<1x32xf32>
    %cst_11 = arith.constant 0.000000e+00 : f32
    %36 = vector.broadcast %cst_11 : f32 to vector<1x32xf32>
    %37 = arith.maximumf %35, %36 : vector<1x32xf32>
    %cst_12 = arith.constant 9.99999974E-6 : f32
    %38 = vector.broadcast %cst_12 : f32 to vector<1x32xf32>
    %39 = arith.addf %37, %38 : vector<1x32xf32>
    %40 = math.rsqrt %39 : vector<1x32xf32>
    %c0_13 = arith.constant 0 : index
    %c0_14 = arith.constant 0 : index
    %41 = vector.load %arg3[%c0_13, %c0_14] : memref<1x32xf32, #tpu.memory_space<vmem>>, vector<1x32xf32>
    %42 = arith.mulf %40, %41 : vector<1x32xf32>
    %c0_15 = arith.constant 0 : index
    %c0_16 = arith.constant 0 : index
    %43 = vector.load %arg4[%c0_15, %c0_16] : memref<1x32xf32, #tpu.memory_space<vmem>>, vector<1x32xf32>
    %44 = arith.mulf %31, %42 : vector<1x32xf32>
    %45 = arith.subf %43, %44 : vector<1x32xf32>
    %46 = tpu.concatenate %42, %42, %42, %42 in 1 : vector<1x32xf32>, vector<1x32xf32>, vector<1x32xf32>, vector<1x32xf32> -> vector<1x128xf32>
    %47 = tpu.concatenate %45, %45, %45, %45 in 1 : vector<1x32xf32>, vector<1x32xf32>, vector<1x32xf32>, vector<1x32xf32> -> vector<1x128xf32>
    %48 = vector.broadcast %46 : vector<1x128xf32> to vector<128x128xf32>
    %49 = arith.mulf %6, %48 : vector<128x128xf32>
    %50 = vector.broadcast %47 : vector<1x128xf32> to vector<128x128xf32>
    %51 = arith.addf %49, %50 : vector<128x128xf32>
    %cst_17 = arith.constant 0.000000e+00 : f32
    %52 = vector.broadcast %cst_17 : f32 to vector<128x128xf32>
    %53 = arith.maximumf %51, %52 : vector<128x128xf32>
    %c0_18 = arith.constant 0 : index
    %c0_19 = arith.constant 0 : index
    %54 = vector.load %arg5[%c0_18, %c0_19] : memref<128x128xf32, #tpu.memory_space<vmem>>, vector<128x128xf32>
    tpu.vector_store %arg5[%c0_18, %c0_19], %53 {strides = array<i32>} : memref<128x128xf32, #tpu.memory_space<vmem>>, vector<128x128xf32>,
    return
  }
}

module attributes {stable_mosaic.version = 11 : i64} {
  func.func @_recon_heads_kernel(%arg0: memref<512x32xf32, #tpu.memory_space<vmem>>, %arg1: memref<32x6xbf16, #tpu.memory_space<vmem>>, %arg2: memref<1x6xf32, #tpu.memory_space<vmem>>, %arg3: memref<512x3xf32, #tpu.memory_space<vmem>>, %arg4: memref<512x3xf32, #tpu.memory_space<vmem>>) attributes {dimension_semantics = [], scalar_prefetch = 0 : i64, scratch_operands = 0 : i64, tpu.core_type = #tpu.core_type<tc>} {
    %c0 = arith.constant 0 : index
    %c0_0 = arith.constant 0 : index
    %0 = vector.load %arg0[%c0, %c0_0] : memref<512x32xf32, #tpu.memory_space<vmem>>, vector<512x32xf32>
    %1 = arith.truncf %0 : vector<512x32xf32> to vector<512x32xbf16>
    %c0_1 = arith.constant 0 : index
    %c0_2 = arith.constant 0 : index
    %2 = vector.load %arg1[%c0_1, %c0_2] : memref<32x6xbf16, #tpu.memory_space<vmem>>, vector<32x6xbf16>
    %cst = arith.constant dense<0.000000e+00> : vector<512x6xf32>
    %3 = tpu.matmul %1, %2, %cst {dimension_numbers = #tpu.dot_dimension_numbers<[1], [0], [0], [1], [0, 0, 1, 1], [], []>} : vector<512x32xbf16>, vector<32x6xbf16>, vector<512x6xf32> -> vector<512x6xf32>
    %c0_3 = arith.constant 0 : index
    %c0_4 = arith.constant 0 : index
    %4 = vector.load %arg2[%c0_3, %c0_4] : memref<1x6xf32, #tpu.memory_space<vmem>>, vector<1x6xf32>
    %5 = vector.broadcast %4 : vector<1x6xf32> to vector<512x6xf32>
    %6 = arith.addf %3, %5 : vector<512x6xf32>
    %7 = vector.extract_strided_slice %6 {offsets = [0, 0], sizes = [512, 3], strides = [1, 1]} : vector<512x6xf32> to vector<512x3xf32>
    %8 = arith.negf %7 : vector<512x3xf32>
    %9 = math.exp %8 : vector<512x3xf32>
    %cst_5 = arith.constant 1.000000e+00 : f32
    %10 = vector.broadcast %cst_5 : f32 to vector<512x3xf32>
    %11 = arith.addf %10, %9 : vector<512x3xf32>
    %12 = arith.divf %10, %11 : vector<512x3xf32>
    %c0_6 = arith.constant 0 : index
    %c0_7 = arith.constant 0 : index
    %13 = vector.load %arg3[%c0_6, %c0_7] : memref<512x3xf32, #tpu.memory_space<vmem>>, vector<512x3xf32>
    tpu.vector_store %arg3[%c0_6, %c0_7], %12 {strides = array<i32>} : memref<512x3xf32, #tpu.memory_space<vmem>>, vector<512x3xf32>,
    %14 = vector.extract_strided_slice %6 {offsets = [0, 3], sizes = [512, 3], strides = [1, 1]} : vector<512x6xf32> to vector<512x3xf32>
    %cst_8 = arith.constant -2.000000e+00 : f32
    %cst_9 = arith.constant 2.000000e+00 : f32
    %15 = vector.broadcast %cst_8 : f32 to vector<512x3xf32>
    %16 = arith.maximumf %15, %14 : vector<512x3xf32>
    %17 = vector.broadcast %cst_9 : f32 to vector<512x3xf32>
    %18 = arith.minimumf %17, %16 : vector<512x3xf32>
    %c0_10 = arith.constant 0 : index
    %c0_11 = arith.constant 0 : index
    %19 = vector.load %arg4[%c0_10, %c0_11] : memref<512x3xf32, #tpu.memory_space<vmem>>, vector<512x3xf32>
    tpu.vector_store %arg4[%c0_10, %c0_11], %18 {strides = array<i32>} : memref<512x3xf32, #tpu.memory_space<vmem>>, vector<512x3xf32>,
    return
  }
}

</mosaic_0001>

<bundles_post_ra>
// kernel: vae_forward.6
= control target key start
LH: loop header
LB: loop body
LE: loop exit
PB: predicated region body
PF: predicated region fallthrough
CT: control target
= control target key end

     0   :  { %vm76_vm0 = vcmask 392192   ;;  %vm198_vm1 = vcmask 261120   ;;  %s749_s1 = inlined_call_operand.vmem [shape: bf16[48,32], index: 1, kind: input, shape index: {}]   ;;  %s750_s0 = inlined_call_operand.vmem [shape: f32[128,48], index: 0, kind: input, shape index: {}]   ;;  %s751_s2 = inlined_call_operand.vmem [shape: f32[1,32], index: 2, kind: input, shape index: {}]   ;;  %s752_s3 = inlined_call_operand.vmem [shape: f32[1,32], index: 3, kind: input, shape index: {}]   ;;  %s753_s4 = inlined_call_operand.vmem [shape: f32[1,32], index: 4, kind: input, shape index: {}]   ;;  %s754_s5 = inlined_call_operand.vmem [shape: f32[128,32], index: 5, kind: output, shape index: {}]  }
   0x1   :  { %v430_v0 = vld [vmem:[%s749_s1 + $0x10] sm:$0xff]   ;;  %v431_v1 = vld [vmem:[%s749_s1 + $0x8] sm:$0xff]   ;;  %v21_v2 = vld [vmem:[%s750_s0] sm:$0xff] }
   0x2   :  { %402 = vmatprep.subr.bf16.mxu0 %v430_v0  ;;  %424 = vmatprep.subr.bf16.mxu1 %v430_v0  ;;  %v22_v3 = vld [vmem:[%s750_s0 + $0x8] sm:$0xff]  ;;  %v432_v4 = vld [vmem:[%s749_s1] sm:$0xff]   ;;  %v23_v7 = vld [vmem:[%s750_s0 + $0x10] sm:$0xff] }
   0x3   :  { %403 = vmatpush3.bf16.msra.mxu0 %v430_v0  ;;  %427 = vmatpush3.bf16.msra.mxu1 %v430_v0  ;;  %v37_v5 = vpack.c.bf16 %v22_v3, %v21_v2  ;;  %v29_v6 = vld [vmem:[%s750_s0 + $0x40] sm:$0xff]  ;;  %v24_v8 = vld [vmem:[%s750_s0 + $0x18] sm:$0xff]  ;;  %v30_v9 = vld [vmem:[%s750_s0 + $0x48] sm:$0xff] }
   0x4   :  { %404 = vmatprep.subr.bf16.mxu0 %v431_v1  ;;  %425 = vmatprep.subr.bf16.mxu1 %v431_v1  ;;  %v25_v10 = vld [vmem:[%s750_s0 + $0x20] sm:$0xff]  ;;  %v41_v11 = vpack.c.bf16 %v30_v9, %v29_v6  ;;  %v31_v12 = vld [vmem:[%s750_s0 + $0x50] sm:$0xff]  ;;  %v32_v13 = vld [vmem:[%s750_s0 + $0x58] sm:$0xff]  ;;  %v38_v17 = vpack.c.bf16 %v24_v8, %v23_v7 }
   0x5   :  { %408 = vmatprep.mubr.msk.bf16.mxu0 %vm76_vm0, %v37_v5  ;;  %v26_v14 = vld [vmem:[%s750_s0 + $0x28] sm:$0xff]  ;;  %v33_v15 = vld [vmem:[%s750_s0 + $0x60] sm:$0xff]  ;;  %v42_v18 = vpack.c.bf16 %v32_v13, %v31_v12  ;;  %v27_v21 = vld [vmem:[%s750_s0 + $0x30] sm:$0xff] }
   0x6   :  { %v34_v16 = vld [vmem:[%s750_s0 + $0x68] sm:$0xff]  ;;  %416 = vmatprep.mubr.msk.bf16.mxu1 %vm76_vm0, %v41_v11  ;;  %v39_v19 = vpack.c.bf16 %v26_v14, %v25_v10  ;;  %v28_v22 = vld [vmem:[%s750_s0 + $0x38] sm:$0xff]  ;;  %v35_v23 = vld [vmem:[%s750_s0 + $0x70] sm:$0xff] }
   0x7   :  { %405 = vmatpush3.bf16.msra.mxu0 %v431_v1  ;;  %428 = vmatpush3.bf16.msra.mxu1 %v431_v1  ;;  %v43_v20 = vpack.c.bf16 %v34_v16, %v33_v15  ;;  %v36_v24 = vld [vmem:[%s750_s0 + $0x78] sm:$0xff]  ;;  %v40_v25 = vpack.c.bf16 %v28_v22, %v27_v21  ;;  %v533_v29 = vld [vmem:[%s751_s2] ss:$0 sm:$0xff] }
   0x8   :  { %406 = vmatprep.subr.bf16.mxu0 %v432_v4  ;;  %426 = vmatprep.subr.bf16.mxu1 %v432_v4  ;;  %v44_v26 = vpack.c.bf16 %v36_v24, %v35_v23 }
   0xb   :  { %407 = vmatpush3.bf16.msra.mxu0 %v432_v4  ;;  %429 = vmatpush3.bf16.msra.mxu1 %v432_v4 }
   0xe   :  { %409 = vmatmul.mubr.msk.bf16.vlgmr.msra.gmra.mxu0 %vm76_vm0, %v38_v17  ;;  %417 = vmatmul.mubr.msk.bf16.vlgmr.msra.gmra.mxu1 %vm76_vm0, %v42_v18 }
   0xf   :  { %412 = vmatprep.mubr.msk.bf16.mxu0 %vm76_vm0, %v39_v19  ;;  %420 = vmatprep.mubr.msk.bf16.mxu1 %vm76_vm0, %v43_v20 }
  0x16   :  { %413 = vmatmul.mubr.msk.bf16.gmra.mxu0 %vm76_vm0, %v40_v25  ;;  %421 = vmatmul.mubr.msk.bf16.gmra.mxu1 %vm76_vm0, %v44_v26 }
  0xce   :  { %v410_v27 = vpop.f32.mrf.mxu0  ;;  %v418_v28 = vpop.f32.mrf.mxu1 }
  0xcf   :  { %v539_v35 = vadd.f32 %v410_v27, %v533_v29  ;;  %v603_v22 = vadd.f32 %v418_v28, %v533_v29 }
  0xd0   :  { %v135_v30 = vpop.f32.mrf.mxu0  ;;  %v167_v31 = vpop.f32.mrf.mxu1 }
  0xd1   :  { %v536_v32 = vadd.f32 %v533_v29, %v135_v30  ;;  %v238_v42 = vmul.f32 %v539_v35, %v539_v35  ;;  %v202_v46 = vsel %vm198_vm1, %v539_v35, 0.0  ;;  %v584_v6 = vadd.f32 %v533_v29, %v167_v31 }
  0xd2   :  { %v411_v33 = vpop.f32.mrf.mxu0  ;;  %v419_v34 = vpop.f32.mrf.mxu1 }
  0xd3   :  { %v236_v37 = vmul.f32 %v536_v32, %v536_v32  ;;  %v544_v38 = vadd.f32 %v411_v33, %v533_v29  ;;  %v199_v43 = vsel %vm198_vm1, %v536_v32, 0.0  ;;  %v255_v57 = vsel %vm198_vm1, %v238_v42, 0.0 }
  0xd4   :  { %v138_v36 = vpop.f32.mrf.mxu0  ;;  %v170_v41 = vpop.f32.mrf.mxu1  ;;  %v244_v24 = vmul.f32 %v584_v6, %v584_v6  ;;  %v214_v30 = vsel %vm198_vm1, %v584_v6, 0.0  ;;  %v613_v31 = vadd.f32 %v419_v34, %v533_v29 }
  0xd5   :  { %v547_v39 = vadd.f32 %v533_v29, %v138_v36  ;;  %v252_v49 = vsel %vm198_vm1, %v236_v37, 0.0  ;;  %v239_v50 = vmul.f32 %v544_v38, %v544_v38  ;;  %v204_v58 = vsel %vm198_vm1, %v544_v38, 0.0 }
  0xd6   :  { %v414_v40 = vpop.f32.mrf.mxu0  ;;  %v422_v56 = vpop.f32.mrf.mxu1  ;;  %v599_v17 = vadd.f32 %v533_v29, %v170_v41  ;;  %v267_v41 = vsel %vm198_vm1, %v244_v24, 0.0 }
  0xd7   :  { %v200_v44 = vsel %vm198_vm1, %v547_v39, 0.0  ;;  %v237_v45 = vmul.f32 %v547_v39, %v547_v39  ;;  %v570_v59 = vadd.f32 %v414_v40, %v533_v29  ;;  %v257_v0 = vsel %vm198_vm1, %v239_v50, 0.0 }
  0xd8   :  { %v201_v47 = vadd.f32 %v200_v44, %v199_v43  ;;  %v151_v48 = vpop.f32.mrf.mxu0  ;;  %v183_v7 = vpop.f32.mrf.mxu1  ;;  %v245_v28 = vmul.f32 %v599_v17, %v599_v17  ;;  %v246_v40 = vmul.f32 %v603_v22, %v603_v22  ;;  %v216_v42 = vsel %vm198_vm1, %v599_v17, 0.0 }
  0xd9   :  { %v253_v51 = vsel %vm198_vm1, %v237_v45, 0.0  ;;  %v564_v52 = vadd.f32 %v533_v29, %v151_v48  ;;  %v242_v8 = vmul.f32 %v570_v59, %v570_v59  ;;  %v210_v14 = vsel %vm198_vm1, %v570_v59, 0.0 }
  0xda   :  { %v203_v53 = vadd.f32 %v202_v46, %v201_v47  ;;  %v254_v54 = vadd.f32 %v253_v51, %v252_v49  ;;  %v415_v55 = vpop.f32.mrf.mxu0  ;;  %v423_v20 = vpop.f32.mrf.mxu1  ;;  %v623_v43 = vadd.f32 %v533_v29, %v183_v7  ;;  %v218_v45 = vsel %vm198_vm1, %v603_v22, 0.0 }
  0xdb   :  { %v240_v60 = vmul.f32 %v564_v52, %v564_v52  ;;  %v206_v1 = vsel %vm198_vm1, %v564_v52, 0.0  ;;  %v578_v2 = vadd.f32 %v415_v55, %v533_v29  ;;  %v263_v21 = vsel %vm198_vm1, %v242_v8, 0.0 }
  0xdc   :  { %v256_v61 = vadd.f32 %v255_v57, %v254_v54  ;;  %v205_v62 = vadd.f32 %v204_v58, %v203_v53  ;;  %v154_v63 = vpop.f32.mrf.mxu0  ;;  %v186_v37 = vpop.f32.mrf.mxu1  ;;  %v247_v46 = vmul.f32 %v613_v31, %v613_v31  ;;  %v269_v47 = vsel %vm198_vm1, %v245_v28, 0.0 }
  0xdd   :  { %v581_v3 = vadd.f32 %v533_v29, %v154_v63  ;;  %v259_v9 = vsel %vm198_vm1, %v240_v60, 0.0  ;;  %v243_v15 = vmul.f32 %v578_v2, %v578_v2  ;;  %v212_v23 = vsel %vm198_vm1, %v578_v2, 0.0 }
  0xde   :  { %v207_v4 = vadd.f32 %v206_v1, %v205_v62  ;;  %v258_v5 = vadd.f32 %v257_v0, %v256_v61  ;;  %v631_v48 = vadd.f32 %v533_v29, %v186_v37  ;;  %v271_v51 = vsel %vm198_vm1, %v246_v40, 0.0 }
  0xdf   :  { %v208_v10 = vsel %vm198_vm1, %v581_v3, 0.0  ;;  %v241_v11 = vmul.f32 %v581_v3, %v581_v3  ;;  %v265_v27 = vsel %vm198_vm1, %v243_v15, 0.0  ;;  %v220_v53 = vsel %vm198_vm1, %v613_v31, 0.0 }
  0xe0   :  { %v260_v12 = vadd.f32 %v259_v9, %v258_v5  ;;  %v209_v13 = vadd.f32 %v208_v10, %v207_v4  ;;  %v637_v54 = vadd.f32 %v422_v56, %v533_v29  ;;  %v248_v55 = vmul.f32 %v623_v43, %v623_v43 }
  0xe1   :  { %v261_v16 = vsel %vm198_vm1, %v241_v11, 0.0  ;;  %v273_v60 = vsel %vm198_vm1, %v247_v46, 0.0  ;;  %v222_v61 = vsel %vm198_vm1, %v623_v43, 0.0  ;;  %v645_v62 = vadd.f32 %v423_v20, %v533_v29 }
  0xe2   :  { %v211_v18 = vadd.f32 %v210_v14, %v209_v13  ;;  %v262_v19 = vadd.f32 %v261_v16, %v260_v12  ;;  %v249_v63 = vmul.f32 %v631_v48, %v631_v48  ;;  %v250_v56 = vmul.f32 %v637_v54, %v637_v54 }
  0xe3   :  { %v275_v4 = vsel %vm198_vm1, %v248_v55, 0.0  ;;  %v224_v5 = vsel %vm198_vm1, %v631_v48, 0.0  ;;  %v226_v9 = vsel %vm198_vm1, %v637_v54, 0.0  ;;  %v251_v29 = vmul.f32 %v645_v62, %v645_v62  ;;  %v298_v55 = vld [vmem:[%s753_s4] sm:$0x1] }
  0xe4   :  { %v264_v25 = vadd.f32 %v263_v21, %v262_v19  ;;  %v213_v26 = vadd.f32 %v212_v23, %v211_v18  ;;  %v277_v10 = vsel %vm198_vm1, %v249_v63, 0.0  ;;  %v279_v13 = vsel %vm198_vm1, %v250_v56, 0.0 }
  0xe5   :  { %v228_v14 = vsel %vm198_vm1, %v645_v62, 0.0  ;;  %v281_v18 = vsel %vm198_vm1, %v251_v29, 0.0  ;;  %v301_v46 = vlaneseq }
  0xe6   :  { %v215_v33 = vadd.f32 %v214_v30, %v213_v26  ;;  %v266_v36 = vadd.f32 %v265_v27, %v264_v25 }
  0xe8   :  { %v217_v44 = vadd.f32 %v216_v42, %v215_v33  ;;  %v268_v34 = vadd.f32 %v267_v41, %v266_v36 }
  0xea   :  { %v219_v49 = vadd.f32 %v218_v45, %v217_v44  ;;  %v270_v50 = vadd.f32 %v269_v47, %v268_v34  ;;  %v302_v47 = vshrl.u32 %v301_v46, 7 }
  0xec   :  { %v272_v57 = vadd.f32 %v271_v51, %v270_v50  ;;  %v221_v58 = vadd.f32 %v220_v53, %v219_v49  ;;  %v296_v49 = vld [vmem:[%s752_s3] sm:$0x1]  ;;  %v303_v50 = vsub.s32 0, %v302_v47 }
  0xee   :  { %v223_v0 = vadd.f32 %v222_v61, %v221_v58  ;;  %v274_v1 = vadd.f32 %v273_v60, %v272_v57 }
  0xf0   :  { %v276_v7 = vadd.f32 %v275_v4, %v274_v1  ;;  %v225_v8 = vadd.f32 %v224_v5, %v223_v0 }
  0xf2   :  { %v227_v11 = vadd.f32 %v226_v9, %v225_v8  ;;  %v278_v12 = vadd.f32 %v277_v10, %v276_v7 }
  0xf4   :  { %v229_v15 = vadd.f32 %v228_v14, %v227_v11  ;;  %v280_v16 = vadd.f32 %v279_v13, %v278_v12 }
  0xf6   :  { %v230_v19 = vrot.slane %v229_v15, 4  ;;  %v282_v20 = vadd.f32 %v281_v18, %v280_v16 }
  0xf8   :  { %v231_v21 = vadd.f32 %v230_v19, %v229_v15  ;;  %v283_v23 = vrot.slane %v282_v20, 4 }
  0xfa   :  { %v232_v24 = vrot.slane %v231_v21, 2  ;;  %v284_v25 = vadd.f32 %v283_v23, %v282_v20 }
  0xfc   :  { %v233_v26 = vadd.f32 %v232_v24, %v231_v21  ;;  %v285_v27 = vrot.slane %v284_v25, 2 }
  0xfe   :  { %v234_v30 = vrot.slane %v233_v26, 1  ;;  %v286_v28 = vadd.f32 %v285_v27, %v284_v25 }
 0x100   :  { %v235_v33 = vadd.f32 %v234_v30, %v233_v26  ;;  %v287_v36 = vrot.slane %v286_v28, 1 }
 0x102   :  { %v288_v37 = vadd.f32 %v287_v36, %v286_v28  ;;  %v289_v40 = vmul.f32 0.0078125, %v235_v33 }
 0x104   :  { %v290_v41 = vmul.f32 0.0078125, %v288_v37  ;;  %v291_v42 = vmul.f32 %v289_v40, %v289_v40 }
 0x106   :  { %v292_v44 = vsub.f32 %v290_v41, %v291_v42 }
 0x108   :  { %v293_v34 = vmax.f32 %v292_v44, 0.0 }
 0x10a   :  { %v294_v45 = vadd.f32 1e-05, %v293_v34 }
 0x10c   :  { %433 = vrsqrt.f32 %v294_v45 }
 0x119   :  { %v434_v51 = vpop.eup %433 }
 0x11a   :  { %v297_v53 = vmul.f32 %v434_v51, %v296_v49 }
 0x11c   :  { %v299_v57 = vmul.f32 %v297_v53, %v289_v40  ;;  %v304_v58 = vrot.slane %v297_v53, %v303_v50 }
 0x11e   :  { %v300_v60 = vsub.f32 %v298_v55, %v299_v57  ;;  %v305_v61 = vmul.f32 %v304_v58, %v536_v32  ;;  %v306_v63 = vmul.f32 %v304_v58, %v547_v39  ;;  %v307_v0 = vmul.f32 %v304_v58, %v539_v35 }
 0x11f   :  { %v308_v1 = vmul.f32 %v304_v58, %v544_v38  ;;  %v309_v56 = vmul.f32 %v304_v58, %v564_v52  ;;  %v310_v4 = vmul.f32 %v304_v58, %v581_v3  ;;  %v311_v5 = vmul.f32 %v304_v58, %v570_v59 }
 0x120   :  { %v312_v7 = vmul.f32 %v304_v58, %v578_v2  ;;  %v313_v8 = vmul.f32 %v304_v58, %v584_v6  ;;  %v314_v9 = vmul.f32 %v304_v58, %v599_v17  ;;  %v315_v32 = vmul.f32 %v304_v58, %v603_v22 }
 0x121   :  { %v316_v39 = vmul.f32 %v304_v58, %v613_v31  ;;  %v325_v29 = vrot.slane %v300_v60, %v303_v50  ;;  %v317_v35 = vmul.f32 %v304_v58, %v623_v43  ;;  %v318_v38 = vmul.f32 %v304_v58, %v631_v48 }
 0x122   :  { %v319_v52 = vmul.f32 %v304_v58, %v637_v54  ;;  %v320_v3 = vmul.f32 %v304_v58, %v645_v62 }
 0x123   :  { %v327_v59 = vadd.f32 %v325_v29, %v305_v61  ;;  %v328_v10 = vadd.f32 %v325_v29, %v306_v63  ;;  %v329_v2 = vadd.f32 %v325_v29, %v307_v0  ;;  %v330_v11 = vadd.f32 %v325_v29, %v308_v1 }
 0x124   :  { %v331_v6 = vadd.f32 %v325_v29, %v309_v56  ;;  %v332_v12 = vadd.f32 %v325_v29, %v310_v4  ;;  %v333_v17 = vadd.f32 %v325_v29, %v311_v5  ;;  %v334_v13 = vadd.f32 %v325_v29, %v312_v7 }
 0x125   :  { %v335_v22 = vadd.f32 %v325_v29, %v313_v8  ;;  %v336_v14 = vadd.f32 %v325_v29, %v314_v9  ;;  %v337_v31 = vadd.f32 %v325_v29, %v315_v32  ;;  %v338_v15 = vadd.f32 %v325_v29, %v316_v39 }
 0x126   :  { %v339_v16 = vadd.f32 %v325_v29, %v317_v35  ;;  %v340_v43 = vadd.f32 %v325_v29, %v318_v38  ;;  %v341_v18 = vadd.f32 %v325_v29, %v319_v52  ;;  %v342_v48 = vadd.f32 %v325_v29, %v320_v3 }
 0x127   :  { %v343_v19 = vmax.f32 %v327_v59, 0.0  ;;  %v344_v54 = vmax.f32 %v328_v10, 0.0  ;;  %v345_v20 = vmax.f32 %v329_v2, 0.0  ;;  %v346_v62 = vmax.f32 %v330_v11, 0.0 }
 0x128   :  { %v347_v21 = vmax.f32 %v331_v6, 0.0  ;;  %v348_v23 = vmax.f32 %v332_v12, 0.0  ;;  %v349_v24 = vmax.f32 %v333_v17, 0.0  ;;  %v350_v25 = vmax.f32 %v334_v13, 0.0 }
 0x129   :  { %v351_v26 = vmax.f32 %v335_v22, 0.0  ;;  %v352_v27 = vmax.f32 %v336_v14, 0.0  ;;  %v353_v30 = vmax.f32 %v337_v31, 0.0  ;;  %v354_v28 = vmax.f32 %v338_v15, 0.0  ;;  %359 = vst.msk [vmem:[%s754_s5] sm:$0xff] %vm198_vm1, %v343_v19  ;;  %360 = vst.msk [vmem:[%s754_s5 + $0x8] sm:$0xff] %vm198_vm1, %v344_v54 }
 0x12a   :  { %361 = vst.msk [vmem:[%s754_s5 + $0x10] sm:$0xff] %vm198_vm1, %v345_v20  ;;  %362 = vst.msk [vmem:[%s754_s5 + $0x18] sm:$0xff] %vm198_vm1, %v346_v62  ;;  %v355_v33 = vmax.f32 %v339_v16, 0.0  ;;  %v356_v36 = vmax.f32 %v340_v43, 0.0  ;;  %v357_v37 = vmax.f32 %v341_v18, 0.0  ;;  %v358_v40 = vmax.f32 %v342_v48, 0.0 }
 0x12b   :  { %363 = vst.msk [vmem:[%s754_s5 + $0x20] sm:$0xff] %vm198_vm1, %v347_v21  ;;  %364 = vst.msk [vmem:[%s754_s5 + $0x28] sm:$0xff] %vm198_vm1, %v348_v23 }
 0x12c   :  { %365 = vst.msk [vmem:[%s754_s5 + $0x30] sm:$0xff] %vm198_vm1, %v349_v24  ;;  %366 = vst.msk [vmem:[%s754_s5 + $0x38] sm:$0xff] %vm198_vm1, %v350_v25 }
 0x12d   :  { %367 = vst.msk [vmem:[%s754_s5 + $0x40] sm:$0xff] %vm198_vm1, %v351_v26  ;;  %368 = vst.msk [vmem:[%s754_s5 + $0x48] sm:$0xff] %vm198_vm1, %v352_v27 }
 0x12e   :  { %369 = vst.msk [vmem:[%s754_s5 + $0x50] sm:$0xff] %vm198_vm1, %v353_v30  ;;  %370 = vst.msk [vmem:[%s754_s5 + $0x58] sm:$0xff] %vm198_vm1, %v354_v28 }
 0x12f   :  { %371 = vst.msk [vmem:[%s754_s5 + $0x60] sm:$0xff] %vm198_vm1, %v355_v33  ;;  %372 = vst.msk [vmem:[%s754_s5 + $0x68] sm:$0xff] %vm198_vm1, %v356_v36 }
 0x130   :  { %373 = vst.msk [vmem:[%s754_s5 + $0x70] sm:$0xff] %vm198_vm1, %v357_v37  ;;  %374 = vst.msk [vmem:[%s754_s5 + $0x78] sm:$0xff] %vm198_vm1, %v358_v40 }

// kernel: vae_forward.7
= control target key start
LH: loop header
LB: loop body
LE: loop exit
PB: predicated region body
PF: predicated region fallthrough
CT: control target
= control target key end

     0   :  { %vm406_vm0 = vcmask 261120   ;;  %s821_s1 = inlined_call_operand.vmem [shape: bf16[512,32], index: 1, kind: input, shape index: {}]   ;;  %s822_s0 = inlined_call_operand.vmem [shape: f32[32,512], index: 0, kind: input, shape index: {}]   ;;  %s823_s2 = inlined_call_operand.vmem [shape: f32[1,32], index: 2, kind: input, shape index: {}]   ;;  %s824_s3 = inlined_call_operand.vmem [shape: f32[1,32], index: 3, kind: input, shape index: {}]   ;;  %s825_s4 = inlined_call_operand.vmem [shape: f32[1,32], index: 4, kind: input, shape index: {}]   ;;  %s826_s5 = inlined_call_operand.vmem [shape: f32[32,32], index: 5, kind: output, shape index: {}]  }
   0x1   :  { %v568_v0 = vld [vmem:[%s821_s1 + $0x78] sm:$0xff]   ;;  %v572_v4 = vld [vmem:[%s821_s1 + $0x70] sm:$0xff]   ;;  %v576_v8 = vld [vmem:[%s821_s1 + $0x68] sm:$0xff]  }
   0x2   :  { %v569_v1 = vld [vmem:[%s821_s1 + $0xf8] sm:$0xff]   ;;  %512 = vmatprep.subr.bf16.mxu0 %v568_v0  ;;  %v573_v5 = vld [vmem:[%s821_s1 + $0xf0] sm:$0xff]   ;;  %v577_v9 = vld [vmem:[%s821_s1 + $0xe8] sm:$0xff]  }
   0x3   :  { %v570_v2 = vld [vmem:[%s821_s1 + $0x38] sm:$0xff]   ;;  %540 = vmatprep.subr.bf16.mxu1 %v569_v1  ;;  %v574_v6 = vld [vmem:[%s821_s1 + $0x30] sm:$0xff]   ;;  %v578_v10 = vld [vmem:[%s821_s1 + $0x28] sm:$0xff]  }
   0x4   :  { %v571_v3 = vld [vmem:[%s821_s1 + $0xb8] sm:$0xff]   ;;  %513 = vmatpush3.bf16.msra.mxu0 %v570_v2  ;;  %v575_v7 = vld [vmem:[%s821_s1 + $0xb0] sm:$0xff]   ;;  %v579_v11 = vld [vmem:[%s821_s1 + $0xa8] sm:$0xff]  }
   0x5   :  { %541 = vmatpush3.bf16.msra.mxu1 %v571_v3  ;;  %514 = vmatprep.subr.bf16.mxu0 %v572_v4  ;;  %v580_v12 = vld [vmem:[%s821_s1 + $0x60] sm:$0xff]   ;;  %v584_v16 = vld [vmem:[%s821_s1 + $0x58] sm:$0xff]   ;;  %v588_v20 = vld [vmem:[%s821_s1 + $0x50] sm:$0xff]  }
   0x6   :  { %542 = vmatprep.subr.bf16.mxu1 %v573_v5  ;;  %v581_v13 = vld [vmem:[%s821_s1 + $0xe0] sm:$0xff]   ;;  %v585_v17 = vld [vmem:[%s821_s1 + $0xd8] sm:$0xff]   ;;  %v589_v21 = vld [vmem:[%s821_s1 + $0xd0] sm:$0xff]  }
   0x7   :  { %v582_v14 = vld [vmem:[%s821_s1 + $0x20] sm:$0xff]   ;;  %v586_v18 = vld [vmem:[%s821_s1 + $0x18] sm:$0xff]   ;;  %v590_v22 = vld [vmem:[%s821_s1 + $0x10] sm:$0xff]  }
   0x8   :  { %515 = vmatpush3.bf16.msra.mxu0 %v574_v6  ;;  %v583_v15 = vld [vmem:[%s821_s1 + $0xa0] sm:$0xff]   ;;  %v587_v19 = vld [vmem:[%s821_s1 + $0x98] sm:$0xff]   ;;  %v591_v23 = vld [vmem:[%s821_s1 + $0x90] sm:$0xff]  }
   0x9   :  { %543 = vmatpush3.bf16.msra.mxu1 %v575_v7  ;;  %516 = vmatprep.subr.bf16.mxu0 %v576_v8  ;;  %v592_v24 = vld [vmem:[%s821_s1 + $0x48] sm:$0xff]   ;;  %v596_v28 = vld [vmem:[%s821_s1 + $0x40] sm:$0xff]   ;;  %v24_v34 = vld [vmem:[%s822_s0 + $0x18] sm:$0xff] }
   0xa   :  { %544 = vmatprep.subr.bf16.mxu1 %v577_v9  ;;  %v593_v25 = vld [vmem:[%s821_s1 + $0xc8] sm:$0xff]   ;;  %v597_v29 = vld [vmem:[%s821_s1 + $0xc0] sm:$0xff]   ;;  %v28_v36 = vld [vmem:[%s822_s0 + $0x38] sm:$0xff] }
   0xb   :  { %v594_v26 = vld [vmem:[%s821_s1 + $0x8] sm:$0xff]   ;;  %v598_v30 = vld [vmem:[%s821_s1] sm:$0xff]   ;;  %v40_v39 = vpack.c.bf16 %v28_v36, %v24_v34  ;;  %v23_v41 = vld [vmem:[%s822_s0 + $0x10] sm:$0xff] }
   0xc   :  { %517 = vmatpush3.bf16.msra.mxu0 %v578_v10  ;;  %v595_v27 = vld [vmem:[%s821_s1 + $0x88] sm:$0xff]   ;;  %v599_v31 = vld [vmem:[%s821_s1 + $0x80] sm:$0xff]   ;;  %v27_v42 = vld [vmem:[%s822_s0 + $0x30] sm:$0xff] }
   0xd   :  { %545 = vmatpush3.bf16.msra.mxu1 %v579_v11  ;;  %518 = vmatprep.subr.bf16.mxu0 %v580_v12  ;;  %v22_v32 = vld [vmem:[%s822_s0 + $0x8] sm:$0xff]  ;;  %v21_v37 = vld [vmem:[%s822_s0] sm:$0xff]  ;;  %v39_v44 = vpack.c.bf16 %v27_v42, %v23_v41  ;;  %v32_v46 = vld [vmem:[%s822_s0 + $0x58] sm:$0xff] }
   0xe   :  { %546 = vmatprep.subr.bf16.mxu1 %v581_v13  ;;  %v26_v33 = vld [vmem:[%s822_s0 + $0x28] sm:$0xff]  ;;  %v25_v38 = vld [vmem:[%s822_s0 + $0x20] sm:$0xff]  ;;  %v36_v47 = vld [vmem:[%s822_s0 + $0x78] sm:$0xff]  ;;  %389 = vmatprep.mubr.bf16.mxu1 %v40_v39 }
   0xf   :  { %v38_v35 = vpack.c.bf16 %v26_v33, %v22_v32  ;;  %v37_v40 = vpack.c.bf16 %v25_v38, %v21_v37  ;;  %v30_v43 = vld [vmem:[%s822_s0 + $0x48] sm:$0xff]  ;;  %v44_v49 = vpack.c.bf16 %v36_v47, %v32_v46  ;;  %v29_v50 = vld [vmem:[%s822_s0 + $0x40] sm:$0xff]  ;;  %v31_v52 = vld [vmem:[%s822_s0 + $0x50] sm:$0xff] }
  0x10   :  { %519 = vmatpush3.bf16.msra.mxu0 %v582_v14  ;;  %v34_v45 = vld [vmem:[%s822_s0 + $0x68] sm:$0xff]  ;;  %v33_v51 = vld [vmem:[%s822_s0 + $0x60] sm:$0xff]  ;;  %v35_v53 = vld [vmem:[%s822_s0 + $0x70] sm:$0xff] }
  0x11   :  { %547 = vmatpush3.bf16.msra.mxu1 %v583_v15  ;;  %520 = vmatprep.subr.bf16.mxu0 %v584_v16  ;;  %v42_v48 = vpack.c.bf16 %v34_v45, %v30_v43  ;;  %v41_v54 = vpack.c.bf16 %v33_v51, %v29_v50  ;;  %v43_v55 = vpack.c.bf16 %v35_v53, %v31_v52  ;;  %v479_v61 = vld [vmem:[%s823_s2] ss:$0 sm:$0xff] }
  0x12   :  { %548 = vmatprep.subr.bf16.mxu1 %v585_v17  ;;  %340 = vmatprep.mubr.bf16.mxu0 %v38_v35 }
  0x14   :  { %521 = vmatpush3.bf16.msra.mxu0 %v586_v18 }
  0x15   :  { %549 = vmatpush3.bf16.msra.mxu1 %v587_v19  ;;  %522 = vmatprep.subr.bf16.mxu0 %v588_v20 }
  0x16   :  { %550 = vmatprep.subr.bf16.mxu1 %v589_v21 }
  0x18   :  { %523 = vmatpush3.bf16.msra.mxu0 %v590_v22 }
  0x19   :  { %551 = vmatpush3.bf16.msra.mxu1 %v591_v23  ;;  %524 = vmatprep.subr.bf16.mxu0 %v592_v24 }
  0x1a   :  { %552 = vmatprep.subr.bf16.mxu1 %v593_v25 }
  0x1c   :  { %525 = vmatpush3.bf16.msra.mxu0 %v594_v26 }
  0x1d   :  { %553 = vmatpush3.bf16.msra.mxu1 %v595_v27  ;;  %526 = vmatprep.subr.bf16.mxu0 %v596_v28 }
  0x1e   :  { %554 = vmatprep.subr.bf16.mxu1 %v597_v29 }
  0x20   :  { %527 = vmatpush3.bf16.msra.mxu0 %v598_v30 }
  0x21   :  { %555 = vmatpush3.bf16.msra.mxu1 %v599_v31 }
  0x23   :  { %341 = vmatmul.mubr.bf16.vlgmr.msra.gmra.mxu0 %v37_v40 }
  0x24   :  { %390 = vmatmul.mubr.bf16.vlgmr.msra.gmra.mxu1 %v39_v44  ;;  %348 = vmatprep.mubr.bf16.mxu0 %v42_v48 }
  0x25   :  { %397 = vmatprep.mubr.bf16.mxu1 %v44_v49 }
  0x2b   :  { %349 = vmatmul.mubr.bf16.gmra.mxu0 %v41_v54 }
  0x2c   :  { %398 = vmatmul.mubr.bf16.gmra.mxu1 %v43_v55 }
  0xe3   :  { %v528_v56 = vpop.f32.mrf.mxu0 }
  0xe4   :  { %v556_v57 = vpop.f32.mrf.mxu1 }
  0xe5   :  { %v529_v58 = vpop.f32.mrf.mxu0 }
  0xe6   :  { %v530_v59 = vadd.f32 %v529_v58, %v528_v56  ;;  %v557_v60 = vpop.f32.mrf.mxu1 }
  0xe7   :  { %v531_v62 = vpop.f32.mrf.mxu0  ;;  %v558_v5 = vadd.f32 %v557_v60, %v556_v57 }
  0xe8   :  { %v559_v63 = vpop.f32.mrf.mxu1  ;;  %v343_v1 = vadd.f32 %v530_v59, %v479_v61 }
  0xe9   :  { %v532_v0 = vpop.f32.mrf.mxu0 }
  0xea   :  { %v533_v2 = vadd.f32 %v532_v0, %v531_v62  ;;  %v560_v3 = vpop.f32.mrf.mxu1  ;;  %v779_v10 = vadd.f32 %v558_v5, %v343_v1 }
  0xeb   :  { %v534_v4 = vpop.f32.mrf.mxu0  ;;  %v561_v7 = vadd.f32 %v560_v3, %v559_v63  ;;  %v444_v63 = vld [vmem:[%s824_s3] sm:$0x1] }
  0xec   :  { %v346_v6 = vadd.f32 %v533_v2, %v479_v61  ;;  %v562_v8 = vpop.f32.mrf.mxu1  ;;  %v420_v20 = vmul.f32 %v779_v10, %v779_v10  ;;  %v407_v25 = vsel %vm406_vm0, %v779_v10, 0.0  ;;  %v446_v3 = vld [vmem:[%s825_s4] sm:$0x1] }
  0xed   :  { %v535_v9 = vpop.f32.mrf.mxu0 }
  0xee   :  { %v781_v11 = vadd.f32 %v561_v7, %v346_v6  ;;  %v536_v12 = vadd.f32 %v535_v9, %v534_v4  ;;  %v563_v13 = vpop.f32.mrf.mxu1  ;;  %v424_v32 = vsel %vm406_vm0, %v420_v20, 0.0 }
  0xef   :  { %v537_v14 = vpop.f32.mrf.mxu0  ;;  %v564_v17 = vadd.f32 %v563_v13, %v562_v8 }
  0xf0   :  { %v421_v15 = vmul.f32 %v781_v11, %v781_v11  ;;  %v351_v16 = vadd.f32 %v536_v12, %v479_v61  ;;  %v565_v18 = vpop.f32.mrf.mxu1  ;;  %v408_v21 = vsel %vm406_vm0, %v781_v11, 0.0 }
  0xf1   :  { %v538_v19 = vpop.f32.mrf.mxu0  ;;  %v409_v31 = vadd.f32 %v408_v21, %v407_v25 }
  0xf2   :  { %v400_v22 = vadd.f32 %v564_v17, %v351_v16  ;;  %v539_v23 = vadd.f32 %v538_v19, %v537_v14  ;;  %v566_v24 = vpop.f32.mrf.mxu1  ;;  %v425_v26 = vsel %vm406_vm0, %v421_v15, 0.0 }
  0xf3   :  { %v567_v30 = vadd.f32 %v566_v24, %v565_v18  ;;  %v426_v35 = vadd.f32 %v425_v26, %v424_v32 }
  0xf4   :  { %v410_v27 = vsel %vm406_vm0, %v400_v22, 0.0  ;;  %v422_v28 = vmul.f32 %v400_v22, %v400_v22  ;;  %v354_v29 = vadd.f32 %v539_v23, %v479_v61  ;;  %v449_v61 = vlaneseq }
  0xf5   :  { %v411_v36 = vadd.f32 %v410_v27, %v409_v31 }
  0xf6   :  { %v427_v33 = vsel %vm406_vm0, %v422_v28, 0.0  ;;  %v403_v34 = vadd.f32 %v567_v30, %v354_v29  ;;  %v450_v62 = vshrl.u32 %v449_v61, 7 }
  0xf7   :  { %v428_v39 = vadd.f32 %v427_v33, %v426_v35 }
  0xf8   :  { %v412_v37 = vsel %vm406_vm0, %v403_v34, 0.0  ;;  %v423_v38 = vmul.f32 %v403_v34, %v403_v34  ;;  %v451_v0 = vsub.s32 0, %v450_v62 }
  0xf9   :  { %v413_v40 = vadd.f32 %v412_v37, %v411_v36 }
  0xfa   :  { %v429_v41 = vsel %vm406_vm0, %v423_v38, 0.0 }
  0xfb   :  { %v414_v42 = vrot.slane %v413_v40, 4  ;;  %v430_v43 = vadd.f32 %v429_v41, %v428_v39 }
  0xfd   :  { %v415_v44 = vadd.f32 %v414_v42, %v413_v40  ;;  %v431_v45 = vrot.slane %v430_v43, 4 }
  0xff   :  { %v416_v46 = vrot.slane %v415_v44, 2  ;;  %v432_v47 = vadd.f32 %v431_v45, %v430_v43 }
 0x101   :  { %v417_v48 = vadd.f32 %v416_v46, %v415_v44  ;;  %v433_v49 = vrot.slane %v432_v47, 2 }
 0x103   :  { %v418_v50 = vrot.slane %v417_v48, 1  ;;  %v434_v51 = vadd.f32 %v433_v49, %v432_v47 }
 0x105   :  { %v419_v52 = vadd.f32 %v418_v50, %v417_v48  ;;  %v435_v53 = vrot.slane %v434_v51, 1 }
 0x107   :  { %v436_v54 = vadd.f32 %v435_v53, %v434_v51  ;;  %v437_v55 = vmul.f32 0.03125, %v419_v52 }
 0x109   :  { %v438_v56 = vmul.f32 0.03125, %v436_v54  ;;  %v439_v57 = vmul.f32 %v437_v55, %v437_v55 }
 0x10b   :  { %v440_v58 = vsub.f32 %v438_v56, %v439_v57 }
 0x10d   :  { %v441_v59 = vmax.f32 %v440_v58, 0.0 }
 0x10f   :  { %v442_v60 = vadd.f32 1e-05, %v441_v59 }
 0x111   :  { %600 = vrsqrt.f32 %v442_v60 }
 0x11e   :  { %v601_v1 = vpop.eup %600 }
 0x11f   :  { %v445_v2 = vmul.f32 %v601_v1, %v444_v63 }
 0x121   :  { %v447_v4 = vmul.f32 %v445_v2, %v437_v55  ;;  %v452_v5 = vrot.slane %v445_v2, %v451_v0 }
 0x123   :  { %v448_v6 = vsub.f32 %v446_v3, %v447_v4  ;;  %v453_v7 = vmul.f32 %v452_v5, %v779_v10  ;;  %v454_v8 = vmul.f32 %v452_v5, %v781_v11  ;;  %v455_v9 = vmul.f32 %v452_v5, %v400_v22 }
 0x124   :  { %v456_v12 = vmul.f32 %v452_v5, %v403_v34 }
 0x125   :  { %v461_v13 = vrot.slane %v448_v6, %v451_v0 }
 0x127   :  { %v463_v14 = vadd.f32 %v461_v13, %v453_v7  ;;  %v464_v15 = vadd.f32 %v461_v13, %v454_v8  ;;  %v465_v16 = vadd.f32 %v461_v13, %v455_v9  ;;  %v466_v17 = vadd.f32 %v461_v13, %v456_v12 }
 0x129   :  { %v467_v18 = vmax.f32 %v463_v14, 0.0  ;;  %v468_v19 = vmax.f32 %v464_v15, 0.0  ;;  %v469_v20 = vmax.f32 %v465_v16, 0.0  ;;  %v470_v21 = vmax.f32 %v466_v17, 0.0 }
 0x12b   :  { %471 = vst.msk [vmem:[%s826_s5] sm:$0xff] %vm406_vm0, %v467_v18  ;;  %472 = vst.msk [vmem:[%s826_s5 + $0x8] sm:$0xff] %vm406_vm0, %v468_v19 }
 0x12c   :  { %473 = vst.msk [vmem:[%s826_s5 + $0x10] sm:$0xff] %vm406_vm0, %v469_v20  ;;  %474 = vst.msk [vmem:[%s826_s5 + $0x18] sm:$0xff] %vm406_vm0, %v470_v21 }

// kernel: vae_forward.8
= control target key start
LH: loop header
LB: loop body
LE: loop exit
PB: predicated region body
PF: predicated region fallthrough
CT: control target
= control target key end

     0   :  { %12 = vsyncpa [#allocation3], 0  ;;  %vm192_vm0 = vcmask 261120   ;;  %s750_s0 = inlined_call_operand.vmem [shape: f32[32,288], index: 0, kind: input, shape index: {}]   ;;  %s751_s1 = inlined_call_operand.vmem [shape: bf16[288,64], index: 1, kind: input, shape index: {}]   ;;  %s752_s2 = inlined_call_operand.vmem [shape: f32[1,64], index: 2, kind: input, shape index: {}]   ;;  %s753_s3 = inlined_call_operand.vmem [shape: f32[32,32], index: 3, kind: input, shape index: {}]   ;;  %s754_s4 = inlined_call_operand.hbm [shape: f32[32,32], index: 4, kind: output, shape index: {0}]   ;;  %s755_s5 = inlined_call_operand.hbm [shape: f32[32,32], index: 5, kind: output, shape index: {1}]   ;;  %s756_s6 = inlined_call_operand.vmem [shape: f32[32,32], index: 6, kind: output, shape index: {2}]  }
   0x1   :  { %v479_v0 = vld [vmem:[%s751_s1 + $0x78] sm:$0xff]   ;;  %v481_v2 = vld [vmem:[%s751_s1 + $0x70] sm:$0xff]   ;;  %v483_v4 = vld [vmem:[%s751_s1 + $0x68] sm:$0xff]  }
   0x2   :  { %v480_v1 = vld [vmem:[%s751_s1 + $0x38] sm:$0xff]   ;;  %434 = vmatprep.subr.bf16.mxu0 %v479_v0  ;;  %v482_v3 = vld [vmem:[%s751_s1 + $0x30] sm:$0xff]   ;;  %v484_v5 = vld [vmem:[%s751_s1 + $0x28] sm:$0xff]  }
   0x3   :  { %435 = vmatpush3.bf16.msra.mxu0 %v480_v1  ;;  %v485_v6 = vld [vmem:[%s751_s1 + $0x60] sm:$0xff]   ;;  %v487_v8 = vld [vmem:[%s751_s1 + $0x58] sm:$0xff]   ;;  %v494_v10 = vld [vmem:[%s751_s1 + $0x88] sm:$0xff]  }
   0x4   :  { %436 = vmatprep.subr.bf16.mxu0 %v481_v2  ;;  %v486_v7 = vld [vmem:[%s751_s1 + $0x20] sm:$0xff]   ;;  %v488_v9 = vld [vmem:[%s751_s1 + $0x18] sm:$0xff]   ;;  %v489_v11 = vld [vmem:[%s751_s1 + $0x50] sm:$0xff]   ;;  %466 = vmatprep.subr.bf16.mxu1 %v494_v10 }
   0x5   :  { %v24_v12 = vld [vmem:[%s750_s0 + $0x8] sm:$0xff]  ;;  %v27_v13 = vld [vmem:[%s750_s0 + $0x20] sm:$0xff]  ;;  %v490_v14 = vld [vmem:[%s751_s1 + $0x10] sm:$0xff]   ;;  %467 = vmatpush3.bf16.msra.mxu1 %v494_v10 }
   0x6   :  { %v36_v15 = vpack.c.bf16 %v27_v13, %v24_v12  ;;  %v496_v16 = vld [vmem:[%s751_s1 + $0x80] sm:$0xff]   ;;  %v25_v17 = vld [vmem:[%s750_s0 + $0x10] sm:$0xff]  ;;  %v28_v18 = vld [vmem:[%s750_s0 + $0x28] sm:$0xff] }
   0x7   :  { %437 = vmatpush3.bf16.msra.mxu0 %v482_v3  ;;  %v491_v19 = vld [vmem:[%s751_s1 + $0x48] sm:$0xff]   ;;  %v37_v20 = vpack.c.bf16 %v28_v18, %v25_v17  ;;  %v31_v21 = vld [vmem:[%s750_s0 + $0x40] sm:$0xff]  ;;  %v34_v22 = vld [vmem:[%s750_s0 + $0x58] sm:$0xff]  ;;  %468 = vmatprep.subr.bf16.mxu1 %v496_v16 }
   0x8   :  { %438 = vmatprep.subr.bf16.mxu0 %v483_v4  ;;  %231 = vmatprep.mubr.bf16.mxu0 %v36_v15  ;;  %v40_v23 = vpack.c.bf16 %v34_v22, %v31_v21 }
   0x9   :  { %469 = vmatpush3.bf16.msra.mxu1 %v496_v16  ;;  %470 = vmatprep.mubr.msk.bf16.mxu1 %vm192_vm0, %v37_v20 }
   0xb   :  { %439 = vmatpush3.bf16.msra.mxu0 %v484_v5 }
   0xc   :  { %440 = vmatprep.subr.bf16.mxu0 %v485_v6 }
   0xf   :  { %441 = vmatpush3.bf16.msra.mxu0 %v486_v7 }
  0x10   :  { %442 = vmatprep.subr.bf16.mxu0 %v487_v8 }
  0x13   :  { %443 = vmatpush3.bf16.msra.mxu0 %v488_v9 }
  0x14   :  { %444 = vmatprep.subr.bf16.mxu0 %v489_v11 }
  0x15   :  { %13 = vsyncpa [#allocation5], 0  ;;  %v492_v24 = vld [vmem:[%s751_s1 + $0x8] sm:$0xff]   ;;  %v493_v25 = vld [vmem:[%s751_s1 + $0x40] sm:$0xff]   ;;  %471 = vmatmul.mubr.msk.bf16.vlgmr.msra.gmra.mxu1 %vm192_vm0, %v40_v23 }
  0x16   :  { %v495_v26 = vld [vmem:[%s751_s1] sm:$0xff]   ;;  %v26_v28 = vld [vmem:[%s750_s0 + $0x18] sm:$0xff]  ;;  %v33_v30 = vld [vmem:[%s750_s0 + $0x50] sm:$0xff] }
  0x17   :  { %445 = vmatpush3.bf16.msra.mxu0 %v490_v14  ;;  %v23_v27 = vld [vmem:[%s750_s0] sm:$0xff]  ;;  %v30_v29 = vld [vmem:[%s750_s0 + $0x38] sm:$0xff]  ;;  %v29_v33 = vld [vmem:[%s750_s0 + $0x30] sm:$0xff] }
  0x18   :  { %446 = vmatprep.subr.bf16.mxu0 %v491_v19  ;;  %v35_v31 = vpack.c.bf16 %v26_v28, %v23_v27  ;;  %v39_v32 = vpack.c.bf16 %v33_v30, %v30_v29  ;;  %v32_v34 = vld [vmem:[%s750_s0 + $0x48] sm:$0xff]  ;;  %v409_v40 = vld [vmem:[%s752_s2] ss:$0 sm:$0xff]  ;;  %s549_s0 = smov 96   ;;  %s550_s2 = smov [#allocation2]  }
  0x19   :  { %v38_v35 = vpack.c.bf16 %v32_v34, %v29_v33  ;;  %s378_s10 = sshll.u32 %s550_s2, 4  ;;  %s379_s10 = int_to_ptr.vmem [resolvable:$true] %s378_s10 }
  0x1a   :  { %s505_s11 = scalar_lea.vmem %s379_s10, 512  ;;  %p510_p1 = scmp.lt.s32.totalorder %s379_s10, %s379_s10 }
  0x1b   :  { %447 = vmatpush3.bf16.msra.mxu0 %v492_v24  ;;  %p506_p0 = scmp.ne.s32.totalorder %s379_s10, %s505_s11  ;;  %p511_p2 = scmp.lt.s32.totalorder %s505_s11, %s505_s11 }
  0x1c   :  { %448 = vmatprep.subr.bf16.mxu0 %v493_v25 }
  0x1d   :  { %p512_p3 = por %p511_p2, %p510_p1 }
  0x1f   :  { %449 = vmatpush3.bf16.msra.mxu0 %v495_v26  ;;  %p513_p4 = pnand %p512_p3, %p506_p0 }
  0x22   :  { %232 = vmatmul.mubr.bf16.vlgmr.msra.gmra.mxu0 %v35_v31 }
  0x23   :  { %239 = vmatprep.mubr.bf16.mxu0 %v39_v32 }
  0x2a   :  { %240 = vmatmul.mubr.bf16.gmra.mxu0 %v38_v35 }
  0xd5   :  { %v472_v36 = vpop.f32.mrf.mxu1 }
  0xd7   :  { %v282_v38 = vpop.f32.mrf.mxu1 }
  0xd9   :  { %v473_v43 = vpop.f32.mrf.mxu1 }
  0xdb   :  { %v285_v49 = vpop.f32.mrf.mxu1 }
  0xe2   :  { %v450_v37 = vpop.f32.mrf.mxu0 }
  0xe4   :  { %v451_v39 = vpop.f32.mrf.mxu0 }
  0xe5   :  { %v452_v41 = vadd.f32 %v451_v39, %v450_v37 }
  0xe6   :  { %v453_v42 = vpop.f32.mrf.mxu0 }
  0xe7   :  { %v234_v44 = vadd.f32 %v452_v41, %v409_v40 }
  0xe8   :  { %v454_v45 = vpop.f32.mrf.mxu0 }
  0xe9   :  { %v455_v46 = vadd.f32 %v454_v45, %v453_v42  ;;  %v684_v47 = vadd.f32 %v282_v38, %v234_v44 }
  0xea   :  { %v456_v48 = vpop.f32.mrf.mxu0 }
  0xeb   :  { %305 = vst.msk [vmem:[#allocation2] sm:$0xff] %vm192_vm0, %v684_v47  ;;  %v237_v50 = vadd.f32 %v455_v46, %v409_v40  ;;  %v430_v51 = vclamps-f32 %v684_v47, 2.0 }
  0xec   :  { %v457_v52 = vpop.f32.mrf.mxu0 }
  0xed   :  { %v458_v53 = vadd.f32 %v457_v52, %v456_v48  ;;  %v689_v54 = vadd.f32 %v285_v49, %v237_v50  ;;  %313 = vrot.lane.b32.xlu0 %v430_v51, %s549_s0  ;;  %v333_v55 = vmul.f32 0.5, %v430_v51 }
  0xee   :  { %v459_v56 = vpop.f32.mrf.mxu0 }
  0xef   :  { %v242_v57 = vadd.f32 %v458_v53, %v409_v40  ;;  %306 = vst.msk [vmem:[#allocation2 + $0x8] sm:$0xff] %vm192_vm0, %v689_v54  ;;  %v337_v58 = vmul.f32 1.442695, %v333_v55  ;;  %v431_v59 = vclamps-f32 %v689_v54, 2.0 }
  0xf0   :  { %v460_v60 = vpop.f32.mrf.mxu0 }
  0xf1   :  { %v291_v61 = vadd.f32 %v472_v36, %v242_v57  ;;  %497 = vpow2.f32 %v337_v58  ;;  %v461_v62 = vadd.f32 %v460_v60, %v459_v56  ;;  %315 = vrot.lane.b32.xlu1 %v431_v59, %s549_s0  ;;  %v334_v63 = vmul.f32 0.5, %v431_v59 }
  0xf3   :  { %v432_v0 = vclamps-f32 %v291_v61, 2.0  ;;  %307 = vst.msk [vmem:[#allocation2 + $0x10] sm:$0xff] %vm192_vm0, %v291_v61  ;;  %v245_v1 = vadd.f32 %v461_v62, %v409_v40  ;;  %v339_v2 = vmul.f32 1.442695, %v334_v63 }
  0xf5   :  { %v335_v3 = vmul.f32 0.5, %v432_v0  ;;  %v294_v4 = vadd.f32 %v473_v43, %v245_v1  ;;  %499 = vpow2.f32 %v339_v2 }
  0xf7   :  { %v341_v5 = vmul.f32 1.442695, %v335_v3  ;;  %v433_v6 = vclamps-f32 %v294_v4, 2.0  ;;  %308 = vst.msk [vmem:[#allocation2 + $0x18] sm:$0xff] %vm192_vm0, %v294_v4 }
  0xf9   :  { %501 = vpow2.f32 %v341_v5  ;;  %v336_v7 = vmul.f32 0.5, %v433_v6 }
  0xfb   :  { %v343_v8 = vmul.f32 1.442695, %v336_v7 }
  0xfd   :  { %503 = vpow2.f32 %v343_v8 }
  0xfe   :  { %v498_v9 = vpop.eup %497 }
  0xff   :  { %349 = vrot.lane.b32.xlu0 %v498_v9, %s549_s0 }
 0x102   :  { %v500_v10 = vpop.eup %499 }
 0x103   :  { %351 = vrot.lane.b32.xlu0 %v500_v10, %s549_s0 }
 0x104   :  { %516 = shalt.err (!%p513_p4)
}
 0x105   :  { %s551_s12 = smov 128   ;;  %s552_s13 = smov 8   ;;  %v329_v15 = vld [vmem:[%s753_s3] sm:$0xff]  ;;  %v330_v18 = vld [vmem:[%s753_s3 + $0x8] sm:$0xff]  ;;  %v331_v22 = vld [vmem:[%s753_s3 + $0x10] sm:$0xff] }
 0x106   :  { %384 = dma.vmem_to_hbm [thread:$0]  %s379_s10, 512, %s754_s4, [#allocation3], %s551_s12, %s551_s12, %s552_s13   ;;  %v502_v11 = vpop.eup %501 }
 0x107   :  { %353 = vrot.lane.b32.xlu1 %v502_v11, %s549_s0  ;;  %317 = vrot.lane.b32.xlu0 %v432_v0, %s549_s0  ;;  %v332_v27 = vld [vmem:[%s753_s3 + $0x18] sm:$0xff]  ;;  %s553_s27 = smov [#allocation4]  }
 0x108   :  { %s390_s28 = sshll.u32 %s553_s27, 4  ;;  %s391_s28 = int_to_ptr.vmem [resolvable:$true] %s390_s28 }
 0x109   :  { %s525_s3 = scalar_lea.vmem %s391_s28, 512  ;;  %p530_p6 = scmp.lt.s32.totalorder %s391_s28, %s391_s28 }
 0x10a   :  { %v504_v12 = vpop.eup %503  ;;  %p526_p5 = scmp.ne.s32.totalorder %s391_s28, %s525_s3  ;;  %p531_p7 = scmp.lt.s32.totalorder %s525_s3, %s525_s3 }
 0x10b   :  { %355 = vrot.lane.b32.xlu1 %v504_v12, %s549_s0 }
 0x10c   :  { %p532_p8 = por %p531_p7, %p530_p6 }
 0x10e   :  { %p533_p9 = pnand %p532_p8, %p526_p5 }
 0x10f   :  { %319 = vrot.lane.b32.xlu1 %v433_v6, %s549_s0 }
 0x15f   :  { %v314_v13 = vpop.permute.xlu0 %313 }
 0x160   :  { %325 = vst.msk [vmem:[#allocation4] sm:$0xff] %vm192_vm0, %v314_v13 }
 0x163   :  { %v316_v14 = vpop.permute.xlu1 %315 }
 0x164   :  { %326 = vst.msk [vmem:[#allocation4 + $0x8] sm:$0xff] %vm192_vm0, %v316_v14 }
 0x171   :  { %v350_v16 = vpop.permute.xlu0 %349 }
 0x172   :  { %v361_v17 = vmul.f32 %v350_v16, %v329_v15 }
 0x174   :  { %v365_v19 = vadd.f32 %v361_v17, %v684_v47 }
 0x175   :  { %v352_v20 = vpop.permute.xlu0 %351 }
 0x176   :  { %369 = vst.msk [vmem:[%s756_s6] sm:$0xff] %vm192_vm0, %v365_v19  ;;  %v362_v21 = vmul.f32 %v352_v20, %v330_v18 }
 0x178   :  { %v366_v23 = vadd.f32 %v362_v21, %v689_v54 }
 0x179   :  { %v354_v24 = vpop.permute.xlu1 %353  ;;  %v318_v25 = vpop.permute.xlu0 %317 }
 0x17a   :  { %370 = vst.msk [vmem:[%s756_s6 + $0x8] sm:$0xff] %vm192_vm0, %v366_v23  ;;  %v363_v26 = vmul.f32 %v354_v24, %v331_v22  ;;  %327 = vst.msk [vmem:[#allocation4 + $0x10] sm:$0xff] %vm192_vm0, %v318_v25 }
 0x17c   :  { %v367_v28 = vadd.f32 %v363_v26, %v291_v61 }
 0x17d   :  { %v356_v29 = vpop.permute.xlu1 %355 }
 0x17e   :  { %371 = vst.msk [vmem:[%s756_s6 + $0x10] sm:$0xff] %vm192_vm0, %v367_v28  ;;  %v364_v30 = vmul.f32 %v356_v29, %v332_v27 }
 0x180   :  { %v368_v31 = vadd.f32 %v364_v30, %v294_v4 }
 0x181   :  { %v320_v32 = vpop.permute.xlu1 %319 }
 0x182   :  { %372 = vst.msk [vmem:[%s756_s6 + $0x18] sm:$0xff] %vm192_vm0, %v368_v31  ;;  %328 = vst.msk [vmem:[#allocation4 + $0x18] sm:$0xff] %vm192_vm0, %v320_v32 }
 0x183   :  { %536 = shalt.err (!%p533_p9)
}
 0x184   :  { %396 = dma.vmem_to_hbm [thread:$0]  %s391_s28, 512, %s755_s5, [#allocation5], %s551_s12, %s551_s12, %s552_s13  }
 0x185   :  { %545 = dma.done.wait [#allocation3], 512  }
 0x186   :  { %546 = vsyncadd [#allocation3], 4294966784 }
 0x187   :  { %547 = dma.done.wait [#allocation5], 512  }
 0x188   :  { %548 = vsyncadd [#allocation5], 4294966784 }
 0x189   :  { %407 = vsyncpa [#allocation3], 1 }
 0x18a   :  { %408 = vsyncpa [#allocation5], 1 }

// kernel: vae_forward.9
= control target key start
LH: loop header
LB: loop body
LE: loop exit
PB: predicated region body
PF: predicated region fallthrough
CT: control target
= control target key end

     0   :  { %vm190_vm0 = vcmask 261120   ;;  %s503_s29 = smov 64   ;;  %vm368_vm1 = vcmask 523264   ;;  %vm370_vm2 = vcmask 785408   ;;  %s685_s1 = inlined_call_operand.vmem [shape: bf16[288,128], index: 1, kind: input, shape index: {}]   ;;  %s686_s0 = inlined_call_operand.vmem [shape: f32[32,288], index: 0, kind: input, shape index: {}]   ;;  %s687_s2 = inlined_call_operand.vmem [shape: f32[1,128], index: 2, kind: input, shape index: {}]   ;;  %s688_s3 = inlined_call_operand.vmem [shape: f32[1,32], index: 3, kind: input, shape index: {}]   ;;  %s689_s4 = inlined_call_operand.vmem [shape: f32[1,32], index: 4, kind: input, shape index: {}]   ;;  %s690_s5 = inlined_call_operand.vmem [shape: f32[32,128], index: 5, kind: output, shape index: {}]  }
   0x1   :  { %v481_v0 = vld [vmem:[%s685_s1 + $0x78] sm:$0xff]   ;;  %v483_v2 = vld [vmem:[%s685_s1 + $0x70] sm:$0xff]   ;;  %v485_v4 = vld [vmem:[%s685_s1 + $0x68] sm:$0xff]  }
   0x2   :  { %v482_v1 = vld [vmem:[%s685_s1 + $0x38] sm:$0xff]   ;;  %438 = vmatprep.subr.bf16.mxu0 %v481_v0  ;;  %v484_v3 = vld [vmem:[%s685_s1 + $0x30] sm:$0xff]   ;;  %v486_v5 = vld [vmem:[%s685_s1 + $0x28] sm:$0xff]  }
   0x3   :  { %439 = vmatpush3.bf16.msra.mxu0 %v482_v1  ;;  %v487_v6 = vld [vmem:[%s685_s1 + $0x60] sm:$0xff]   ;;  %v489_v8 = vld [vmem:[%s685_s1 + $0x58] sm:$0xff]   ;;  %v495_v9 = vld [vmem:[%s685_s1 + $0x88] sm:$0xff]  }
   0x4   :  { %440 = vmatprep.subr.bf16.mxu0 %v483_v2  ;;  %v488_v7 = vld [vmem:[%s685_s1 + $0x20] sm:$0xff]   ;;  %v490_v10 = vld [vmem:[%s685_s1 + $0x18] sm:$0xff]   ;;  %v491_v11 = vld [vmem:[%s685_s1 + $0x50] sm:$0xff]   ;;  %470 = vmatprep.subr.bf16.mxu1 %v495_v9 }
   0x5   :  { %471 = vmatpush3.bf16.msra.mxu1 %v495_v9  ;;  %v498_v12 = vld [vmem:[%s685_s1 + $0x80] sm:$0xff]   ;;  %v22_v13 = vld [vmem:[%s686_s0 + $0x8] sm:$0xff]  ;;  %v492_v15 = vld [vmem:[%s685_s1 + $0x10] sm:$0xff]  }
   0x6   :  { %v25_v14 = vld [vmem:[%s686_s0 + $0x20] sm:$0xff]  ;;  %472 = vmatprep.subr.bf16.mxu1 %v498_v12  ;;  %v23_v17 = vld [vmem:[%s686_s0 + $0x10] sm:$0xff]  ;;  %v26_v18 = vld [vmem:[%s686_s0 + $0x28] sm:$0xff] }
   0x7   :  { %441 = vmatpush3.bf16.msra.mxu0 %v484_v3  ;;  %v34_v16 = vpack.c.bf16 %v25_v14, %v22_v13  ;;  %v493_v19 = vld [vmem:[%s685_s1 + $0x48] sm:$0xff]   ;;  %v35_v20 = vpack.c.bf16 %v26_v18, %v23_v17  ;;  %v29_v21 = vld [vmem:[%s686_s0 + $0x40] sm:$0xff]  ;;  %v32_v22 = vld [vmem:[%s686_s0 + $0x58] sm:$0xff] }
   0x8   :  { %442 = vmatprep.subr.bf16.mxu0 %v485_v4  ;;  %v38_v23 = vpack.c.bf16 %v32_v22, %v29_v21  ;;  %v494_v24 = vld [vmem:[%s685_s1 + $0x8] sm:$0xff]   ;;  %v496_v25 = vld [vmem:[%s685_s1 + $0x40] sm:$0xff]   ;;  %v24_v28 = vld [vmem:[%s686_s0 + $0x18] sm:$0xff] }
   0x9   :  { %229 = vmatprep.mubr.bf16.mxu0 %v34_v16  ;;  %473 = vmatpush3.bf16.msra.mxu1 %v498_v12  ;;  %v497_v26 = vld [vmem:[%s685_s1] sm:$0xff]   ;;  %v28_v29 = vld [vmem:[%s686_s0 + $0x38] sm:$0xff]  ;;  %v31_v30 = vld [vmem:[%s686_s0 + $0x50] sm:$0xff] }
   0xa   :  { %474 = vmatprep.mubr.msk.bf16.mxu1 %vm190_vm0, %v35_v20  ;;  %v21_v27 = vld [vmem:[%s686_s0] sm:$0xff]  ;;  %v37_v32 = vpack.c.bf16 %v31_v30, %v28_v29  ;;  %v27_v33 = vld [vmem:[%s686_s0 + $0x30] sm:$0xff]  ;;  %v30_v34 = vld [vmem:[%s686_s0 + $0x48] sm:$0xff]  ;;  %s501_s0 = smov 32  }
   0xb   :  { %443 = vmatpush3.bf16.msra.mxu0 %v486_v5  ;;  %v33_v31 = vpack.c.bf16 %v24_v28, %v21_v27  ;;  %v36_v35 = vpack.c.bf16 %v30_v34, %v27_v33  ;;  %v417_v42 = vld [vmem:[%s687_s2] ss:$0 sm:$0xff]  ;;  %s502_s2 = smov 96  }
   0xc   :  { %444 = vmatprep.subr.bf16.mxu0 %v487_v6  ;;  %475 = vmatmul.mubr.msk.bf16.vlgmr.msra.gmra.mxu1 %vm190_vm0, %v38_v23 }
   0xf   :  { %445 = vmatpush3.bf16.msra.mxu0 %v488_v7 }
  0x10   :  { %446 = vmatprep.subr.bf16.mxu0 %v489_v8 }
  0x13   :  { %447 = vmatpush3.bf16.msra.mxu0 %v490_v10 }
  0x14   :  { %448 = vmatprep.subr.bf16.mxu0 %v491_v11 }
  0x17   :  { %449 = vmatpush3.bf16.msra.mxu0 %v492_v15 }
  0x18   :  { %450 = vmatprep.subr.bf16.mxu0 %v493_v19 }
  0x1b   :  { %451 = vmatpush3.bf16.msra.mxu0 %v494_v24 }
  0x1c   :  { %452 = vmatprep.subr.bf16.mxu0 %v496_v25 }
  0x1f   :  { %453 = vmatpush3.bf16.msra.mxu0 %v497_v26 }
  0x22   :  { %230 = vmatmul.mubr.bf16.vlgmr.msra.gmra.mxu0 %v33_v31 }
  0x23   :  { %237 = vmatprep.mubr.bf16.mxu0 %v37_v32 }
  0x2a   :  { %238 = vmatmul.mubr.bf16.gmra.mxu0 %v36_v35 }
  0xcc   :  { %v476_v36 = vpop.f32.mrf.mxu1 }
  0xce   :  { %v280_v39 = vpop.f32.mrf.mxu1 }
  0xd0   :  { %v477_v44 = vpop.f32.mrf.mxu1 }
  0xd2   :  { %v283_v49 = vpop.f32.mrf.mxu1 }
  0xe2   :  { %v454_v37 = vpop.f32.mrf.mxu0 }
  0xe4   :  { %v455_v38 = vpop.f32.mrf.mxu0 }
  0xe5   :  { %v456_v41 = vadd.f32 %v455_v38, %v454_v37  ;;  %v373_v37 = vlaneseq  ;;  %v352_v38 = vld [vmem:[%s688_s3] sm:$0x1] }
  0xe6   :  { %v457_v40 = vpop.f32.mrf.mxu0 }
  0xe7   :  { %v232_v47 = vadd.f32 %v456_v41, %v417_v42 }
  0xe8   :  { %v458_v43 = vpop.f32.mrf.mxu0 }
  0xe9   :  { %v459_v45 = vadd.f32 %v458_v43, %v457_v40  ;;  %v631_v54 = vadd.f32 %v280_v39, %v232_v47  ;;  %v374_v39 = vshrl.u32 %v373_v37, 7 }
  0xea   :  { %v460_v46 = vpop.f32.mrf.mxu0 }
  0xeb   :  { %v235_v48 = vadd.f32 %v459_v45, %v417_v42  ;;  %v304_v60 = vmul.f32 %v631_v54, %v631_v54 }
  0xec   :  { %v461_v50 = vpop.f32.mrf.mxu0 }
  0xed   :  { %v629_v51 = vadd.f32 %v283_v49, %v235_v48  ;;  %v462_v52 = vadd.f32 %v461_v50, %v460_v46 }
  0xee   :  { %v463_v53 = vpop.f32.mrf.mxu0 }
  0xef   :  { %v240_v55 = vadd.f32 %v462_v52, %v417_v42  ;;  %v305_v57 = vmul.f32 %v629_v51, %v629_v51  ;;  %v295_v61 = vadd.f32 %v629_v51, %v631_v54 }
  0xf0   :  { %v464_v56 = vpop.f32.mrf.mxu0 }
  0xf1   :  { %v635_v58 = vadd.f32 %v476_v36, %v240_v55  ;;  %v465_v59 = vadd.f32 %v464_v56, %v463_v53  ;;  %v308_v0 = vadd.f32 %v305_v57, %v304_v60 }
  0xf3   :  { %v306_v62 = vmul.f32 %v635_v58, %v635_v58  ;;  %v243_v63 = vadd.f32 %v465_v59, %v417_v42  ;;  %v296_v1 = vadd.f32 %v295_v61, %v635_v58  ;;  %v354_v42 = vld [vmem:[%s689_s4] sm:$0x1] }
  0xf5   :  { %v644_v2 = vadd.f32 %v477_v44, %v243_v63  ;;  %v309_v3 = vadd.f32 %v308_v0, %v306_v62  ;;  %v375_v44 = vsub.s32 0, %v374_v39 }
  0xf7   :  { %v297_v4 = vadd.f32 %v296_v1, %v644_v2  ;;  %v307_v5 = vmul.f32 %v644_v2, %v644_v2 }
  0xf9   :  { %v298_v6 = vrot.slane %v297_v4, 4  ;;  %v310_v7 = vadd.f32 %v309_v3, %v307_v5 }
  0xfb   :  { %v299_v8 = vadd.f32 %v298_v6, %v297_v4  ;;  %v311_v9 = vrot.slane %v310_v7, 4 }
  0xfd   :  { %v300_v10 = vrot.slane %v299_v8, 2  ;;  %v312_v11 = vadd.f32 %v311_v9, %v310_v7 }
  0xff   :  { %v301_v12 = vadd.f32 %v300_v10, %v299_v8  ;;  %v313_v13 = vrot.slane %v312_v11, 2 }
 0x101   :  { %v302_v14 = vrot.slane %v301_v12, 1  ;;  %v314_v15 = vadd.f32 %v313_v13, %v312_v11 }
 0x103   :  { %v303_v16 = vadd.f32 %v302_v14, %v301_v12  ;;  %v315_v17 = vrot.slane %v314_v15, 1 }
 0x105   :  { %327 = vrot.lane.b32.xlu1 %v303_v16, %s501_s0  ;;  %319 = vrot.lane.b32.xlu0 %v303_v16, %s502_s2  ;;  %v316_v18 = vadd.f32 %v315_v17, %v314_v15 }
 0x109   :  { %333 = vrot.lane.b32.xlu1 %v316_v18, %s502_s2  ;;  %323 = vrot.lane.b32.xlu0 %v303_v16, %s503_s29 }
 0x10d   :  { %341 = vrot.lane.b32.xlu1 %v316_v18, %s501_s0  ;;  %337 = vrot.lane.b32.xlu0 %v316_v18, %s503_s29 }
 0x177   :  { %v328_v19 = vpop.permute.xlu1 %327  ;;  %v320_v20 = vpop.permute.xlu0 %319 }
 0x178   :  { %v322_v21 = vadd.f32 %v320_v20, %v303_v16 }
 0x17b   :  { %v334_v22 = vpop.permute.xlu1 %333  ;;  %v324_v23 = vpop.permute.xlu0 %323 }
 0x17c   :  { %v326_v24 = vadd.f32 %v324_v23, %v322_v21  ;;  %v336_v25 = vadd.f32 %v334_v22, %v316_v18 }
 0x17e   :  { %v330_v26 = vadd.f32 %v328_v19, %v326_v24 }
 0x17f   :  { %v338_v27 = vpop.permute.xlu0 %337  ;;  %v342_v30 = vpop.permute.xlu1 %341 }
 0x180   :  { %v345_v28 = vmul.f32 0.0078125, %v330_v26  ;;  %v340_v29 = vadd.f32 %v338_v27, %v336_v25 }
 0x182   :  { %v344_v31 = vadd.f32 %v342_v30, %v340_v29  ;;  %v347_v32 = vmul.f32 %v345_v28, %v345_v28 }
 0x184   :  { %v346_v33 = vmul.f32 0.0078125, %v344_v31 }
 0x186   :  { %v348_v34 = vsub.f32 %v346_v33, %v347_v32 }
 0x188   :  { %v349_v35 = vmax.f32 %v348_v34, 0.0 }
 0x18a   :  { %v350_v36 = vadd.f32 1e-05, %v349_v35 }
 0x18c   :  { %499 = vrsqrt.f32 %v350_v36 }
 0x199   :  { %v500_v40 = vpop.eup %499 }
 0x19a   :  { %v353_v41 = vmul.f32 %v500_v40, %v352_v38 }
 0x19c   :  { %361 = vrot.lane.b32.xlu1 %v353_v41, %s503_s29  ;;  %358 = vrot.lane.b32.xlu0 %v353_v41, %s501_s0  ;;  %v355_v43 = vmul.f32 %v353_v41, %v345_v28 }
 0x19e   :  { %v356_v45 = vsub.f32 %v354_v42, %v355_v43 }
 0x1a0   :  { %364 = vrot.lane.b32.xlu0 %v353_v41, %s502_s2  ;;  %v376_v46 = vrot.slane %v356_v45, %v375_v44 }
 0x1a2   :  { %377 = vrot.lane.b32.xlu1 %v376_v46, %s501_s0 }
 0x1a4   :  { %380 = vrot.lane.b32.xlu0 %v376_v46, %s503_s29 }
 0x1a6   :  { %383 = vrot.lane.b32.xlu1 %v376_v46, %s502_s2 }
 0x20e   :  { %v359_v47 = vpop.permute.xlu0 %358  ;;  %v362_v48 = vpop.permute.xlu1 %361 }
 0x20f   :  { %v367_v49 = vsel %vm190_vm0, %v353_v41, %v359_v47 }
 0x210   :  { %v369_v50 = vsel %vm368_vm1, %v367_v49, %v362_v48 }
 0x212   :  { %v365_v52 = vpop.permute.xlu0 %364 }
 0x213   :  { %v371_v53 = vsel %vm370_vm2, %v369_v50, %v365_v52 }
 0x214   :  { %v378_v55 = vpop.permute.xlu1 %377  ;;  %v392_v56 = vrot.slane %v371_v53, %v375_v44 }
 0x215   :  { %v386_v57 = vsel %vm190_vm0, %v356_v45, %v378_v55 }
 0x216   :  { %v381_v59 = vpop.permute.xlu0 %380  ;;  %v393_v62 = vmul.f32 %v392_v56, %v631_v54  ;;  %v394_v0 = vmul.f32 %v392_v56, %v629_v51  ;;  %v395_v1 = vmul.f32 %v392_v56, %v635_v58  ;;  %v396_v3 = vmul.f32 %v392_v56, %v644_v2 }
 0x217   :  { %v387_v60 = vsel %vm368_vm1, %v386_v57, %v381_v59 }
 0x218   :  { %v384_v61 = vpop.permute.xlu1 %383 }
 0x219   :  { %v388_v63 = vsel %vm370_vm2, %v387_v60, %v384_v61 }
 0x21a   :  { %v400_v4 = vrot.slane %v388_v63, %v375_v44 }
 0x21c   :  { %v401_v5 = vadd.f32 %v400_v4, %v393_v62  ;;  %v402_v6 = vadd.f32 %v400_v4, %v394_v0  ;;  %v403_v7 = vadd.f32 %v400_v4, %v395_v1  ;;  %v404_v8 = vadd.f32 %v400_v4, %v396_v3 }
 0x21e   :  { %v405_v9 = vmax.f32 %v401_v5, 0.0  ;;  %v406_v10 = vmax.f32 %v402_v6, 0.0  ;;  %v407_v11 = vmax.f32 %v403_v7, 0.0  ;;  %v408_v12 = vmax.f32 %v404_v8, 0.0 }
 0x220   :  { %409 = vst [vmem:[%s690_s5] sm:$0xff] %v405_v9  ;;  %410 = vst [vmem:[%s690_s5 + $0x8] sm:$0xff] %v406_v10 }
 0x221   :  { %411 = vst [vmem:[%s690_s5 + $0x10] sm:$0xff] %v407_v11  ;;  %412 = vst [vmem:[%s690_s5 + $0x18] sm:$0xff] %v408_v12 }

// kernel: vae_forward.10
= control target key start
LH: loop header
LB: loop body
LE: loop exit
PB: predicated region body
PF: predicated region fallthrough
CT: control target
= control target key end

     0   :  { %vm244_vm0 = vcmask 261120   ;;  %s830_s23 = smov 96   ;;  %s831_s24 = smov 64   ;;  %vm572_vm1 = vcmask 523264   ;;  %vm574_vm2 = vcmask 785408   ;;  %s1281_s1 = inlined_call_operand.vmem [shape: bf16[288,128], index: 1, kind: input, shape index: {}]   ;;  %s1282_s0 = inlined_call_operand.vmem [shape: f32[128,288], index: 0, kind: input, shape index: {}]   ;;  %s1283_s2 = inlined_call_operand.vmem [shape: f32[1,128], index: 2, kind: input, shape index: {}]   ;;  %s1284_s3 = inlined_call_operand.vmem [shape: f32[1,32], index: 3, kind: input, shape index: {}]   ;;  %s1285_s4 = inlined_call_operand.vmem [shape: f32[1,32], index: 4, kind: input, shape index: {}]   ;;  %s1286_s5 = inlined_call_operand.vmem [shape: f32[128,128], index: 5, kind: output, shape index: {}]  }
   0x1   :  { %v809_v0 = vld [vmem:[%s1281_s1 + $0x78] sm:$0xff]   ;;  %v811_v2 = vld [vmem:[%s1281_s1 + $0x70] sm:$0xff]   ;;  %v813_v4 = vld [vmem:[%s1281_s1 + $0x68] sm:$0xff]  }
   0x2   :  { %v810_v1 = vld [vmem:[%s1281_s1 + $0x38] sm:$0xff]   ;;  %696 = vmatprep.subr.bf16.mxu0 %v809_v0  ;;  %790 = vmatprep.subr.bf16.mxu1 %v809_v0  ;;  %v812_v3 = vld [vmem:[%s1281_s1 + $0x30] sm:$0xff]   ;;  %v814_v5 = vld [vmem:[%s1281_s1 + $0x28] sm:$0xff]  }
   0x3   :  { %697 = vmatpush3.bf16.msra.mxu0 %v810_v1  ;;  %798 = vmatpush3.bf16.msra.mxu1 %v810_v1  ;;  %v815_v6 = vld [vmem:[%s1281_s1 + $0x60] sm:$0xff]   ;;  %v817_v8 = vld [vmem:[%s1281_s1 + $0x58] sm:$0xff]   ;;  %v819_v10 = vld [vmem:[%s1281_s1 + $0x50] sm:$0xff]  }
   0x4   :  { %698 = vmatprep.subr.bf16.mxu0 %v811_v2  ;;  %791 = vmatprep.subr.bf16.mxu1 %v811_v2  ;;  %v816_v7 = vld [vmem:[%s1281_s1 + $0x20] sm:$0xff]   ;;  %v818_v9 = vld [vmem:[%s1281_s1 + $0x18] sm:$0xff]   ;;  %v22_v11 = vld [vmem:[%s1282_s0 + $0x8] sm:$0xff] }
   0x5   :  { %v25_v12 = vld [vmem:[%s1282_s0 + $0x20] sm:$0xff]  ;;  %v58_v13 = vld [vmem:[%s1282_s0 + $0x128] sm:$0xff]  ;;  %v820_v17 = vld [vmem:[%s1281_s1 + $0x10] sm:$0xff]  }
   0x6   :  { %v70_v14 = vpack.c.bf16 %v25_v12, %v22_v11  ;;  %v61_v15 = vld [vmem:[%s1282_s0 + $0x140] sm:$0xff]  ;;  %v821_v18 = vld [vmem:[%s1281_s1 + $0x48] sm:$0xff]   ;;  %v24_v23 = vld [vmem:[%s1282_s0 + $0x18] sm:$0xff] }
   0x7   :  { %699 = vmatpush3.bf16.msra.mxu0 %v812_v3  ;;  %799 = vmatpush3.bf16.msra.mxu1 %v812_v3  ;;  %v88_v16 = vpack.c.bf16 %v61_v15, %v58_v13  ;;  %v822_v19 = vld [vmem:[%s1281_s1 + $0x8] sm:$0xff]   ;;  %v823_v20 = vld [vmem:[%s1281_s1 + $0x40] sm:$0xff]   ;;  %v60_v25 = vld [vmem:[%s1282_s0 + $0x138] sm:$0xff] }
   0x8   :  { %700 = vmatprep.subr.bf16.mxu0 %v813_v4  ;;  %792 = vmatprep.subr.bf16.mxu1 %v813_v4  ;;  %v824_v21 = vld [vmem:[%s1281_s1] sm:$0xff]   ;;  %v28_v26 = vld [vmem:[%s1282_s0 + $0x38] sm:$0xff]  ;;  %v31_v27 = vld [vmem:[%s1282_s0 + $0x50] sm:$0xff] }
   0x9   :  { %301 = vmatprep.mubr.bf16.mxu0 %v70_v14  ;;  %349 = vmatprep.mubr.bf16.mxu1 %v88_v16  ;;  %v21_v22 = vld [vmem:[%s1282_s0] sm:$0xff]  ;;  %v64_v28 = vld [vmem:[%s1282_s0 + $0x158] sm:$0xff]  ;;  %v67_v29 = vld [vmem:[%s1282_s0 + $0x170] sm:$0xff]  ;;  %v73_v33 = vpack.c.bf16 %v31_v27, %v28_v26 }
   0xa   :  { %v57_v24 = vld [vmem:[%s1282_s0 + $0x120] sm:$0xff]  ;;  %v825_v30 = vld [vmem:[%s1281_s1 + $0x88] sm:$0xff]   ;;  %v69_v31 = vpack.c.bf16 %v24_v23, %v21_v22  ;;  %v91_v34 = vpack.c.bf16 %v67_v29, %v64_v28  ;;  %v27_v36 = vld [vmem:[%s1282_s0 + $0x30] sm:$0xff] }
   0xb   :  { %701 = vmatpush3.bf16.msra.mxu0 %v814_v5  ;;  %800 = vmatpush3.bf16.msra.mxu1 %v814_v5  ;;  %v87_v32 = vpack.c.bf16 %v60_v25, %v57_v24  ;;  %v826_v35 = vld [vmem:[%s1281_s1 + $0x80] sm:$0xff]   ;;  %v30_v37 = vld [vmem:[%s1282_s0 + $0x48] sm:$0xff]  ;;  %v63_v38 = vld [vmem:[%s1282_s0 + $0x150] sm:$0xff] }
   0xc   :  { %702 = vmatprep.subr.bf16.mxu0 %v815_v6  ;;  %793 = vmatprep.subr.bf16.mxu1 %v815_v6  ;;  %v66_v39 = vld [vmem:[%s1282_s0 + $0x168] sm:$0xff]  ;;  %v37_v41 = vld [vmem:[%s1282_s0 + $0x80] sm:$0xff]  ;;  %v23_v42 = vld [vmem:[%s1282_s0 + $0x10] sm:$0xff]  ;;  %v72_v44 = vpack.c.bf16 %v30_v37, %v27_v36 }
   0xd   :  { %v34_v40 = vld [vmem:[%s1282_s0 + $0x68] sm:$0xff]  ;;  %v90_v45 = vpack.c.bf16 %v66_v39, %v63_v38  ;;  %v33_v48 = vld [vmem:[%s1282_s0 + $0x60] sm:$0xff]  ;;  %v36_v49 = vld [vmem:[%s1282_s0 + $0x78] sm:$0xff] }
   0xe   :  { %v26_v43 = vld [vmem:[%s1282_s0 + $0x28] sm:$0xff]  ;;  %v76_v46 = vpack.c.bf16 %v37_v41, %v34_v40  ;;  %v29_v50 = vld [vmem:[%s1282_s0 + $0x40] sm:$0xff]  ;;  %v32_v51 = vld [vmem:[%s1282_s0 + $0x58] sm:$0xff]  ;;  %v75_v56 = vpack.c.bf16 %v36_v49, %v33_v48 }
   0xf   :  { %703 = vmatpush3.bf16.msra.mxu0 %v816_v7  ;;  %801 = vmatpush3.bf16.msra.mxu1 %v816_v7  ;;  %v71_v47 = vpack.c.bf16 %v26_v43, %v23_v42  ;;  %v40_v52 = vld [vmem:[%s1282_s0 + $0x98] sm:$0xff]  ;;  %v43_v53 = vld [vmem:[%s1282_s0 + $0xb0] sm:$0xff]  ;;  %v38_v55 = vld [vmem:[%s1282_s0 + $0x88] sm:$0xff]  ;;  %v74_v57 = vpack.c.bf16 %v32_v51, %v29_v50 }
  0x10   :  { %704 = vmatprep.subr.bf16.mxu0 %v817_v8  ;;  %794 = vmatprep.subr.bf16.mxu1 %v817_v8  ;;  %v35_v54 = vld [vmem:[%s1282_s0 + $0x70] sm:$0xff]  ;;  %v79_v58 = vpack.c.bf16 %v43_v53, %v40_v52  ;;  %v42_v61 = vld [vmem:[%s1282_s0 + $0xa8] sm:$0xff]  ;;  %v41_v62 = vld [vmem:[%s1282_s0 + $0xa0] sm:$0xff] }
  0x11   :  { %v77_v59 = vpack.c.bf16 %v38_v55, %v35_v54  ;;  %v39_v60 = vld [vmem:[%s1282_s0 + $0x90] sm:$0xff]  ;;  %v44_v63 = vld [vmem:[%s1282_s0 + $0xb8] sm:$0xff]  ;;  %v46_v0 = vld [vmem:[%s1282_s0 + $0xc8] sm:$0xff] }
  0x12   :  { %v49_v1 = vld [vmem:[%s1282_s0 + $0xe0] sm:$0xff]  ;;  %v47_v2 = vld [vmem:[%s1282_s0 + $0xd0] sm:$0xff]  ;;  %v50_v3 = vld [vmem:[%s1282_s0 + $0xe8] sm:$0xff]  ;;  %v78_v4 = vpack.c.bf16 %v42_v61, %v39_v60  ;;  %v80_v5 = vpack.c.bf16 %v44_v63, %v41_v62 }
  0x13   :  { %705 = vmatpush3.bf16.msra.mxu0 %v818_v9  ;;  %802 = vmatpush3.bf16.msra.mxu1 %v818_v9  ;;  %v82_v6 = vpack.c.bf16 %v49_v1, %v46_v0  ;;  %v83_v7 = vpack.c.bf16 %v50_v3, %v47_v2  ;;  %v45_v8 = vld [vmem:[%s1282_s0 + $0xc0] sm:$0xff]  ;;  %v48_v9 = vld [vmem:[%s1282_s0 + $0xd8] sm:$0xff]  ;;  %v55_v13 = vld [vmem:[%s1282_s0 + $0x110] sm:$0xff] }
  0x14   :  { %706 = vmatprep.subr.bf16.mxu0 %v819_v10  ;;  %795 = vmatprep.subr.bf16.mxu1 %v819_v10  ;;  %v53_v10 = vld [vmem:[%s1282_s0 + $0x100] sm:$0xff]  ;;  %v56_v11 = vld [vmem:[%s1282_s0 + $0x118] sm:$0xff]  ;;  %v59_v14 = vld [vmem:[%s1282_s0 + $0x130] sm:$0xff]  ;;  %v81_v16 = vpack.c.bf16 %v48_v9, %v45_v8 }
  0x15   :  { %v52_v12 = vld [vmem:[%s1282_s0 + $0xf8] sm:$0xff]  ;;  %v62_v15 = vld [vmem:[%s1282_s0 + $0x148] sm:$0xff]  ;;  %v65_v22 = vld [vmem:[%s1282_s0 + $0x160] sm:$0xff] }
  0x16   :  { %v68_v23 = vld [vmem:[%s1282_s0 + $0x178] sm:$0xff] }
  0x17   :  { %707 = vmatpush3.bf16.msra.mxu0 %v820_v17  ;;  %803 = vmatpush3.bf16.msra.mxu1 %v820_v17  ;;  %v86_v17 = vpack.c.bf16 %v56_v11, %v53_v10  ;;  %v92_v25 = vpack.c.bf16 %v68_v23, %v65_v22 }
  0x18   :  { %708 = vmatprep.subr.bf16.mxu0 %v821_v18  ;;  %796 = vmatprep.subr.bf16.mxu1 %v821_v18  ;;  %v85_v18 = vpack.c.bf16 %v55_v13, %v52_v12 }
  0x1b   :  { %709 = vmatpush3.bf16.msra.mxu0 %v822_v19  ;;  %804 = vmatpush3.bf16.msra.mxu1 %v822_v19  ;;  %v89_v19 = vpack.c.bf16 %v62_v15, %v59_v14 }
  0x1c   :  { %710 = vmatprep.subr.bf16.mxu0 %v823_v20  ;;  %797 = vmatprep.subr.bf16.mxu1 %v823_v20  ;;  %v51_v20 = vld [vmem:[%s1282_s0 + $0xf0] sm:$0xff] }
  0x1f   :  { %711 = vmatpush3.bf16.msra.mxu0 %v824_v21  ;;  %805 = vmatpush3.bf16.msra.mxu1 %v824_v21  ;;  %v54_v21 = vld [vmem:[%s1282_s0 + $0x108] sm:$0xff] }
  0x20   :  { %770 = vmatprep.subr.bf16.mxu1 %v825_v30  ;;  %v84_v24 = vpack.c.bf16 %v54_v21, %v51_v20 }
  0x22   :  { %302 = vmatmul.mubr.bf16.vlgmr.msra.gmra.mxu0 %v69_v31  ;;  %350 = vmatmul.mubr.bf16.vlgmr.msra.gmra.mxu1 %v87_v32 }
  0x23   :  { %309 = vmatprep.mubr.bf16.mxu0 %v73_v33  ;;  %357 = vmatprep.mubr.bf16.mxu1 %v91_v34 }
  0x24   :  { %771 = vmatpush3.bf16.msra.mxu1 %v825_v30 }
  0x25   :  { %772 = vmatprep.subr.bf16.mxu1 %v826_v35 }
  0x28   :  { %773 = vmatpush3.bf16.msra.mxu1 %v826_v35 }
  0x2a   :  { %310 = vmatmul.mubr.bf16.gmra.mxu0 %v72_v44  ;;  %358 = vmatmul.mubr.bf16.gmra.mxu1 %v90_v45  ;;  %v1087_v44 = vld [vmem:[%s1283_s2] ss:$0 sm:$0xff]  ;;  %s829_s2 = smov 32  }
  0x2b   :  { %317 = vmatprep.mubr.bf16.mxu0 %v76_v46  ;;  %774 = vmatprep.mubr.msk.bf16.mxu1 %vm244_vm0, %v71_v47 }
  0x32   :  { %318 = vmatmul.mubr.bf16.gmra.mxu0 %v75_v56  ;;  %775 = vmatmul.mubr.msk.bf16.vlgmr.msra.gmra.mxu1 %vm244_vm0, %v74_v57 }
  0x33   :  { %325 = vmatprep.mubr.bf16.mxu0 %v79_v58  ;;  %778 = vmatprep.mubr.msk.bf16.mxu1 %vm244_vm0, %v77_v59 }
  0x3a   :  { %326 = vmatmul.mubr.bf16.gmra.mxu0 %v78_v4  ;;  %779 = vmatmul.mubr.msk.bf16.gmra.mxu1 %vm244_vm0, %v80_v5 }
  0x3b   :  { %333 = vmatprep.mubr.bf16.mxu0 %v82_v6  ;;  %782 = vmatprep.mubr.msk.bf16.mxu1 %vm244_vm0, %v83_v7 }
  0x42   :  { %334 = vmatmul.mubr.bf16.gmra.mxu0 %v81_v16  ;;  %783 = vmatmul.mubr.msk.bf16.gmra.mxu1 %vm244_vm0, %v86_v17 }
  0x43   :  { %341 = vmatprep.mubr.bf16.mxu0 %v85_v18  ;;  %786 = vmatprep.mubr.msk.bf16.mxu1 %vm244_vm0, %v89_v19 }
  0x4a   :  { %342 = vmatmul.mubr.bf16.gmra.mxu0 %v84_v24  ;;  %787 = vmatmul.mubr.msk.bf16.gmra.mxu1 %vm244_vm0, %v92_v25 }
  0xe2   :  { %v712_v26 = vpop.f32.mrf.mxu0  ;;  %v1068_v27 = vpop.f32.mrf.mxu1 }
  0xe4   :  { %v713_v28 = vpop.f32.mrf.mxu0  ;;  %v1070_v29 = vpop.f32.mrf.mxu1 }
  0xe5   :  { %v714_v42 = vadd.f32 %v713_v28, %v712_v26 }
  0xe6   :  { %v715_v30 = vpop.f32.mrf.mxu0  ;;  %v1072_v31 = vpop.f32.mrf.mxu1 }
  0xe7   :  { %v304_v51 = vadd.f32 %v714_v42, %v1087_v44 }
  0xe8   :  { %v716_v32 = vpop.f32.mrf.mxu0  ;;  %v1074_v33 = vpop.f32.mrf.mxu1 }
  0xe9   :  { %v717_v46 = vadd.f32 %v716_v32, %v715_v30 }
  0xea   :  { %v718_v34 = vpop.f32.mrf.mxu0  ;;  %v1076_v35 = vpop.f32.mrf.mxu1 }
  0xeb   :  { %v307_v56 = vadd.f32 %v717_v46, %v1087_v44 }
  0xec   :  { %v719_v36 = vpop.f32.mrf.mxu0  ;;  %v1078_v37 = vpop.f32.mrf.mxu1 }
  0xed   :  { %v720_v47 = vadd.f32 %v719_v36, %v718_v34 }
  0xee   :  { %v721_v38 = vpop.f32.mrf.mxu0  ;;  %v1080_v39 = vpop.f32.mrf.mxu1 }
  0xef   :  { %v312_v54 = vadd.f32 %v720_v47, %v1087_v44 }
  0xf0   :  { %v722_v40 = vpop.f32.mrf.mxu0  ;;  %v1082_v41 = vpop.f32.mrf.mxu1 }
  0xf1   :  { %v723_v50 = vadd.f32 %v722_v40, %v721_v38 }
  0xf2   :  { %v724_v43 = vpop.f32.mrf.mxu0  ;;  %v776_v45 = vpop.f32.mrf.mxu1 }
  0xf3   :  { %v1094_v60 = vadd.f32 %v776_v45, %v312_v54  ;;  %v315_v61 = vadd.f32 %v723_v50, %v1087_v44 }
  0xf4   :  { %v725_v48 = vpop.f32.mrf.mxu0  ;;  %v400_v49 = vpop.f32.mrf.mxu1 }
  0xf5   :  { %v1091_v55 = vadd.f32 %v400_v49, %v304_v51  ;;  %v726_v57 = vadd.f32 %v725_v48, %v724_v43  ;;  %v486_v9 = vmul.f32 %v1094_v60, %v1094_v60 }
  0xf6   :  { %v727_v52 = vpop.f32.mrf.mxu0  ;;  %v777_v53 = vpop.f32.mrf.mxu1 }
  0xf7   :  { %v484_v1 = vmul.f32 %v1091_v55, %v1091_v55  ;;  %v1101_v2 = vadd.f32 %v777_v53, %v315_v61  ;;  %v320_v7 = vadd.f32 %v726_v57, %v1087_v44 }
  0xf8   :  { %v728_v58 = vpop.f32.mrf.mxu0  ;;  %v403_v59 = vpop.f32.mrf.mxu1 }
  0xf9   :  { %v1097_v62 = vadd.f32 %v403_v59, %v307_v56  ;;  %v729_v5 = vadd.f32 %v728_v58, %v727_v52  ;;  %v487_v16 = vmul.f32 %v1101_v2, %v1101_v2 }
  0xfa   :  { %v730_v63 = vpop.f32.mrf.mxu0  ;;  %v780_v0 = vpop.f32.mrf.mxu1 }
  0xfb   :  { %v463_v3 = vadd.f32 %v1097_v62, %v1091_v55  ;;  %v485_v4 = vmul.f32 %v1097_v62, %v1097_v62  ;;  %v323_v20 = vadd.f32 %v729_v5, %v1087_v44 }
  0xfc   :  { %v731_v6 = vpop.f32.mrf.mxu0  ;;  %v416_v8 = vpop.f32.mrf.mxu1 }
  0xfd   :  { %v464_v10 = vadd.f32 %v463_v3, %v1094_v60  ;;  %v500_v11 = vadd.f32 %v485_v4, %v484_v1  ;;  %v732_v12 = vadd.f32 %v731_v6, %v730_v63  ;;  %v1111_v13 = vadd.f32 %v416_v8, %v320_v7 }
  0xfe   :  { %v733_v14 = vpop.f32.mrf.mxu0  ;;  %v781_v15 = vpop.f32.mrf.mxu1  ;;  %v750_v7 = vadd.f32 %v1070_v29, %v1068_v27 }
  0xff   :  { %v501_v17 = vadd.f32 %v500_v11, %v486_v9  ;;  %v465_v18 = vadd.f32 %v464_v10, %v1101_v2  ;;  %v328_v24 = vadd.f32 %v732_v12, %v1087_v44  ;;  %v488_v25 = vmul.f32 %v1111_v13, %v1111_v13 }
 0x100   :  { %v734_v19 = vpop.f32.mrf.mxu0  ;;  %v419_v21 = vpop.f32.mrf.mxu1  ;;  %v753_v12 = vadd.f32 %v1074_v33, %v1072_v31 }
 0x101   :  { %v502_v22 = vadd.f32 %v501_v17, %v487_v16  ;;  %v735_v23 = vadd.f32 %v734_v19, %v733_v14  ;;  %v1120_v26 = vadd.f32 %v419_v21, %v323_v20  ;;  %v466_v32 = vadd.f32 %v465_v18, %v1111_v13 }
 0x102   :  { %v736_v28 = vpop.f32.mrf.mxu0  ;;  %v784_v30 = vpop.f32.mrf.mxu1  ;;  %v1126_v45 = vadd.f32 %v780_v0, %v328_v24  ;;  %v756_v19 = vadd.f32 %v1078_v37, %v1076_v35  ;;  %v352_v20 = vadd.f32 %v750_v7, %v1087_v44  ;;  %v355_v24 = vadd.f32 %v753_v12, %v1087_v44 }
 0x103   :  { %v503_v34 = vadd.f32 %v502_v22, %v488_v25  ;;  %v331_v36 = vadd.f32 %v735_v23, %v1087_v44  ;;  %v489_v38 = vmul.f32 %v1120_v26, %v1120_v26  ;;  %v467_v48 = vadd.f32 %v466_v32, %v1120_v26 }
 0x104   :  { %v737_v40 = vpop.f32.mrf.mxu0  ;;  %v432_v42 = vpop.f32.mrf.mxu1  ;;  %v490_v56 = vmul.f32 %v1126_v45, %v1126_v45  ;;  %v759_v23 = vadd.f32 %v1082_v41, %v1080_v39  ;;  %v360_v32 = vadd.f32 %v756_v19, %v1087_v44 }
 0x105   :  { %v738_v43 = vadd.f32 %v737_v40, %v736_v28  ;;  %v1130_v50 = vadd.f32 %v781_v15, %v331_v36  ;;  %v504_v51 = vadd.f32 %v503_v34, %v489_v38  ;;  %v468_v59 = vadd.f32 %v467_v48, %v1126_v45 }
 0x106   :  { %v739_v46 = vpop.f32.mrf.mxu0  ;;  %v785_v47 = vpop.f32.mrf.mxu1  ;;  %v363_v41 = vadd.f32 %v759_v23, %v1087_v44 }
 0x107   :  { %v336_v49 = vadd.f32 %v738_v43, %v1087_v44  ;;  %v491_v0 = vmul.f32 %v1130_v50, %v1130_v50  ;;  %v505_v1 = vadd.f32 %v504_v51, %v490_v56  ;;  %v469_v9 = vadd.f32 %v468_v59, %v1130_v50 }
 0x108   :  { %v740_v52 = vpop.f32.mrf.mxu0  ;;  %v435_v53 = vpop.f32.mrf.mxu1 }
 0x109   :  { %v741_v54 = vadd.f32 %v740_v52, %v739_v46  ;;  %v1135_v61 = vadd.f32 %v432_v42, %v336_v49  ;;  %v506_v14 = vadd.f32 %v505_v1, %v491_v0 }
 0x10a   :  { %v742_v57 = vpop.f32.mrf.mxu0  ;;  %v788_v58 = vpop.f32.mrf.mxu1 }
 0x10b   :  { %v339_v63 = vadd.f32 %v741_v54, %v1087_v44  ;;  %v492_v10 = vmul.f32 %v1135_v61, %v1135_v61  ;;  %v470_v17 = vadd.f32 %v469_v9, %v1135_v61  ;;  %v1177_v40 = vadd.f32 %v788_v58, %v360_v32 }
 0x10c   :  { %v743_v3 = vpop.f32.mrf.mxu0  ;;  %v448_v4 = vpop.f32.mrf.mxu1  ;;  %v577_v32 = vlaneseq }
 0x10d   :  { %v1140_v5 = vadd.f32 %v435_v53, %v339_v63  ;;  %v744_v6 = vadd.f32 %v743_v3, %v742_v57  ;;  %v507_v21 = vadd.f32 %v506_v14, %v492_v10  ;;  %v1166_v35 = vadd.f32 %v448_v4, %v352_v20 }
 0x10e   :  { %v745_v8 = vpop.f32.mrf.mxu0  ;;  %v789_v15 = vpop.f32.mrf.mxu1  ;;  %v498_v52 = vmul.f32 %v1177_v40, %v1177_v40 }
 0x10f   :  { %v344_v11 = vadd.f32 %v744_v6, %v1087_v44  ;;  %v493_v18 = vmul.f32 %v1140_v5, %v1140_v5  ;;  %v471_v22 = vadd.f32 %v470_v17, %v1140_v5  ;;  %v496_v42 = vmul.f32 %v1166_v35, %v1166_v35 }
 0x110   :  { %v746_v16 = vpop.f32.mrf.mxu0  ;;  %v451_v25 = vpop.f32.mrf.mxu1 }
 0x111   :  { %v1153_v27 = vadd.f32 %v784_v30, %v344_v11  ;;  %v747_v29 = vadd.f32 %v746_v16, %v745_v8  ;;  %v508_v28 = vadd.f32 %v507_v21, %v493_v18  ;;  %v1173_v38 = vadd.f32 %v451_v25, %v355_v24 }
 0x113   :  { %v494_v31 = vmul.f32 %v1153_v27, %v1153_v27  ;;  %v347_v33 = vadd.f32 %v747_v29, %v1087_v44  ;;  %v472_v30 = vadd.f32 %v471_v22, %v1153_v27  ;;  %v497_v49 = vmul.f32 %v1173_v38, %v1173_v38 }
 0x115   :  { %v1168_v37 = vadd.f32 %v785_v47, %v347_v33  ;;  %v509_v34 = vadd.f32 %v508_v28, %v494_v31  ;;  %v1182_v47 = vadd.f32 %v789_v15, %v363_v41 }
 0x117   :  { %v495_v36 = vmul.f32 %v1168_v37, %v1168_v37  ;;  %v473_v39 = vadd.f32 %v472_v30, %v1168_v37  ;;  %v499_v54 = vmul.f32 %v1182_v47, %v1182_v47 }
 0x119   :  { %v474_v43 = vadd.f32 %v473_v39, %v1166_v35  ;;  %v510_v46 = vadd.f32 %v509_v34, %v495_v36  ;;  %v556_v34 = vld [vmem:[%s1284_s3] sm:$0x1]  ;;  %v578_v36 = vshrl.u32 %v577_v32, 7 }
 0x11b   :  { %v475_v48 = vadd.f32 %v474_v43, %v1173_v38  ;;  %v511_v51 = vadd.f32 %v510_v46, %v496_v42  ;;  %v558_v42 = vld [vmem:[%s1285_s4] sm:$0x1]  ;;  %v579_v46 = vsub.s32 0, %v578_v36 }
 0x11d   :  { %v476_v44 = vadd.f32 %v475_v48, %v1177_v40  ;;  %v512_v53 = vadd.f32 %v511_v51, %v497_v49 }
 0x11f   :  { %v477_v56 = vadd.f32 %v476_v44, %v1182_v47  ;;  %v513_v57 = vadd.f32 %v512_v53, %v498_v52 }
 0x121   :  { %v478_v58 = vrot.slane %v477_v56, 4  ;;  %v514_v59 = vadd.f32 %v513_v57, %v499_v54 }
 0x123   :  { %v479_v63 = vadd.f32 %v478_v58, %v477_v56  ;;  %v515_v0 = vrot.slane %v514_v59, 4 }
 0x125   :  { %v480_v1 = vrot.slane %v479_v63, 2  ;;  %v516_v3 = vadd.f32 %v515_v0, %v514_v59 }
 0x127   :  { %v481_v4 = vadd.f32 %v480_v1, %v479_v63  ;;  %v517_v6 = vrot.slane %v516_v3, 2 }
 0x129   :  { %v482_v7 = vrot.slane %v481_v4, 1  ;;  %v518_v8 = vadd.f32 %v517_v6, %v516_v3 }
 0x12b   :  { %v483_v9 = vadd.f32 %v482_v7, %v481_v4  ;;  %v519_v10 = vrot.slane %v518_v8, 1 }
 0x12d   :  { %531 = vrot.lane.b32.xlu1 %v483_v9, %s829_s2  ;;  %523 = vrot.lane.b32.xlu0 %v483_v9, %s830_s23  ;;  %v520_v11 = vadd.f32 %v519_v10, %v518_v8 }
 0x131   :  { %537 = vrot.lane.b32.xlu1 %v520_v11, %s830_s23  ;;  %527 = vrot.lane.b32.xlu0 %v483_v9, %s831_s24 }
 0x135   :  { %545 = vrot.lane.b32.xlu1 %v520_v11, %s829_s2  ;;  %541 = vrot.lane.b32.xlu0 %v520_v11, %s831_s24 }
 0x19f   :  { %v532_v12 = vpop.permute.xlu1 %531  ;;  %v524_v14 = vpop.permute.xlu0 %523 }
 0x1a0   :  { %v526_v15 = vadd.f32 %v524_v14, %v483_v9 }
 0x1a3   :  { %v538_v16 = vpop.permute.xlu1 %537  ;;  %v528_v17 = vpop.permute.xlu0 %527 }
 0x1a4   :  { %v530_v18 = vadd.f32 %v528_v17, %v526_v15  ;;  %v540_v29 = vadd.f32 %v538_v16, %v520_v11 }
 0x1a6   :  { %v534_v19 = vadd.f32 %v532_v12, %v530_v18 }
 0x1a7   :  { %v542_v20 = vpop.permute.xlu0 %541  ;;  %v546_v31 = vpop.permute.xlu1 %545 }
 0x1a8   :  { %v549_v21 = vmul.f32 0.001953125, %v534_v19  ;;  %v544_v22 = vadd.f32 %v542_v20, %v540_v29 }
 0x1aa   :  { %v548_v33 = vadd.f32 %v546_v31, %v544_v22  ;;  %v551_v23 = vmul.f32 %v549_v21, %v549_v21 }
 0x1ac   :  { %v550_v24 = vmul.f32 0.001953125, %v548_v33 }
 0x1ae   :  { %v552_v25 = vsub.f32 %v550_v24, %v551_v23 }
 0x1b0   :  { %v553_v28 = vmax.f32 %v552_v25, 0.0 }
 0x1b2   :  { %v554_v30 = vadd.f32 1e-05, %v553_v28 }
 0x1b4   :  { %827 = vrsqrt.f32 %v554_v30 }
 0x1c1   :  { %v828_v39 = vpop.eup %827 }
 0x1c2   :  { %v557_v41 = vmul.f32 %v828_v39, %v556_v34 }
 0x1c4   :  { %565 = vrot.lane.b32.xlu1 %v557_v41, %s831_s24  ;;  %562 = vrot.lane.b32.xlu0 %v557_v41, %s829_s2  ;;  %v559_v43 = vmul.f32 %v557_v41, %v549_v21 }
 0x1c6   :  { %v560_v48 = vsub.f32 %v558_v42, %v559_v43 }
 0x1c8   :  { %568 = vrot.lane.b32.xlu0 %v557_v41, %s830_s23  ;;  %v580_v49 = vrot.slane %v560_v48, %v579_v46 }
 0x1ca   :  { %581 = vrot.lane.b32.xlu1 %v580_v49, %s829_s2 }
 0x1cc   :  { %584 = vrot.lane.b32.xlu0 %v580_v49, %s831_s24 }
 0x1ce   :  { %587 = vrot.lane.b32.xlu1 %v580_v49, %s830_s23 }
 0x236   :  { %v563_v51 = vpop.permute.xlu0 %562  ;;  %v566_v52 = vpop.permute.xlu1 %565 }
 0x237   :  { %v571_v44 = vsel %vm244_vm0, %v557_v41, %v563_v51 }
 0x238   :  { %v573_v53 = vsel %vm572_vm1, %v571_v44, %v566_v52 }
 0x23a   :  { %v569_v54 = vpop.permute.xlu0 %568 }
 0x23b   :  { %v575_v56 = vsel %vm574_vm2, %v573_v53, %v569_v54 }
 0x23c   :  { %v582_v57 = vpop.permute.xlu1 %581  ;;  %v596_v58 = vrot.slane %v575_v56, %v579_v46 }
 0x23d   :  { %v590_v59 = vsel %vm244_vm0, %v560_v48, %v582_v57 }
 0x23e   :  { %v585_v63 = vpop.permute.xlu0 %584  ;;  %v597_v1 = vmul.f32 %v596_v58, %v1091_v55  ;;  %v598_v3 = vmul.f32 %v596_v58, %v1097_v62  ;;  %v599_v4 = vmul.f32 %v596_v58, %v1094_v60  ;;  %v600_v6 = vmul.f32 %v596_v58, %v1101_v2 }
 0x23f   :  { %v601_v7 = vmul.f32 %v596_v58, %v1111_v13  ;;  %v602_v8 = vmul.f32 %v596_v58, %v1120_v26  ;;  %v591_v9 = vsel %vm572_vm1, %v590_v59, %v585_v63  ;;  %v603_v10 = vmul.f32 %v596_v58, %v1126_v45 }
 0x240   :  { %v588_v0 = vpop.permute.xlu1 %587  ;;  %v604_v11 = vmul.f32 %v596_v58, %v1130_v50  ;;  %v605_v12 = vmul.f32 %v596_v58, %v1135_v61  ;;  %v606_v62 = vmul.f32 %v596_v58, %v1140_v5  ;;  %v607_v60 = vmul.f32 %v596_v58, %v1153_v27 }
 0x241   :  { %v592_v55 = vsel %vm574_vm2, %v591_v9, %v588_v0  ;;  %v608_v2 = vmul.f32 %v596_v58, %v1168_v37  ;;  %v609_v13 = vmul.f32 %v596_v58, %v1166_v35  ;;  %v610_v26 = vmul.f32 %v596_v58, %v1173_v38 }
 0x242   :  { %v616_v14 = vrot.slane %v592_v55, %v579_v46  ;;  %v611_v15 = vmul.f32 %v596_v58, %v1177_v40  ;;  %v612_v45 = vmul.f32 %v596_v58, %v1182_v47 }
 0x244   :  { %v617_v50 = vadd.f32 %v616_v14, %v597_v1  ;;  %v618_v16 = vadd.f32 %v616_v14, %v598_v3  ;;  %v619_v61 = vadd.f32 %v616_v14, %v599_v4  ;;  %v620_v17 = vadd.f32 %v616_v14, %v600_v6 }
 0x245   :  { %v621_v18 = vadd.f32 %v616_v14, %v601_v7  ;;  %v622_v29 = vadd.f32 %v616_v14, %v602_v8  ;;  %v623_v5 = vadd.f32 %v616_v14, %v603_v10  ;;  %v624_v19 = vadd.f32 %v616_v14, %v604_v11 }
 0x246   :  { %v625_v27 = vadd.f32 %v616_v14, %v605_v12  ;;  %v626_v20 = vadd.f32 %v616_v14, %v606_v62  ;;  %v627_v37 = vadd.f32 %v616_v14, %v607_v60  ;;  %v628_v21 = vadd.f32 %v616_v14, %v608_v2 }
 0x247   :  { %v629_v22 = vadd.f32 %v616_v14, %v609_v13  ;;  %v630_v35 = vadd.f32 %v616_v14, %v610_v26  ;;  %v631_v31 = vadd.f32 %v616_v14, %v611_v15  ;;  %v632_v38 = vadd.f32 %v616_v14, %v612_v45 }
 0x248   :  { %v633_v33 = vmax.f32 %v617_v50, 0.0  ;;  %v634_v40 = vmax.f32 %v618_v16, 0.0  ;;  %v635_v23 = vmax.f32 %v619_v61, 0.0  ;;  %v636_v47 = vmax.f32 %v620_v17, 0.0 }
 0x249   :  { %v637_v24 = vmax.f32 %v621_v18, 0.0  ;;  %v638_v25 = vmax.f32 %v622_v29, 0.0  ;;  %v639_v28 = vmax.f32 %v623_v5, 0.0  ;;  %v640_v30 = vmax.f32 %v624_v19, 0.0 }
 0x24a   :  { %v641_v32 = vmax.f32 %v625_v27, 0.0  ;;  %v642_v34 = vmax.f32 %v626_v20, 0.0  ;;  %v643_v36 = vmax.f32 %v627_v37, 0.0  ;;  %v644_v39 = vmax.f32 %v628_v21, 0.0  ;;  %649 = vst [vmem:[%s1286_s5] sm:$0xff] %v633_v33  ;;  %650 = vst [vmem:[%s1286_s5 + $0x8] sm:$0xff] %v634_v40 }
 0x24b   :  { %651 = vst [vmem:[%s1286_s5 + $0x10] sm:$0xff] %v635_v23  ;;  %652 = vst [vmem:[%s1286_s5 + $0x18] sm:$0xff] %v636_v47  ;;  %v645_v41 = vmax.f32 %v629_v22, 0.0  ;;  %v646_v42 = vmax.f32 %v630_v35, 0.0  ;;  %v647_v43 = vmax.f32 %v631_v31, 0.0  ;;  %v648_v46 = vmax.f32 %v632_v38, 0.0 }
 0x24c   :  { %653 = vst [vmem:[%s1286_s5 + $0x20] sm:$0xff] %v637_v24  ;;  %654 = vst [vmem:[%s1286_s5 + $0x28] sm:$0xff] %v638_v25 }
 0x24d   :  { %655 = vst [vmem:[%s1286_s5 + $0x30] sm:$0xff] %v639_v28  ;;  %656 = vst [vmem:[%s1286_s5 + $0x38] sm:$0xff] %v640_v30 }
 0x24e   :  { %657 = vst [vmem:[%s1286_s5 + $0x40] sm:$0xff] %v641_v32  ;;  %658 = vst [vmem:[%s1286_s5 + $0x48] sm:$0xff] %v642_v34 }
 0x24f   :  { %659 = vst [vmem:[%s1286_s5 + $0x50] sm:$0xff] %v643_v36  ;;  %660 = vst [vmem:[%s1286_s5 + $0x58] sm:$0xff] %v644_v39 }
 0x250   :  { %661 = vst [vmem:[%s1286_s5 + $0x60] sm:$0xff] %v645_v41  ;;  %662 = vst [vmem:[%s1286_s5 + $0x68] sm:$0xff] %v646_v42 }
 0x251   :  { %663 = vst [vmem:[%s1286_s5 + $0x70] sm:$0xff] %v647_v43  ;;  %664 = vst [vmem:[%s1286_s5 + $0x78] sm:$0xff] %v648_v46 }

// kernel: vae_forward.11
= control target key start
LH: loop header
LB: loop body
LE: loop exit
PB: predicated region body
PF: predicated region fallthrough
CT: control target
= control target key end

     0   :  { %vm136_vm0 = vcmask 261120   ;;  %vm906_vm1 = vcmask 23552   ;;  %s3044_s1 = inlined_call_operand.vmem [shape: bf16[32,6], index: 1, kind: input, shape index: {}]   ;;  %s3045_s0 = inlined_call_operand.vmem [shape: f32[512,32], index: 0, kind: input, shape index: {}]   ;;  %s3046_s2 = inlined_call_operand.vmem [shape: f32[1,6], index: 2, kind: input, shape index: {}]   ;;  %s3047_s3 = inlined_call_operand.vmem [shape: f32[512,3], index: 3, kind: output, shape index: {0}]   ;;  %s3048_s4 = inlined_call_operand.vmem [shape: f32[512,3], index: 4, kind: output, shape index: {1}]  }
   0x1   :  { %v1697_v0 = vld [vmem:[%s3044_s1 + $0x8] sm:$0xff]   ;;  %v1698_v1 = vld [vmem:[%s3044_s1] sm:$0xff]   ;;  %v19_v7 = vld [vmem:[%s3045_s0 + $0x10] sm:$0xff] }
   0x2   :  { %1624 = vmatprep.subr.bf16.mxu0 %v1697_v0  ;;  %1692 = vmatprep.subr.bf16.mxu1 %v1697_v0  ;;  %v17_v2 = vld [vmem:[%s3045_s0] sm:$0xff]  ;;  %v18_v3 = vld [vmem:[%s3045_s0 + $0x8] sm:$0xff]  ;;  %v20_v8 = vld [vmem:[%s3045_s0 + $0x18] sm:$0xff] }
   0x3   :  { %v49_v4 = vld [vmem:[%s3045_s0 + $0x100] sm:$0xff]  ;;  %1625 = vmatpush3.bf16.msra.mxu0 %v1697_v0  ;;  %1694 = vmatpush3.bf16.msra.mxu1 %v1697_v0  ;;  %v81_v5 = vpack.c.bf16 %v18_v3, %v17_v2  ;;  %v50_v6 = vld [vmem:[%s3045_s0 + $0x108] sm:$0xff]  ;;  %v51_v10 = vld [vmem:[%s3045_s0 + $0x110] sm:$0xff]  ;;  %v82_v14 = vpack.c.bf16 %v20_v8, %v19_v7 }
   0x4   :  { %1626 = vmatprep.subr.bf16.mxu0 %v1698_v1  ;;  %1693 = vmatprep.subr.bf16.mxu1 %v1698_v1  ;;  %v97_v9 = vpack.c.bf16 %v50_v6, %v49_v4  ;;  %v52_v11 = vld [vmem:[%s3045_s0 + $0x118] sm:$0xff]  ;;  %v21_v12 = vld [vmem:[%s3045_s0 + $0x20] sm:$0xff]  ;;  %v22_v13 = vld [vmem:[%s3045_s0 + $0x28] sm:$0xff] }
   0x5   :  { %1628 = vmatprep.mubr.msk.bf16.mxu0 %vm136_vm0, %v81_v5  ;;  %v98_v15 = vpack.c.bf16 %v52_v11, %v51_v10  ;;  %v53_v16 = vld [vmem:[%s3045_s0 + $0x120] sm:$0xff]  ;;  %v54_v17 = vld [vmem:[%s3045_s0 + $0x128] sm:$0xff]  ;;  %v83_v18 = vpack.c.bf16 %v22_v13, %v21_v12  ;;  %v23_v20 = vld [vmem:[%s3045_s0 + $0x30] sm:$0xff] }
   0x6   :  { %1660 = vmatprep.mubr.msk.bf16.mxu1 %vm136_vm0, %v97_v9  ;;  %v99_v19 = vpack.c.bf16 %v54_v17, %v53_v16  ;;  %v24_v21 = vld [vmem:[%s3045_s0 + $0x38] sm:$0xff]  ;;  %v55_v22 = vld [vmem:[%s3045_s0 + $0x130] sm:$0xff]  ;;  %v25_v24 = vld [vmem:[%s3045_s0 + $0x40] sm:$0xff] }
   0x7   :  { %1627 = vmatpush3.bf16.msra.mxu0 %v1698_v1  ;;  %1695 = vmatpush3.bf16.msra.mxu1 %v1698_v1  ;;  %v56_v23 = vld [vmem:[%s3045_s0 + $0x138] sm:$0xff]  ;;  %v26_v25 = vld [vmem:[%s3045_s0 + $0x48] sm:$0xff]  ;;  %v57_v26 = vld [vmem:[%s3045_s0 + $0x140] sm:$0xff]  ;;  %v84_v28 = vpack.c.bf16 %v24_v21, %v23_v20 }
   0x8   :  { %v58_v27 = vld [vmem:[%s3045_s0 + $0x148] sm:$0xff]  ;;  %v100_v29 = vpack.c.bf16 %v56_v23, %v55_v22  ;;  %v85_v30 = vpack.c.bf16 %v26_v25, %v25_v24  ;;  %v27_v32 = vld [vmem:[%s3045_s0 + $0x50] sm:$0xff]  ;;  %v28_v33 = vld [vmem:[%s3045_s0 + $0x58] sm:$0xff] }
   0x9   :  { %v101_v31 = vpack.c.bf16 %v58_v27, %v57_v26  ;;  %v59_v34 = vld [vmem:[%s3045_s0 + $0x150] sm:$0xff]  ;;  %v60_v35 = vld [vmem:[%s3045_s0 + $0x158] sm:$0xff]  ;;  %v29_v36 = vld [vmem:[%s3045_s0 + $0x60] sm:$0xff]  ;;  %v86_v40 = vpack.c.bf16 %v28_v33, %v27_v32 }
   0xa   :  { %1629 = vmatmul.mubr.msk.bf16.vlgmr.msra.gmra.mxu0 %vm136_vm0, %v82_v14  ;;  %1661 = vmatmul.mubr.msk.bf16.vlgmr.msra.gmra.mxu1 %vm136_vm0, %v98_v15  ;;  %v30_v37 = vld [vmem:[%s3045_s0 + $0x68] sm:$0xff]  ;;  %v61_v38 = vld [vmem:[%s3045_s0 + $0x160] sm:$0xff]  ;;  %v102_v41 = vpack.c.bf16 %v60_v35, %v59_v34  ;;  %v31_v44 = vld [vmem:[%s3045_s0 + $0x70] sm:$0xff] }
   0xb   :  { %1632 = vmatprep.mubr.msk.bf16.mxu0 %vm136_vm0, %v83_v18  ;;  %1664 = vmatprep.mubr.msk.bf16.mxu1 %vm136_vm0, %v99_v19  ;;  %v62_v39 = vld [vmem:[%s3045_s0 + $0x168] sm:$0xff]  ;;  %v87_v42 = vpack.c.bf16 %v30_v37, %v29_v36  ;;  %v32_v45 = vld [vmem:[%s3045_s0 + $0x78] sm:$0xff]  ;;  %v63_v46 = vld [vmem:[%s3045_s0 + $0x170] sm:$0xff] }
   0xc   :  { %v103_v43 = vpack.c.bf16 %v62_v39, %v61_v38  ;;  %v64_v47 = vld [vmem:[%s3045_s0 + $0x178] sm:$0xff]  ;;  %v33_v48 = vld [vmem:[%s3045_s0 + $0x80] sm:$0xff]  ;;  %v34_v49 = vld [vmem:[%s3045_s0 + $0x88] sm:$0xff]  ;;  %v88_v52 = vpack.c.bf16 %v32_v45, %v31_v44 }
   0xd   :  { %v65_v50 = vld [vmem:[%s3045_s0 + $0x180] sm:$0xff]  ;;  %v66_v51 = vld [vmem:[%s3045_s0 + $0x188] sm:$0xff]  ;;  %v104_v53 = vpack.c.bf16 %v64_v47, %v63_v46  ;;  %v89_v54 = vpack.c.bf16 %v34_v49, %v33_v48  ;;  %v35_v56 = vld [vmem:[%s3045_s0 + $0x90] sm:$0xff] }
   0xe   :  { %v105_v55 = vpack.c.bf16 %v66_v51, %v65_v50  ;;  %v36_v57 = vld [vmem:[%s3045_s0 + $0x98] sm:$0xff]  ;;  %v67_v58 = vld [vmem:[%s3045_s0 + $0x190] sm:$0xff]  ;;  %v37_v60 = vld [vmem:[%s3045_s0 + $0xa0] sm:$0xff] }
   0xf   :  { %v68_v59 = vld [vmem:[%s3045_s0 + $0x198] sm:$0xff]  ;;  %v38_v61 = vld [vmem:[%s3045_s0 + $0xa8] sm:$0xff]  ;;  %v69_v62 = vld [vmem:[%s3045_s0 + $0x1a0] sm:$0xff]  ;;  %v90_v0 = vpack.c.bf16 %v36_v57, %v35_v56 }
  0x10   :  { %v70_v63 = vld [vmem:[%s3045_s0 + $0x1a8] sm:$0xff]  ;;  %v106_v1 = vpack.c.bf16 %v68_v59, %v67_v58  ;;  %v91_v2 = vpack.c.bf16 %v38_v61, %v37_v60  ;;  %v39_v4 = vld [vmem:[%s3045_s0 + $0xb0] sm:$0xff]  ;;  %v40_v5 = vld [vmem:[%s3045_s0 + $0xb8] sm:$0xff] }
  0x11   :  { %v107_v3 = vpack.c.bf16 %v70_v63, %v69_v62  ;;  %v71_v6 = vld [vmem:[%s3045_s0 + $0x1b0] sm:$0xff]  ;;  %v72_v7 = vld [vmem:[%s3045_s0 + $0x1b8] sm:$0xff]  ;;  %v41_v8 = vld [vmem:[%s3045_s0 + $0xc0] sm:$0xff]  ;;  %v92_v12 = vpack.c.bf16 %v40_v5, %v39_v4 }
  0x12   :  { %1633 = vmatmul.mubr.msk.bf16.gmra.mxu0 %vm136_vm0, %v84_v28  ;;  %1665 = vmatmul.mubr.msk.bf16.gmra.mxu1 %vm136_vm0, %v100_v29  ;;  %v42_v9 = vld [vmem:[%s3045_s0 + $0xc8] sm:$0xff]  ;;  %v73_v10 = vld [vmem:[%s3045_s0 + $0x1c0] sm:$0xff]  ;;  %v108_v13 = vpack.c.bf16 %v72_v7, %v71_v6  ;;  %v43_v16 = vld [vmem:[%s3045_s0 + $0xd0] sm:$0xff] }
  0x13   :  { %1636 = vmatprep.mubr.msk.bf16.mxu0 %vm136_vm0, %v85_v30  ;;  %1668 = vmatprep.mubr.msk.bf16.mxu1 %vm136_vm0, %v101_v31  ;;  %v74_v11 = vld [vmem:[%s3045_s0 + $0x1c8] sm:$0xff]  ;;  %v93_v14 = vpack.c.bf16 %v42_v9, %v41_v8  ;;  %v44_v17 = vld [vmem:[%s3045_s0 + $0xd8] sm:$0xff]  ;;  %v75_v18 = vld [vmem:[%s3045_s0 + $0x1d0] sm:$0xff] }
  0x14   :  { %v109_v15 = vpack.c.bf16 %v74_v11, %v73_v10  ;;  %v76_v19 = vld [vmem:[%s3045_s0 + $0x1d8] sm:$0xff]  ;;  %v45_v20 = vld [vmem:[%s3045_s0 + $0xe0] sm:$0xff]  ;;  %v46_v21 = vld [vmem:[%s3045_s0 + $0xe8] sm:$0xff]  ;;  %v94_v24 = vpack.c.bf16 %v44_v17, %v43_v16 }
  0x15   :  { %v77_v22 = vld [vmem:[%s3045_s0 + $0x1e0] sm:$0xff]  ;;  %v78_v23 = vld [vmem:[%s3045_s0 + $0x1e8] sm:$0xff]  ;;  %v110_v25 = vpack.c.bf16 %v76_v19, %v75_v18  ;;  %v95_v26 = vpack.c.bf16 %v46_v21, %v45_v20  ;;  %v47_v28 = vld [vmem:[%s3045_s0 + $0xf0] sm:$0xff] }
  0x16   :  { %v111_v27 = vpack.c.bf16 %v78_v23, %v77_v22  ;;  %v48_v29 = vld [vmem:[%s3045_s0 + $0xf8] sm:$0xff]  ;;  %v79_v30 = vld [vmem:[%s3045_s0 + $0x1f0] sm:$0xff]  ;;  %v2215_v34 = vld [vmem:[%s3046_s2] ss:$0 sm:$0xff] }
  0x17   :  { %v80_v31 = vld [vmem:[%s3045_s0 + $0x1f8] sm:$0xff]  ;;  %v96_v32 = vpack.c.bf16 %v48_v29, %v47_v28  ;;  %s1956_s0 = smov 125  }
  0x18   :  { %v112_v33 = vpack.c.bf16 %v80_v31, %v79_v30 }
  0x1a   :  { %1637 = vmatmul.mubr.msk.bf16.gmra.mxu0 %vm136_vm0, %v86_v40  ;;  %1669 = vmatmul.mubr.msk.bf16.gmra.mxu1 %vm136_vm0, %v102_v41 }
  0x1b   :  { %1640 = vmatprep.mubr.msk.bf16.mxu0 %vm136_vm0, %v87_v42  ;;  %1672 = vmatprep.mubr.msk.bf16.mxu1 %vm136_vm0, %v103_v43 }
  0x22   :  { %1641 = vmatmul.mubr.msk.bf16.gmra.mxu0 %vm136_vm0, %v88_v52  ;;  %1673 = vmatmul.mubr.msk.bf16.gmra.mxu1 %vm136_vm0, %v104_v53 }
  0x23   :  { %1644 = vmatprep.mubr.msk.bf16.mxu0 %vm136_vm0, %v89_v54  ;;  %1676 = vmatprep.mubr.msk.bf16.mxu1 %vm136_vm0, %v105_v55 }
  0x2a   :  { %1645 = vmatmul.mubr.msk.bf16.gmra.mxu0 %vm136_vm0, %v90_v0  ;;  %1677 = vmatmul.mubr.msk.bf16.gmra.mxu1 %vm136_vm0, %v106_v1 }
  0x2b   :  { %1648 = vmatprep.mubr.msk.bf16.mxu0 %vm136_vm0, %v91_v2  ;;  %1680 = vmatprep.mubr.msk.bf16.mxu1 %vm136_vm0, %v107_v3 }
  0x32   :  { %1649 = vmatmul.mubr.msk.bf16.gmra.mxu0 %vm136_vm0, %v92_v12  ;;  %1681 = vmatmul.mubr.msk.bf16.gmra.mxu1 %vm136_vm0, %v108_v13 }
  0x33   :  { %1652 = vmatprep.mubr.msk.bf16.mxu0 %vm136_vm0, %v93_v14  ;;  %1684 = vmatprep.mubr.msk.bf16.mxu1 %vm136_vm0, %v109_v15 }
  0x3a   :  { %1653 = vmatmul.mubr.msk.bf16.gmra.mxu0 %vm136_vm0, %v94_v24  ;;  %1685 = vmatmul.mubr.msk.bf16.gmra.mxu1 %vm136_vm0, %v110_v25 }
  0x3b   :  { %1656 = vmatprep.mubr.msk.bf16.mxu0 %vm136_vm0, %v95_v26  ;;  %1688 = vmatprep.mubr.msk.bf16.mxu1 %vm136_vm0, %v111_v27 }
  0x42   :  { %1657 = vmatmul.mubr.msk.bf16.gmra.mxu0 %vm136_vm0, %v96_v32  ;;  %1689 = vmatmul.mubr.msk.bf16.gmra.mxu1 %vm136_vm0, %v112_v33 }
  0xca   :  { %v1630_v35 = vpop.f32.mrf.mxu0  ;;  %v1662_v36 = vpop.f32.mrf.mxu1 }
  0xcb   :  { %v276_v37 = vadd.f32 %v1630_v35, %v2215_v34  ;;  %v404_v38 = vadd.f32 %v1662_v36, %v2215_v34 }
  0xcc   :  { %v267_v39 = vpop.f32.mrf.mxu0  ;;  %v395_v40 = vpop.f32.mrf.mxu1 }
  0xcd   :  { %v1464_v41 = vmul.f32 -1.442695, %v276_v37  ;;  %v1496_v42 = vmul.f32 -1.442695, %v404_v38  ;;  %v268_v43 = vadd.f32 %v2215_v34, %v267_v39  ;;  %v396_v44 = vadd.f32 %v2215_v34, %v395_v40 }
  0xce   :  { %v1631_v45 = vpop.f32.mrf.mxu0  ;;  %v1663_v46 = vpop.f32.mrf.mxu1  ;;  %v1560_v47 = vclamps-f32 %v404_v38, 2.0  ;;  %v1528_v48 = vclamps-f32 %v276_v37, 2.0 }
  0xcf   :  { %1699 = vpow2.f32 %v1464_v41  ;;  %v1462_v49 = vmul.f32 -1.442695, %v268_v43  ;;  %v1494_v50 = vmul.f32 -1.442695, %v396_v44  ;;  %v279_v51 = vadd.f32 %v1631_v45, %v2215_v34 }
  0xd0   :  { %1701 = vpow2.f32 %v1496_v42  ;;  %v407_v52 = vadd.f32 %v1663_v46, %v2215_v34  ;;  %1231 = vrot.lane.b32.xlu0 %v1560_v47, %s1956_s0  ;;  %1167 = vrot.lane.b32.xlu1 %v1528_v48, %s1956_s0  ;;  %v270_v53 = vpop.f32.mrf.mxu0  ;;  %v398_v54 = vpop.f32.mrf.mxu1  ;;  %v1526_v55 = vclamps-f32 %v268_v43, 2.0  ;;  %v1558_v5 = vclamps-f32 %v396_v44, 2.0 }
  0xd1   :  { %1703 = vpow2.f32 %v1462_v49  ;;  %v271_v56 = vadd.f32 %v2215_v34, %v270_v53  ;;  %v399_v57 = vadd.f32 %v2215_v34, %v398_v54  ;;  %v1465_v58 = vmul.f32 -1.442695, %v279_v51 }
  0xd2   :  { %1705 = vpow2.f32 %v1494_v50  ;;  %v1529_v59 = vclamps-f32 %v279_v51, 2.0  ;;  %v1497_v60 = vmul.f32 -1.442695, %v407_v52  ;;  %v1634_v61 = vpop.f32.mrf.mxu0  ;;  %v1666_v62 = vpop.f32.mrf.mxu1  ;;  %v1561_v8 = vclamps-f32 %v407_v52, 2.0 }
  0xd3   :  { %v1463_v63 = vmul.f32 -1.442695, %v271_v56  ;;  %v1495_v0 = vmul.f32 -1.442695, %v399_v57  ;;  %1707 = vpow2.f32 %v1465_v58  ;;  %v292_v1 = vadd.f32 %v1634_v61, %v2215_v34 }
  0xd4   :  { %1169 = vrot.lane.b32.xlu1 %v1529_v59, %s1956_s0  ;;  %1163 = vrot.lane.b32.xlu0 %v1526_v55, %s1956_s0  ;;  %v283_v2 = vpop.f32.mrf.mxu0  ;;  %v2231_v3 = vadd.f32 %v1666_v62, %v2215_v34  ;;  %v411_v4 = vpop.f32.mrf.mxu1  ;;  %1709 = vpow2.f32 %v1497_v60  ;;  %v1527_v20 = vclamps-f32 %v271_v56, 2.0  ;;  %v1559_v21 = vclamps-f32 %v399_v57, 2.0 }
  0xd5   :  { %v2234_v6 = vadd.f32 %v2215_v34, %v283_v2  ;;  %v2237_v7 = vadd.f32 %v2215_v34, %v411_v4  ;;  %1711 = vpow2.f32 %v1463_v63  ;;  %v1468_v9 = vmul.f32 -1.442695, %v292_v1 }
  0xd6   :  { %v1500_v10 = vmul.f32 -1.442695, %v2231_v3  ;;  %v1635_v11 = vpop.f32.mrf.mxu0  ;;  %v1667_v12 = vpop.f32.mrf.mxu1  ;;  %1713 = vpow2.f32 %v1495_v0  ;;  %v1532_v33 = vclamps-f32 %v292_v1, 2.0  ;;  %v1564_v45 = vclamps-f32 %v2231_v3, 2.0 }
  0xd7   :  { %v1466_v13 = vmul.f32 -1.442695, %v2234_v6  ;;  %1715 = vpow2.f32 %v1468_v9  ;;  %v295_v14 = vadd.f32 %v1635_v11, %v2215_v34  ;;  %v1498_v15 = vmul.f32 -1.442695, %v2237_v7 }
  0xd8   :  { %1233 = vrot.lane.b32.xlu1 %v1561_v8, %s1956_s0  ;;  %1227 = vrot.lane.b32.xlu0 %v1558_v5, %s1956_s0  ;;  %v286_v16 = vpop.f32.mrf.mxu0  ;;  %v414_v17 = vpop.f32.mrf.mxu1  ;;  %v423_v19 = vadd.f32 %v1667_v12, %v2215_v34  ;;  %v1530_v58 = vclamps-f32 %v2234_v6, 2.0  ;;  %v1562_v5 = vclamps-f32 %v2237_v7, 2.0 }
  0xd9   :  { %1717 = vpow2.f32 %v1466_v13  ;;  %v2246_v18 = vadd.f32 %v2215_v34, %v286_v16  ;;  %v1469_v22 = vmul.f32 -1.442695, %v295_v14  ;;  %v2251_v26 = vadd.f32 %v2215_v34, %v414_v17 }
  0xda   :  { %1719 = vpow2.f32 %v1500_v10  ;;  %v1638_v23 = vpop.f32.mrf.mxu0  ;;  %v1501_v25 = vmul.f32 -1.442695, %v423_v19  ;;  %v1533_v35 = vclamps-f32 %v295_v14, 2.0  ;;  %v1670_v36 = vpop.f32.mrf.mxu1  ;;  %v1565_v46 = vclamps-f32 %v423_v19, 2.0 }
  0xdb   :  { %1721 = vpow2.f32 %v1498_v15  ;;  %v1467_v24 = vmul.f32 -1.442695, %v2246_v18  ;;  %v1499_v39 = vmul.f32 -1.442695, %v2251_v26  ;;  %v1531_v59 = vclamps-f32 %v2246_v18, 2.0 }
  0xdc   :  { %v1700_v27 = vpop.eup %1699  ;;  %1723 = vpow2.f32 %v1469_v22  ;;  %1229 = vrot.lane.b32.xlu1 %v1559_v21, %s1956_s0  ;;  %1165 = vrot.lane.b32.xlu0 %v1527_v20, %s1956_s0  ;;  %v299_v28 = vpop.f32.mrf.mxu0  ;;  %v308_v63 = vadd.f32 %v1638_v23, %v2215_v34  ;;  %v1563_v11 = vclamps-f32 %v2251_v26, 2.0  ;;  %v436_v12 = vadd.f32 %v1670_v36, %v2215_v34 }
  0xdd   :  { %v1702_v29 = vpop.eup %1701  ;;  %v716_v30 = vadd.f32 1.0, %v1700_v27  ;;  %1725 = vpow2.f32 %v1467_v24  ;;  %v427_v47 = vpop.f32.mrf.mxu1  ;;  %v2267_v2 = vadd.f32 %v2215_v34, %v299_v28 }
  0xde   :  { %v1704_v31 = vpop.eup %1703  ;;  %v748_v32 = vadd.f32 1.0, %v1702_v29  ;;  %1727 = vpow2.f32 %v1501_v25  ;;  %v1639_v40 = vpop.f32.mrf.mxu0  ;;  %v1472_v16 = vmul.f32 -1.442695, %v308_v63  ;;  %v1536_v22 = vclamps-f32 %v308_v63, 2.0 }
  0xdf   :  { %v1706_v37 = vpop.eup %1705  ;;  %1729 = vrcp.f32 %v716_v30  ;;  %v714_v38 = vadd.f32 1.0, %v1704_v31  ;;  %v1671_v60 = vpop.f32.mrf.mxu1  ;;  %v311_v6 = vadd.f32 %v1639_v40, %v2215_v34  ;;  %v1470_v7 = vmul.f32 -1.442695, %v2267_v2 }
  0xe0   :  { %1731 = vrcp.f32 %v748_v32  ;;  %v746_v41 = vadd.f32 1.0, %v1706_v37  ;;  %1177 = vrot.lane.b32.xlu1 %v1533_v35, %s1956_s0  ;;  %1175 = vrot.lane.b32.xlu0 %v1532_v33, %s1956_s0  ;;  %v1708_v42 = vpop.eup %1707  ;;  %v302_v50 = vpop.f32.mrf.mxu0  ;;  %v2286_v24 = vadd.f32 %v2215_v34, %v427_v47  ;;  %v1504_v28 = vmul.f32 -1.442695, %v436_v12 }
  0xe1   :  { %1733 = vrcp.f32 %v714_v38  ;;  %v1710_v43 = vpop.eup %1709  ;;  %v717_v44 = vadd.f32 1.0, %v1708_v42  ;;  %v430_v13 = vpop.f32.mrf.mxu1  ;;  %v2277_v19 = vadd.f32 %v2215_v34, %v302_v50  ;;  %v1473_v23 = vmul.f32 -1.442695, %v311_v6 }
  0xe2   :  { %1735 = vrcp.f32 %v746_v41  ;;  %v1712_v48 = vpop.eup %1711  ;;  %v749_v49 = vadd.f32 1.0, %v1710_v43  ;;  %v2261_v55 = vpop.f32.mrf.mxu0  ;;  %v1537_v27 = vclamps-f32 %v311_v6, 2.0  ;;  %v439_v29 = vadd.f32 %v1671_v60, %v2215_v34 }
  0xe3   :  { %1737 = vpow2.f32 %v1499_v39  ;;  %v1714_v51 = vpop.eup %1713  ;;  %v715_v52 = vadd.f32 1.0, %v1712_v48  ;;  %v1674_v20 = vpop.f32.mrf.mxu1  ;;  %v2298_v31 = vadd.f32 %v2215_v34, %v430_v13  ;;  %v1568_v33 = vclamps-f32 %v436_v12, 2.0 }
  0xe4   :  { %1739 = vrcp.f32 %v717_v44  ;;  %1241 = vrot.lane.b32.xlu1 %v1565_v46, %s1956_s0  ;;  %1239 = vrot.lane.b32.xlu0 %v1564_v45, %s1956_s0  ;;  %v1716_v53 = vpop.eup %1715  ;;  %v747_v54 = vadd.f32 1.0, %v1714_v51  ;;  %v315_v8 = vpop.f32.mrf.mxu0  ;;  %v1471_v35 = vmul.f32 -1.442695, %v2277_v19  ;;  %v2309_v36 = vadd.f32 %v2261_v55, %v2215_v34 }
  0xe5   :  { %1741 = vrcp.f32 %v749_v49  ;;  %v720_v57 = vadd.f32 1.0, %v1716_v53  ;;  %v443_v37 = vpop.f32.mrf.mxu1  ;;  %v1502_v40 = vmul.f32 -1.442695, %v2286_v24  ;;  %v2313_v41 = vadd.f32 %v2215_v34, %v315_v8 }
  0xe6   :  { %v1718_v56 = vpop.eup %1717  ;;  %1743 = vrcp.f32 %v715_v52  ;;  %v1643_v25 = vpop.f32.mrf.mxu0  ;;  %v1505_v44 = vmul.f32 -1.442695, %v439_v29  ;;  %v1569_v45 = vclamps-f32 %v439_v29, 2.0  ;;  %v1503_v48 = vmul.f32 -1.442695, %v2298_v31 }
  0xe7   :  { %v1720_v61 = vpop.eup %1719  ;;  %1745 = vrcp.f32 %v747_v54  ;;  %v718_v62 = vadd.f32 1.0, %v1718_v56  ;;  %v2320_v46 = vadd.f32 %v1643_v25, %v2215_v34  ;;  %v2328_v49 = vadd.f32 %v1674_v20, %v2215_v34  ;;  %v1675_v53 = vpop.f32.mrf.mxu1 }
  0xe8   :  { %v1722_v0 = vpop.eup %1721  ;;  %1747 = vrcp.f32 %v720_v57  ;;  %v752_v1 = vadd.f32 1.0, %v1720_v61  ;;  %1173 = vrot.lane.b32.xlu1 %v1531_v59, %s1956_s0  ;;  %1171 = vrot.lane.b32.xlu0 %v1530_v58, %s1956_s0  ;;  %v318_v42 = vpop.f32.mrf.mxu0  ;;  %v1476_v51 = vmul.f32 -1.442695, %v2309_v36  ;;  %v1534_v55 = vclamps-f32 %v2267_v2, 2.0 }
  0xe9   :  { %v1724_v3 = vpop.eup %1723  ;;  %1749 = vrcp.f32 %v718_v62  ;;  %v750_v4 = vadd.f32 1.0, %v1722_v0  ;;  %v2338_v52 = vadd.f32 %v2215_v34, %v318_v42  ;;  %v1474_v56 = vmul.f32 -1.442695, %v2313_v41 }
  0xea   :  { %v1726_v9 = vpop.eup %1725  ;;  %1751 = vrcp.f32 %v752_v1  ;;  %v721_v10 = vadd.f32 1.0, %v1724_v3  ;;  %v2347_v57 = vadd.f32 %v2215_v34, %v443_v37  ;;  %v1535_v59 = vclamps-f32 %v2277_v19, 2.0  ;;  %v2363_v0 = vpop.f32.mrf.mxu0 }
  0xeb   :  { %v1728_v14 = vpop.eup %1727  ;;  %1753 = vrcp.f32 %v750_v4  ;;  %v719_v15 = vadd.f32 1.0, %v1726_v9  ;;  %v1477_v60 = vmul.f32 -1.442695, %v2320_v46  ;;  %v2356_v61 = vadd.f32 %v1675_v53, %v2215_v34  ;;  %v446_v3 = vpop.f32.mrf.mxu1 }
  0xec   :  { %v1730_v17 = vpop.eup %1729  ;;  %1755 = vrcp.f32 %v721_v10  ;;  %v753_v18 = vadd.f32 1.0, %v1728_v14  ;;  %1237 = vrot.lane.b32.xlu1 %v1563_v11, %s1956_s0  ;;  %1235 = vrot.lane.b32.xlu0 %v1562_v5, %s1956_s0  ;;  %v1508_v63 = vmul.f32 -1.442695, %v2328_v49  ;;  %v1475_v2 = vmul.f32 -1.442695, %v2338_v52  ;;  %v331_v13 = vpop.f32.mrf.mxu0 }
  0xed   :  { %v1732_v21 = vpop.eup %1731  ;;  %909 = vst.msk [vmem:[%s3047_s3 + $0x10] sm:$0xff] %vm906_vm1, %v1730_v17  ;;  %1757 = vrcp.f32 %v719_v15  ;;  %v1506_v5 = vmul.f32 -1.442695, %v2347_v57  ;;  %v1566_v8 = vclamps-f32 %v2286_v24, 2.0  ;;  %v1567_v9 = vclamps-f32 %v2298_v31, 2.0  ;;  %v1678_v20 = vpop.f32.mrf.mxu1 }
  0xee   :  { %v1734_v26 = vpop.eup %1733  ;;  %941 = vst.msk [vmem:[%s3047_s3 + $0x110] sm:$0xff] %vm906_vm1, %v1732_v21  ;;  %1759 = vrcp.f32 %v753_v18  ;;  %v1509_v10 = vmul.f32 -1.442695, %v2356_v61  ;;  %v2389_v12 = vadd.f32 %v2215_v34, %v446_v3  ;;  %v1541_v19 = vclamps-f32 %v2320_v46, 2.0  ;;  %v1647_v24 = vpop.f32.mrf.mxu0 }
  0xef   :  { %v1736_v30 = vpop.eup %1735  ;;  %907 = vst.msk [vmem:[%s3047_s3] sm:$0xff] %vm906_vm1, %v1734_v26  ;;  %1761 = vpow2.f32 %v1472_v16  ;;  %v1573_v31 = vclamps-f32 %v2356_v61, 2.0  ;;  %v1539_v46 = vclamps-f32 %v2338_v52, 2.0 }
  0xf0   :  { %v1738_v32 = vpop.eup %1737  ;;  %939 = vst.msk [vmem:[%s3047_s3 + $0x100] sm:$0xff] %vm906_vm1, %v1736_v30  ;;  %1763 = vpow2.f32 %v1470_v7  ;;  %1185 = vrot.lane.b32.xlu1 %v1537_v27, %s1956_s0  ;;  %1183 = vrot.lane.b32.xlu0 %v1536_v22, %s1956_s0  ;;  %v1540_v7 = vclamps-f32 %v2309_v36, 2.0  ;;  %v1572_v30 = vclamps-f32 %v2328_v49, 2.0  ;;  %v334_v36 = vpop.f32.mrf.mxu0  ;;  %v1571_v61 = vclamps-f32 %v2389_v12, 2.0 }
  0xf1   :  { %v1740_v38 = vpop.eup %1739  ;;  %v751_v39 = vadd.f32 1.0, %v1738_v32  ;;  %1765 = vpow2.f32 %v1473_v23  ;;  %v1507_v23 = vmul.f32 -1.442695, %v2389_v12  ;;  %v459_v32 = vpop.f32.mrf.mxu1 }
  0xf2   :  { %v1742_v43 = vpop.eup %1741  ;;  %910 = vst.msk [vmem:[%s3047_s3 + $0x18] sm:$0xff] %vm906_vm1, %v1740_v38  ;;  %1767 = vpow2.f32 %v1504_v28  ;;  %v2410_v42 = vpop.f32.mrf.mxu0 }
  0xf3   :  { %v1744_v47 = vpop.eup %1743  ;;  %942 = vst.msk [vmem:[%s3047_s3 + $0x118] sm:$0xff] %vm906_vm1, %v1742_v43  ;;  %1769 = vrcp.f32 %v751_v39 }
  0xf4   :  { %v1746_v50 = vpop.eup %1745  ;;  %908 = vst.msk [vmem:[%s3047_s3 + $0x8] sm:$0xff] %vm906_vm1, %v1744_v47  ;;  %1771 = vpow2.f32 %v1471_v35  ;;  %1249 = vrot.lane.b32.xlu1 %v1569_v45, %s1956_s0  ;;  %1247 = vrot.lane.b32.xlu0 %v1568_v33, %s1956_s0  ;;  %v1538_v45 = vclamps-f32 %v2313_v41, 2.0  ;;  %v1679_v47 = vpop.f32.mrf.mxu1 }
  0xf5   :  { %v1748_v54 = vpop.eup %1747  ;;  %940 = vst.msk [vmem:[%s3047_s3 + $0x108] sm:$0xff] %vm906_vm1, %v1746_v50  ;;  %1773 = vpow2.f32 %v1502_v40  ;;  %v340_v50 = vadd.f32 %v2363_v0, %v2215_v34 }
  0xf6   :  { %v1750_v58 = vpop.eup %1749  ;;  %913 = vst.msk [vmem:[%s3047_s3 + $0x30] sm:$0xff] %vm906_vm1, %v1748_v54  ;;  %1775 = vpow2.f32 %v1505_v44  ;;  %v2417_v54 = vadd.f32 %v2215_v34, %v331_v13 }
  0xf7   :  { %v1752_v62 = vpop.eup %1751  ;;  %911 = vst.msk [vmem:[%s3047_s3 + $0x20] sm:$0xff] %vm906_vm1, %v1750_v58  ;;  %1777 = vpow2.f32 %v1503_v48  ;;  %v347_v58 = vpop.f32.mrf.mxu0 }
  0xf8   :  { %v1754_v1 = vpop.eup %1753  ;;  %945 = vst.msk [vmem:[%s3047_s3 + $0x130] sm:$0xff] %vm906_vm1, %v1752_v62  ;;  %1779 = vpow2.f32 %v1476_v51  ;;  %1181 = vrot.lane.b32.xlu1 %v1535_v59, %s1956_s0  ;;  %1179 = vrot.lane.b32.xlu0 %v1534_v55, %s1956_s0  ;;  %v1570_v55 = vclamps-f32 %v2347_v57, 2.0  ;;  %v468_v62 = vadd.f32 %v1678_v20, %v2215_v34  ;;  %v1478_v57 = vmul.f32 -1.442695, %v2417_v54 }
  0xf9   :  { %v1756_v4 = vpop.eup %1755  ;;  %943 = vst.msk [vmem:[%s3047_s3 + $0x120] sm:$0xff] %vm906_vm1, %v1754_v1  ;;  %1781 = vpow2.f32 %v1474_v56  ;;  %v343_v56 = vadd.f32 %v1647_v24, %v2215_v34  ;;  %v1651_v12 = vpop.f32.mrf.mxu0 }
  0xfa   :  { %v1758_v6 = vpop.eup %1757  ;;  %914 = vst.msk [vmem:[%s3047_s3 + $0x38] sm:$0xff] %vm906_vm1, %v1756_v4  ;;  %1783 = vpow2.f32 %v1477_v60 }
  0xfb   :  { %v1760_v11 = vpop.eup %1759  ;;  %912 = vst.msk [vmem:[%s3047_s3 + $0x28] sm:$0xff] %vm906_vm1, %v1758_v6  ;;  %1785 = vpow2.f32 %v1508_v63  ;;  %v462_v63 = vpop.f32.mrf.mxu1 }
  0xfc   :  { %v1762_v14 = vpop.eup %1761  ;;  %946 = vst.msk [vmem:[%s3047_s3 + $0x138] sm:$0xff] %vm906_vm1, %v1760_v11  ;;  %1787 = vpow2.f32 %v1475_v2  ;;  %1245 = vrot.lane.b32.xlu1 %v1567_v9, %s1956_s0  ;;  %1243 = vrot.lane.b32.xlu0 %v1566_v8, %s1956_s0  ;;  %v1480_v2 = vmul.f32 -1.442695, %v340_v50  ;;  %v1544_v9 = vclamps-f32 %v340_v50, 2.0  ;;  %v2436_v11 = vadd.f32 %v2215_v34, %v459_v32 }
  0xfd   :  { %v1764_v15 = vpop.eup %1763  ;;  %v724_v16 = vadd.f32 1.0, %v1762_v14  ;;  %1789 = vpow2.f32 %v1506_v5  ;;  %v2427_v5 = vadd.f32 %v2215_v34, %v334_v36  ;;  %v1682_v6 = vpop.f32.mrf.mxu1  ;;  %v1545_v14 = vclamps-f32 %v343_v56, 2.0 }
  0xfe   :  { %v1766_v17 = vpop.eup %1765  ;;  %v722_v18 = vadd.f32 1.0, %v1764_v15  ;;  %1791 = vpow2.f32 %v1509_v10  ;;  %v1481_v10 = vmul.f32 -1.442695, %v343_v56  ;;  %v1512_v15 = vmul.f32 -1.442695, %v468_v62 }
  0xff   :  { %v1768_v21 = vpop.eup %1767  ;;  %1793 = vrcp.f32 %v724_v16  ;;  %v725_v22 = vadd.f32 1.0, %v1766_v17  ;;  %v471_v16 = vadd.f32 %v1679_v47, %v2215_v34  ;;  %v1479_v20 = vmul.f32 -1.442695, %v2427_v5 }
 0x100   :  { %v1770_v25 = vpop.eup %1769  ;;  %1795 = vrcp.f32 %v722_v18  ;;  %v756_v26 = vadd.f32 1.0, %v1768_v21  ;;  %1193 = vrot.lane.b32.xlu1 %v1541_v19, %s1956_s0  ;;  %1191 = vrot.lane.b32.xlu0 %v1540_v7, %s1956_s0  ;;  %v2448_v18 = vadd.f32 %v2215_v34, %v462_v63  ;;  %v1576_v19 = vclamps-f32 %v468_v62, 2.0 }
 0x101   :  { %v1772_v27 = vpop.eup %1771  ;;  %944 = vst.msk [vmem:[%s3047_s3 + $0x128] sm:$0xff] %vm906_vm1, %v1770_v25  ;;  %1797 = vrcp.f32 %v725_v22  ;;  %v2459_v21 = vadd.f32 %v2410_v42, %v2215_v34  ;;  %v475_v22 = vpop.f32.mrf.mxu1  ;;  %v1510_v25 = vmul.f32 -1.442695, %v2436_v11  ;;  %v1542_v42 = vclamps-f32 %v2417_v54, 2.0 }
 0x102   :  { %v1774_v28 = vpop.eup %1773  ;;  %1799 = vrcp.f32 %v756_v26  ;;  %v723_v29 = vadd.f32 1.0, %v1772_v27  ;;  %v2463_v26 = vadd.f32 %v2215_v34, %v347_v58  ;;  %v350_v27 = vpop.f32.mrf.mxu0  ;;  %v1574_v58 = vclamps-f32 %v2436_v11, 2.0 }
 0x103   :  { %v1776_v33 = vpop.eup %1775  ;;  %v754_v35 = vadd.f32 1.0, %v1774_v28  ;;  %1801 = vpow2.f32 %v1507_v23 }
 0x104   :  { %v1778_v37 = vpop.eup %1777  ;;  %1803 = vrcp.f32 %v723_v29  ;;  %v757_v38 = vadd.f32 1.0, %v1776_v33  ;;  %1257 = vrot.lane.b32.xlu1 %v1573_v31, %s1956_s0  ;;  %1255 = vrot.lane.b32.xlu0 %v1572_v30, %s1956_s0  ;;  %v1513_v29 = vmul.f32 -1.442695, %v471_v16  ;;  %v1577_v30 = vclamps-f32 %v471_v16, 2.0 }
 0x105   :  { %v1780_v39 = vpop.eup %1779  ;;  %1805 = vrcp.f32 %v754_v35  ;;  %v755_v40 = vadd.f32 1.0, %v1778_v37  ;;  %v2470_v31 = vadd.f32 %v1651_v12, %v2215_v34  ;;  %v1511_v33 = vmul.f32 -1.442695, %v2448_v18 }
 0x106   :  { %v1782_v43 = vpop.eup %1781  ;;  %1807 = vrcp.f32 %v757_v38  ;;  %v728_v44 = vadd.f32 1.0, %v1780_v39  ;;  %v2478_v35 = vadd.f32 %v1682_v6, %v2215_v34  ;;  %v1484_v37 = vmul.f32 -1.442695, %v2459_v21  ;;  %v1683_v39 = vpop.f32.mrf.mxu1 }
 0x107   :  { %v1784_v48 = vpop.eup %1783  ;;  %1809 = vrcp.f32 %v755_v40  ;;  %v726_v49 = vadd.f32 1.0, %v1782_v43  ;;  %v2488_v38 = vadd.f32 %v2215_v34, %v350_v27  ;;  %v1482_v43 = vmul.f32 -1.442695, %v2463_v26 }
 0x108   :  { %v1786_v51 = vpop.eup %1785  ;;  %1811 = vrcp.f32 %v728_v44  ;;  %v729_v53 = vadd.f32 1.0, %v1784_v48  ;;  %1189 = vrot.lane.b32.xlu1 %v1539_v46, %s1956_s0  ;;  %1187 = vrot.lane.b32.xlu0 %v1538_v45, %s1956_s0  ;;  %v2497_v44 = vadd.f32 %v2215_v34, %v475_v22  ;;  %v1543_v46 = vclamps-f32 %v2427_v5, 2.0 }
 0x109   :  { %v1788_v41 = vpop.eup %1787  ;;  %1813 = vrcp.f32 %v726_v49  ;;  %v760_v52 = vadd.f32 1.0, %v1786_v51  ;;  %v1485_v47 = vmul.f32 -1.442695, %v2470_v31  ;;  %v2506_v48 = vadd.f32 %v1683_v39, %v2215_v34  ;;  %v2508_v49 = vpop.f32.mrf.mxu0 }
 0x10a   :  { %v1790_v59 = vpop.eup %1789  ;;  %1815 = vrcp.f32 %v729_v53  ;;  %v727_v60 = vadd.f32 1.0, %v1788_v41  ;;  %v1516_v51 = vmul.f32 -1.442695, %v2478_v35  ;;  %v1483_v54 = vmul.f32 -1.442695, %v2488_v38  ;;  %v478_v41 = vpop.f32.mrf.mxu1 }
 0x10b   :  { %v1792_v0 = vpop.eup %1791  ;;  %1817 = vrcp.f32 %v760_v52  ;;  %v758_v1 = vadd.f32 1.0, %v1790_v59  ;;  %v1575_v59 = vclamps-f32 %v2448_v18, 2.0  ;;  %v2541_v63 = vadd.f32 %v2215_v34, %v478_v41 }
 0x10c   :  { %v1794_v3 = vpop.eup %1793  ;;  %1819 = vrcp.f32 %v727_v60  ;;  %v761_v4 = vadd.f32 1.0, %v1792_v0  ;;  %1253 = vrot.lane.b32.xlu1 %v1571_v61, %s1956_s0  ;;  %1251 = vrot.lane.b32.xlu0 %v1570_v55, %s1956_s0  ;;  %v1514_v55 = vmul.f32 -1.442695, %v2497_v44  ;;  %v1517_v60 = vmul.f32 -1.442695, %v2506_v48  ;;  %v2534_v61 = vpop.f32.mrf.mxu0 }
 0x10d   :  { %v1796_v8 = vpop.eup %1795  ;;  %917 = vst.msk [vmem:[%s3047_s3 + $0x50] sm:$0xff] %vm906_vm1, %v1794_v3  ;;  %1821 = vrcp.f32 %v758_v1  ;;  %v1549_v5 = vclamps-f32 %v2470_v31, 2.0  ;;  %v1515_v11 = vmul.f32 -1.442695, %v2541_v63  ;;  %v1581_v18 = vclamps-f32 %v2506_v48, 2.0 }
 0x10e   :  { %v1798_v13 = vpop.eup %1797  ;;  %915 = vst.msk [vmem:[%s3047_s3 + $0x40] sm:$0xff] %vm906_vm1, %v1796_v8  ;;  %1823 = vrcp.f32 %v761_v4  ;;  %v1655_v6 = vpop.f32.mrf.mxu0  ;;  %v1547_v31 = vclamps-f32 %v2488_v38, 2.0  ;;  %v1579_v48 = vclamps-f32 %v2541_v63, 2.0 }
 0x10f   :  { %v1800_v17 = vpop.eup %1799  ;;  %918 = vst.msk [vmem:[%s3047_s3 + $0x58] sm:$0xff] %vm906_vm1, %v1798_v13  ;;  %1825 = vpow2.f32 %v1480_v2  ;;  %v1686_v8 = vpop.f32.mrf.mxu1 }
 0x110   :  { %v1802_v7 = vpop.eup %1801  ;;  %949 = vst.msk [vmem:[%s3047_s3 + $0x150] sm:$0xff] %vm906_vm1, %v1800_v17  ;;  %1827 = vpow2.f32 %v1478_v57  ;;  %1201 = vrot.lane.b32.xlu1 %v1545_v14, %s1956_s0  ;;  %1199 = vrot.lane.b32.xlu0 %v1544_v9, %s1956_s0  ;;  %v1548_v57 = vclamps-f32 %v2459_v21, 2.0  ;;  %v1580_v17 = vclamps-f32 %v2478_v35, 2.0 }
 0x111   :  { %v1804_v23 = vpop.eup %1803  ;;  %v759_v24 = vadd.f32 1.0, %v1802_v7  ;;  %1829 = vpow2.f32 %v1481_v10  ;;  %v366_v7 = vpop.f32.mrf.mxu0 }
 0x112   :  { %v1806_v28 = vpop.eup %1805  ;;  %916 = vst.msk [vmem:[%s3047_s3 + $0x48] sm:$0xff] %vm906_vm1, %v1804_v23  ;;  %1831 = vpow2.f32 %v1512_v15 }
 0x113   :  { %v1808_v32 = vpop.eup %1807  ;;  %947 = vst.msk [vmem:[%s3047_s3 + $0x140] sm:$0xff] %vm906_vm1, %v1806_v28  ;;  %1833 = vrcp.f32 %v759_v24  ;;  %v2562_v24 = vpop.f32.mrf.mxu0 }
 0x114   :  { %v1810_v36 = vpop.eup %1809  ;;  %950 = vst.msk [vmem:[%s3047_s3 + $0x158] sm:$0xff] %vm906_vm1, %v1808_v32  ;;  %1835 = vpow2.f32 %v1479_v20  ;;  %1265 = vrot.lane.b32.xlu1 %v1577_v30, %s1956_s0  ;;  %1263 = vrot.lane.b32.xlu0 %v1576_v19, %s1956_s0  ;;  %v491_v19 = vpop.f32.mrf.mxu1  ;;  %v1546_v30 = vclamps-f32 %v2463_v26, 2.0 }
 0x115   :  { %v1812_v40 = vpop.eup %1811  ;;  %948 = vst.msk [vmem:[%s3047_s3 + $0x148] sm:$0xff] %vm906_vm1, %v1810_v36  ;;  %1837 = vpow2.f32 %v1510_v25  ;;  %v372_v36 = vadd.f32 %v2508_v49, %v2215_v34  ;;  %v379_v26 = vpop.f32.mrf.mxu0  ;;  %v2578_v49 = vadd.f32 %v1686_v8, %v2215_v34 }
 0x116   :  { %v1814_v45 = vpop.eup %1813  ;;  %921 = vst.msk [vmem:[%s3047_s3 + $0x70] sm:$0xff] %vm906_vm1, %v1812_v40  ;;  %1839 = vpow2.f32 %v1513_v29  ;;  %v1687_v32 = vpop.f32.mrf.mxu1  ;;  %v2570_v40 = vadd.f32 %v2215_v34, %v2534_v61 }
 0x117   :  { %v1816_v50 = vpop.eup %1815  ;;  %919 = vst.msk [vmem:[%s3047_s3 + $0x60] sm:$0xff] %vm906_vm1, %v1814_v45  ;;  %1841 = vpow2.f32 %v1511_v33  ;;  %v375_v45 = vadd.f32 %v1655_v6, %v2215_v34 }
 0x118   :  { %v1818_v53 = vpop.eup %1817  ;;  %922 = vst.msk [vmem:[%s3047_s3 + $0x78] sm:$0xff] %vm906_vm1, %v1816_v50  ;;  %1843 = vpow2.f32 %v1484_v37  ;;  %1197 = vrot.lane.b32.xlu1 %v1543_v46, %s1956_s0  ;;  %1195 = vrot.lane.b32.xlu0 %v1542_v42, %s1956_s0  ;;  %v494_v50 = vpop.f32.mrf.mxu1 }
 0x119   :  { %v1820_v52 = vpop.eup %1819  ;;  %953 = vst.msk [vmem:[%s3047_s3 + $0x170] sm:$0xff] %vm906_vm1, %v1818_v53  ;;  %1845 = vpow2.f32 %v1482_v43  ;;  %v1578_v43 = vclamps-f32 %v2497_v44, 2.0  ;;  %v1486_v44 = vmul.f32 -1.442695, %v2570_v40  ;;  %v1489_v61 = vmul.f32 -1.442695, %v375_v45 }
 0x11a   :  { %v1822_v56 = vpop.eup %1821  ;;  %920 = vst.msk [vmem:[%s3047_s3 + $0x68] sm:$0xff] %vm906_vm1, %v1820_v52  ;;  %1847 = vpow2.f32 %v1485_v47 }
 0x11b   :  { %v1824_v62 = vpop.eup %1823  ;;  %951 = vst.msk [vmem:[%s3047_s3 + $0x160] sm:$0xff] %vm906_vm1, %v1822_v56  ;;  %1849 = vpow2.f32 %v1516_v51  ;;  %v1659_v56 = vpop.f32.mrf.mxu0 }
 0x11c   :  { %v1826_v0 = vpop.eup %1825  ;;  %954 = vst.msk [vmem:[%s3047_s3 + $0x178] sm:$0xff] %vm906_vm1, %v1824_v62  ;;  %1851 = vpow2.f32 %v1483_v54  ;;  %1261 = vrot.lane.b32.xlu1 %v1575_v59, %s1956_s0  ;;  %1259 = vrot.lane.b32.xlu0 %v1574_v58, %s1956_s0  ;;  %v1488_v54 = vmul.f32 -1.442695, %v372_v36  ;;  %v1690_v58 = vpop.f32.mrf.mxu1 }
 0x11d   :  { %v1828_v1 = vpop.eup %1827  ;;  %v732_v2 = vadd.f32 1.0, %v1826_v0  ;;  %1853 = vpow2.f32 %v1514_v55  ;;  %v2582_v55 = vadd.f32 %v2215_v34, %v366_v7  ;;  %v2593_v34 = vld [vmem:[%s3046_s2] ss:$0 sm:$0xff]  ;;  %v1553_v0 = vclamps-f32 %v375_v45, 2.0 }
 0x11e   :  { %v1830_v3 = vpop.eup %1829  ;;  %v730_v4 = vadd.f32 1.0, %v1828_v1  ;;  %1855 = vpow2.f32 %v1517_v60  ;;  %v1552_v60 = vclamps-f32 %v372_v36, 2.0  ;;  %v2596_v62 = vadd.f32 %v2593_v34, %v491_v19 }
 0x11f   :  { %v1832_v9 = vpop.eup %1831  ;;  %1857 = vrcp.f32 %v732_v2  ;;  %v733_v10 = vadd.f32 1.0, %v1830_v3  ;;  %v1520_v1 = vmul.f32 -1.442695, %v2578_v49  ;;  %v503_v2 = vadd.f32 %v2593_v34, %v1687_v32 }
 0x120   :  { %v1834_v12 = vpop.eup %1833  ;;  %1859 = vrcp.f32 %v730_v4  ;;  %v764_v13 = vadd.f32 1.0, %v1832_v9  ;;  %1209 = vrot.lane.b32.xlu1 %v1549_v5, %s1956_s0  ;;  %1207 = vrot.lane.b32.xlu0 %v1548_v57, %s1956_s0  ;;  %v2609_v4 = vadd.f32 %v2593_v34, %v494_v50  ;;  %v1584_v5 = vclamps-f32 %v2578_v49, 2.0  ;;  %v382_v9 = vpop.f32.mrf.mxu0 }
 0x121   :  { %v1836_v14 = vpop.eup %1835  ;;  %952 = vst.msk [vmem:[%s3047_s3 + $0x168] sm:$0xff] %vm906_vm1, %v1834_v12  ;;  %1861 = vrcp.f32 %v733_v10  ;;  %v1487_v6 = vmul.f32 -1.442695, %v2582_v55  ;;  %v2621_v8 = vadd.f32 %v2593_v34, %v2562_v24  ;;  %v507_v10 = vpop.f32.mrf.mxu1 }
 0x122   :  { %v1838_v15 = vpop.eup %1837  ;;  %1863 = vrcp.f32 %v764_v13  ;;  %v731_v16 = vadd.f32 1.0, %v1836_v14  ;;  %v1518_v13 = vmul.f32 -1.442695, %v2596_v62  ;;  %v2625_v14 = vadd.f32 %v2593_v34, %v379_v26 }
 0x123   :  { %v1840_v20 = vpop.eup %1839  ;;  %v762_v21 = vadd.f32 1.0, %v1838_v15  ;;  %1865 = vpow2.f32 %v1515_v11  ;;  %v1519_v19 = vmul.f32 -1.442695, %v2609_v4  ;;  %v1691_v24 = vpop.f32.mrf.mxu1  ;;  %v1583_v45 = vclamps-f32 %v2609_v4, 2.0 }
 0x124   :  { %v1842_v22 = vpop.eup %1841  ;;  %1867 = vrcp.f32 %v731_v16  ;;  %v765_v23 = vadd.f32 1.0, %v1840_v20  ;;  %1273 = vrot.lane.b32.xlu1 %v1581_v18, %s1956_s0  ;;  %1271 = vrot.lane.b32.xlu0 %v1580_v17, %s1956_s0  ;;  %v1521_v16 = vmul.f32 -1.442695, %v503_v2  ;;  %v1585_v17 = vclamps-f32 %v503_v2, 2.0 }
 0x125   :  { %v1844_v25 = vpop.eup %1843  ;;  %1869 = vrcp.f32 %v762_v21  ;;  %v763_v27 = vadd.f32 1.0, %v1842_v22  ;;  %v2632_v18 = vadd.f32 %v2593_v34, %v1659_v56  ;;  %v2640_v20 = vadd.f32 %v2593_v34, %v382_v9 }
 0x126   :  { %v1846_v28 = vpop.eup %1845  ;;  %1871 = vrcp.f32 %v765_v23  ;;  %v736_v29 = vadd.f32 1.0, %v1844_v25  ;;  %v1492_v22 = vmul.f32 -1.442695, %v2621_v8  ;;  %v2650_v23 = vadd.f32 %v2593_v34, %v1690_v58 }
 0x127   :  { %v1848_v33 = vpop.eup %1847  ;;  %1873 = vrcp.f32 %v763_v27  ;;  %v734_v35 = vadd.f32 1.0, %v1846_v28  ;;  %v1550_v27 = vclamps-f32 %v2570_v40, 2.0  ;;  %v1490_v28 = vmul.f32 -1.442695, %v2625_v14  ;;  %v510_v40 = vpop.f32.mrf.mxu1 }
 0x128   :  { %v1850_v37 = vpop.eup %1849  ;;  %1875 = vrcp.f32 %v736_v29  ;;  %v737_v39 = vadd.f32 1.0, %v1848_v33  ;;  %1205 = vrot.lane.b32.xlu1 %v1547_v31, %s1956_s0  ;;  %1203 = vrot.lane.b32.xlu0 %v1546_v30, %s1956_s0  ;;  %v2659_v29 = vadd.f32 %v2593_v34, %v507_v10  ;;  %v1551_v31 = vclamps-f32 %v2582_v55, 2.0 }
 0x129   :  { %v1852_v38 = vpop.eup %1851  ;;  %1877 = vrcp.f32 %v734_v35  ;;  %v768_v42 = vadd.f32 1.0, %v1850_v37  ;;  %v1493_v32 = vmul.f32 -1.442695, %v2632_v18  ;;  %v2668_v33 = vadd.f32 %v2593_v34, %v1691_v24 }
 0x12a   :  { %v1854_v46 = vpop.eup %1853  ;;  %1879 = vrcp.f32 %v737_v39  ;;  %v735_v47 = vadd.f32 1.0, %v1852_v38  ;;  %v1491_v36 = vmul.f32 -1.442695, %v2640_v20  ;;  %v1524_v39 = vmul.f32 -1.442695, %v2650_v23 }
 0x12b   :  { %v1856_v51 = vpop.eup %1855  ;;  %1881 = vrcp.f32 %v768_v42  ;;  %v766_v53 = vadd.f32 1.0, %v1854_v46  ;;  %v1522_v38 = vmul.f32 -1.442695, %v2659_v29  ;;  %v1525_v46 = vmul.f32 -1.442695, %v2668_v33 }
 0x12c   :  { %v1858_v41 = vpop.eup %1857  ;;  %1883 = vrcp.f32 %v735_v47  ;;  %v769_v52 = vadd.f32 1.0, %v1856_v51  ;;  %1269 = vrot.lane.b32.xlu1 %v1579_v48, %s1956_s0  ;;  %1267 = vrot.lane.b32.xlu0 %v1578_v43, %s1956_s0  ;;  %v1582_v43 = vclamps-f32 %v2596_v62, 2.0  ;;  %v511_v48 = vadd.f32 %v2593_v34, %v510_v40 }
 0x12d   :  { %v1860_v59 = vpop.eup %1859  ;;  %925 = vst.msk [vmem:[%s3047_s3 + $0x90] sm:$0xff] %vm906_vm1, %v1858_v41  ;;  %1885 = vrcp.f32 %v766_v53  ;;  %v1556_v41 = vclamps-f32 %v2621_v8, 2.0  ;;  %v1554_v62 = vclamps-f32 %v2625_v14, 2.0  ;;  %v1586_v10 = vclamps-f32 %v2659_v29, 2.0 }
 0x12e   :  { %v1862_v63 = vpop.eup %1861  ;;  %923 = vst.msk [vmem:[%s3047_s3 + $0x80] sm:$0xff] %vm906_vm1, %v1860_v59  ;;  %1887 = vrcp.f32 %v769_v52  ;;  %v1557_v52 = vclamps-f32 %v2632_v18, 2.0  ;;  %v1523_v56 = vmul.f32 -1.442695, %v511_v48 }
 0x12f   :  { %v1864_v3 = vpop.eup %1863  ;;  %926 = vst.msk [vmem:[%s3047_s3 + $0x98] sm:$0xff] %vm906_vm1, %v1862_v63  ;;  %1889 = vpow2.f32 %v1488_v54  ;;  %v1555_v63 = vclamps-f32 %v2640_v20, 2.0 }
 0x130   :  { %v1866_v57 = vpop.eup %1865  ;;  %957 = vst.msk [vmem:[%s3047_s3 + $0x190] sm:$0xff] %vm906_vm1, %v1864_v3  ;;  %1891 = vpow2.f32 %v1486_v44  ;;  %1217 = vrot.lane.b32.xlu1 %v1553_v0, %s1956_s0  ;;  %1215 = vrot.lane.b32.xlu0 %v1552_v60, %s1956_s0 }
 0x131   :  { %v1868_v11 = vpop.eup %1867  ;;  %v767_v12 = vadd.f32 1.0, %v1866_v57  ;;  %1893 = vpow2.f32 %v1489_v61 }
 0x132   :  { %v1870_v15 = vpop.eup %1869  ;;  %924 = vst.msk [vmem:[%s3047_s3 + $0x88] sm:$0xff] %vm906_vm1, %v1868_v11  ;;  %1895 = vpow2.f32 %v1520_v1  ;;  %v1587_v11 = vclamps-f32 %v511_v48, 2.0 }
 0x133   :  { %v1872_v7 = vpop.eup %1871  ;;  %955 = vst.msk [vmem:[%s3047_s3 + $0x180] sm:$0xff] %vm906_vm1, %v1870_v15  ;;  %1897 = vrcp.f32 %v767_v12 }
 0x134   :  { %v1874_v21 = vpop.eup %1873  ;;  %958 = vst.msk [vmem:[%s3047_s3 + $0x198] sm:$0xff] %vm906_vm1, %v1872_v7  ;;  %1899 = vpow2.f32 %v1487_v6  ;;  %1281 = vrot.lane.b32.xlu1 %v1585_v17, %s1956_s0  ;;  %1279 = vrot.lane.b32.xlu0 %v1584_v5, %s1956_s0 }
 0x135   :  { %v1876_v25 = vpop.eup %1875  ;;  %956 = vst.msk [vmem:[%s3047_s3 + $0x188] sm:$0xff] %vm906_vm1, %v1874_v21  ;;  %1901 = vpow2.f32 %v1518_v13  ;;  %v1588_v21 = vclamps-f32 %v2650_v23, 2.0 }
 0x136   :  { %v1878_v30 = vpop.eup %1877  ;;  %929 = vst.msk [vmem:[%s3047_s3 + $0xb0] sm:$0xff] %vm906_vm1, %v1876_v25  ;;  %1903 = vpow2.f32 %v1521_v16 }
 0x137   :  { %v1880_v35 = vpop.eup %1879  ;;  %927 = vst.msk [vmem:[%s3047_s3 + $0xa0] sm:$0xff] %vm906_vm1, %v1878_v30  ;;  %1905 = vpow2.f32 %v1519_v19 }
 0x138   :  { %v1882_v37 = vpop.eup %1881  ;;  %930 = vst.msk [vmem:[%s3047_s3 + $0xb8] sm:$0xff] %vm906_vm1, %v1880_v35  ;;  %1907 = vpow2.f32 %v1492_v22  ;;  %1213 = vrot.lane.b32.xlu1 %v1551_v31, %s1956_s0  ;;  %1211 = vrot.lane.b32.xlu0 %v1550_v27, %s1956_s0  ;;  %v1589_v22 = vclamps-f32 %v2668_v33, 2.0 }
 0x139   :  { %v1884_v26 = vpop.eup %1883  ;;  %961 = vst.msk [vmem:[%s3047_s3 + $0x1b0] sm:$0xff] %vm906_vm1, %v1882_v37  ;;  %1909 = vpow2.f32 %v1490_v28 }
 0x13a   :  { %v1886_v42 = vpop.eup %1885  ;;  %928 = vst.msk [vmem:[%s3047_s3 + $0xa8] sm:$0xff] %vm906_vm1, %v1884_v26  ;;  %1911 = vpow2.f32 %v1493_v32 }
 0x13b   :  { %v1888_v47 = vpop.eup %1887  ;;  %959 = vst.msk [vmem:[%s3047_s3 + $0x1a0] sm:$0xff] %vm906_vm1, %v1886_v42  ;;  %1913 = vpow2.f32 %v1491_v36 }
 0x13c   :  { %v1890_v49 = vpop.eup %1889  ;;  %962 = vst.msk [vmem:[%s3047_s3 + $0x1b8] sm:$0xff] %vm906_vm1, %v1888_v47  ;;  %1915 = vpow2.f32 %v1524_v39  ;;  %1277 = vrot.lane.b32.xlu1 %v1583_v45, %s1956_s0  ;;  %1275 = vrot.lane.b32.xlu0 %v1582_v43, %s1956_s0 }
 0x13d   :  { %v1892_v50 = vpop.eup %1891  ;;  %v740_v51 = vadd.f32 1.0, %v1890_v49  ;;  %1917 = vpow2.f32 %v1522_v38 }
 0x13e   :  { %v1894_v53 = vpop.eup %1893  ;;  %v738_v54 = vadd.f32 1.0, %v1892_v50  ;;  %1919 = vpow2.f32 %v1525_v46 }
 0x13f   :  { %v1896_v44 = vpop.eup %1895  ;;  %1921 = vrcp.f32 %v740_v51  ;;  %v741_v55 = vadd.f32 1.0, %v1894_v53 }
 0x140   :  { %v1898_v58 = vpop.eup %1897  ;;  %1923 = vrcp.f32 %v738_v54  ;;  %v772_v59 = vadd.f32 1.0, %v1896_v44  ;;  %1225 = vrot.lane.b32.xlu1 %v1557_v52, %s1956_s0  ;;  %1223 = vrot.lane.b32.xlu0 %v1556_v41, %s1956_s0 }
 0x141   :  { %v1900_v60 = vpop.eup %1899  ;;  %960 = vst.msk [vmem:[%s3047_s3 + $0x1a8] sm:$0xff] %vm906_vm1, %v1898_v58  ;;  %1925 = vrcp.f32 %v741_v55 }
 0x142   :  { %v1902_v61 = vpop.eup %1901  ;;  %1927 = vrcp.f32 %v772_v59  ;;  %v739_v34 = vadd.f32 1.0, %v1900_v60  ;;  %v1232_v0 = vpop.permute.xlu0 %1231 }
 0x143   :  { %v1168_v1 = vpop.permute.xlu1 %1167  ;;  %v1904_v2 = vpop.eup %1903  ;;  %v770_v3 = vadd.f32 1.0, %v1902_v61  ;;  %1929 = vpow2.f32 %v1523_v56  ;;  %1389 = vst.msk [vmem:[%s3048_s4 + $0x110] sm:$0xff] %vm906_vm1, %v1232_v0 }
 0x144   :  { %1357 = vst.msk [vmem:[%s3048_s4 + $0x10] sm:$0xff] %vm906_vm1, %v1168_v1  ;;  %v1906_v4 = vpop.eup %1905  ;;  %1931 = vrcp.f32 %v739_v34  ;;  %v773_v57 = vadd.f32 1.0, %v1904_v2  ;;  %1221 = vrot.lane.b32.xlu1 %v1555_v63, %s1956_s0  ;;  %1219 = vrot.lane.b32.xlu0 %v1554_v62, %s1956_s0 }
 0x145   :  { %v1908_v5 = vpop.eup %1907  ;;  %1933 = vrcp.f32 %v770_v3  ;;  %v771_v6 = vadd.f32 1.0, %v1906_v4 }
 0x146   :  { %v1910_v8 = vpop.eup %1909  ;;  %1935 = vrcp.f32 %v773_v57  ;;  %v744_v9 = vadd.f32 1.0, %v1908_v5  ;;  %v1164_v13 = vpop.permute.xlu0 %1163 }
 0x147   :  { %v1170_v12 = vpop.permute.xlu1 %1169  ;;  %v1912_v14 = vpop.eup %1911  ;;  %1937 = vrcp.f32 %v771_v6  ;;  %v742_v15 = vadd.f32 1.0, %v1910_v8  ;;  %1355 = vst.msk [vmem:[%s3048_s4] sm:$0xff] %vm906_vm1, %v1164_v13 }
 0x148   :  { %1358 = vst.msk [vmem:[%s3048_s4 + $0x18] sm:$0xff] %vm906_vm1, %v1170_v12  ;;  %v1914_v16 = vpop.eup %1913  ;;  %1939 = vrcp.f32 %v744_v9  ;;  %v745_v17 = vadd.f32 1.0, %v1912_v14  ;;  %1285 = vrot.lane.b32.xlu1 %v1587_v11, %s1956_s0  ;;  %1283 = vrot.lane.b32.xlu0 %v1586_v10, %s1956_s0 }
 0x149   :  { %v1916_v18 = vpop.eup %1915  ;;  %1941 = vrcp.f32 %v742_v15  ;;  %v743_v7 = vadd.f32 1.0, %v1914_v16 }
 0x14a   :  { %v1918_v19 = vpop.eup %1917  ;;  %1943 = vrcp.f32 %v745_v17  ;;  %v776_v20 = vadd.f32 1.0, %v1916_v18  ;;  %v1228_v25 = vpop.permute.xlu0 %1227 }
 0x14b   :  { %v1234_v24 = vpop.permute.xlu1 %1233  ;;  %v1920_v27 = vpop.eup %1919  ;;  %1945 = vrcp.f32 %v743_v7  ;;  %v774_v28 = vadd.f32 1.0, %v1918_v19  ;;  %1387 = vst.msk [vmem:[%s3048_s4 + $0x100] sm:$0xff] %vm906_vm1, %v1228_v25 }
 0x14c   :  { %1390 = vst.msk [vmem:[%s3048_s4 + $0x118] sm:$0xff] %vm906_vm1, %v1234_v24  ;;  %v1922_v29 = vpop.eup %1921  ;;  %1947 = vrcp.f32 %v776_v20  ;;  %v777_v23 = vadd.f32 1.0, %v1920_v27  ;;  %1289 = vrot.lane.b32.xlu1 %v1589_v22, %s1956_s0  ;;  %1287 = vrot.lane.b32.xlu0 %v1588_v21, %s1956_s0 }
 0x14d   :  { %v1924_v30 = vpop.eup %1923  ;;  %933 = vst.msk [vmem:[%s3047_s3 + $0xd0] sm:$0xff] %vm906_vm1, %v1922_v29  ;;  %1949 = vrcp.f32 %v774_v28 }
 0x14e   :  { %v1926_v31 = vpop.eup %1925  ;;  %931 = vst.msk [vmem:[%s3047_s3 + $0xc0] sm:$0xff] %vm906_vm1, %v1924_v30  ;;  %1951 = vrcp.f32 %v777_v23  ;;  %v1166_v33 = vpop.permute.xlu0 %1165 }
 0x14f   :  { %v1230_v32 = vpop.permute.xlu1 %1229  ;;  %v1928_v35 = vpop.eup %1927  ;;  %934 = vst.msk [vmem:[%s3047_s3 + $0xd8] sm:$0xff] %vm906_vm1, %v1926_v31  ;;  %1356 = vst.msk [vmem:[%s3048_s4 + $0x8] sm:$0xff] %vm906_vm1, %v1166_v33 }
 0x150   :  { %1388 = vst.msk [vmem:[%s3048_s4 + $0x108] sm:$0xff] %vm906_vm1, %v1230_v32  ;;  %v1930_v36 = vpop.eup %1929  ;;  %965 = vst.msk [vmem:[%s3047_s3 + $0x1d0] sm:$0xff] %vm906_vm1, %v1928_v35 }
 0x151   :  { %v1932_v37 = vpop.eup %1931  ;;  %v775_v39 = vadd.f32 1.0, %v1930_v36 }
 0x152   :  { %v1934_v40 = vpop.eup %1933  ;;  %932 = vst.msk [vmem:[%s3047_s3 + $0xc8] sm:$0xff] %vm906_vm1, %v1932_v37  ;;  %v1176_v38 = vpop.permute.xlu0 %1175 }
 0x153   :  { %v1178_v26 = vpop.permute.xlu1 %1177  ;;  %v1936_v42 = vpop.eup %1935  ;;  %963 = vst.msk [vmem:[%s3047_s3 + $0x1c0] sm:$0xff] %vm906_vm1, %v1934_v40  ;;  %1953 = vrcp.f32 %v775_v39  ;;  %1361 = vst.msk [vmem:[%s3048_s4 + $0x30] sm:$0xff] %vm906_vm1, %v1176_v38 }
 0x154   :  { %1362 = vst.msk [vmem:[%s3048_s4 + $0x38] sm:$0xff] %vm906_vm1, %v1178_v26  ;;  %v1938_v43 = vpop.eup %1937  ;;  %966 = vst.msk [vmem:[%s3047_s3 + $0x1d8] sm:$0xff] %vm906_vm1, %v1936_v42 }
 0x155   :  { %v1940_v45 = vpop.eup %1939  ;;  %964 = vst.msk [vmem:[%s3047_s3 + $0x1c8] sm:$0xff] %vm906_vm1, %v1938_v43 }
 0x156   :  { %v1942_v46 = vpop.eup %1941  ;;  %937 = vst.msk [vmem:[%s3047_s3 + $0xf0] sm:$0xff] %vm906_vm1, %v1940_v45  ;;  %v1240_v48 = vpop.permute.xlu0 %1239 }
 0x157   :  { %v1242_v47 = vpop.permute.xlu1 %1241  ;;  %v1944_v49 = vpop.eup %1943  ;;  %935 = vst.msk [vmem:[%s3047_s3 + $0xe0] sm:$0xff] %vm906_vm1, %v1942_v46  ;;  %1393 = vst.msk [vmem:[%s3048_s4 + $0x130] sm:$0xff] %vm906_vm1, %v1240_v48 }
 0x158   :  { %1394 = vst.msk [vmem:[%s3048_s4 + $0x138] sm:$0xff] %vm906_vm1, %v1242_v47  ;;  %v1946_v50 = vpop.eup %1945  ;;  %938 = vst.msk [vmem:[%s3047_s3 + $0xf8] sm:$0xff] %vm906_vm1, %v1944_v49 }
 0x159   :  { %v1948_v51 = vpop.eup %1947  ;;  %936 = vst.msk [vmem:[%s3047_s3 + $0xe8] sm:$0xff] %vm906_vm1, %v1946_v50 }
 0x15a   :  { %v1950_v53 = vpop.eup %1949  ;;  %969 = vst.msk [vmem:[%s3047_s3 + $0x1f0] sm:$0xff] %vm906_vm1, %v1948_v51  ;;  %v1172_v41 = vpop.permute.xlu0 %1171 }
 0x15b   :  { %v1174_v54 = vpop.permute.xlu1 %1173  ;;  %v1952_v52 = vpop.eup %1951  ;;  %967 = vst.msk [vmem:[%s3047_s3 + $0x1e0] sm:$0xff] %vm906_vm1, %v1950_v53  ;;  %1359 = vst.msk [vmem:[%s3048_s4 + $0x20] sm:$0xff] %vm906_vm1, %v1172_v41 }
 0x15c   :  { %1360 = vst.msk [vmem:[%s3048_s4 + $0x28] sm:$0xff] %vm906_vm1, %v1174_v54  ;;  %970 = vst.msk [vmem:[%s3047_s3 + $0x1f8] sm:$0xff] %vm906_vm1, %v1952_v52 }
 0x15e   :  { %v1236_v55 = vpop.permute.xlu0 %1235 }
 0x15f   :  { %v1238_v44 = vpop.permute.xlu1 %1237  ;;  %1391 = vst.msk [vmem:[%s3048_s4 + $0x120] sm:$0xff] %vm906_vm1, %v1236_v55 }
 0x160   :  { %1392 = vst.msk [vmem:[%s3048_s4 + $0x128] sm:$0xff] %vm906_vm1, %v1238_v44  ;;  %v1954_v56 = vpop.eup %1953 }
 0x161   :  { %968 = vst.msk [vmem:[%s3047_s3 + $0x1e8] sm:$0xff] %vm906_vm1, %v1954_v56 }
 0x162   :  { %v1184_v59 = vpop.permute.xlu0 %1183 }
 0x163   :  { %v1186_v58 = vpop.permute.xlu1 %1185  ;;  %1365 = vst.msk [vmem:[%s3048_s4 + $0x50] sm:$0xff] %vm906_vm1, %v1184_v59 }
 0x164   :  { %1366 = vst.msk [vmem:[%s3048_s4 + $0x58] sm:$0xff] %vm906_vm1, %v1186_v58 }
 0x166   :  { %v1248_v61 = vpop.permute.xlu0 %1247 }
 0x167   :  { %v1250_v60 = vpop.permute.xlu1 %1249  ;;  %1397 = vst.msk [vmem:[%s3048_s4 + $0x150] sm:$0xff] %vm906_vm1, %v1248_v61 }
 0x168   :  { %1398 = vst.msk [vmem:[%s3048_s4 + $0x158] sm:$0xff] %vm906_vm1, %v1250_v60 }
 0x16a   :  { %v1180_v62 = vpop.permute.xlu0 %1179 }
 0x16b   :  { %v1182_v34 = vpop.permute.xlu1 %1181  ;;  %1363 = vst.msk [vmem:[%s3048_s4 + $0x40] sm:$0xff] %vm906_vm1, %v1180_v62 }
 0x16c   :  { %1364 = vst.msk [vmem:[%s3048_s4 + $0x48] sm:$0xff] %vm906_vm1, %v1182_v34 }
 0x16e   :  { %v1244_v0 = vpop.permute.xlu0 %1243 }
 0x16f   :  { %v1246_v63 = vpop.permute.xlu1 %1245  ;;  %1395 = vst.msk [vmem:[%s3048_s4 + $0x140] sm:$0xff] %vm906_vm1, %v1244_v0 }
 0x170   :  { %1396 = vst.msk [vmem:[%s3048_s4 + $0x148] sm:$0xff] %vm906_vm1, %v1246_v63 }
 0x172   :  { %v1192_v2 = vpop.permute.xlu0 %1191 }
 0x173   :  { %v1194_v1 = vpop.permute.xlu1 %1193  ;;  %1369 = vst.msk [vmem:[%s3048_s4 + $0x70] sm:$0xff] %vm906_vm1, %v1192_v2 }
 0x174   :  { %1370 = vst.msk [vmem:[%s3048_s4 + $0x78] sm:$0xff] %vm906_vm1, %v1194_v1 }
 0x176   :  { %v1256_v4 = vpop.permute.xlu0 %1255 }
 0x177   :  { %v1258_v3 = vpop.permute.xlu1 %1257  ;;  %1401 = vst.msk [vmem:[%s3048_s4 + $0x170] sm:$0xff] %vm906_vm1, %v1256_v4 }
 0x178   :  { %1402 = vst.msk [vmem:[%s3048_s4 + $0x178] sm:$0xff] %vm906_vm1, %v1258_v3 }
 0x17a   :  { %v1188_v5 = vpop.permute.xlu0 %1187 }
 0x17b   :  { %v1190_v57 = vpop.permute.xlu1 %1189  ;;  %1367 = vst.msk [vmem:[%s3048_s4 + $0x60] sm:$0xff] %vm906_vm1, %v1188_v5 }
 0x17c   :  { %1368 = vst.msk [vmem:[%s3048_s4 + $0x68] sm:$0xff] %vm906_vm1, %v1190_v57 }
 0x17e   :  { %v1252_v8 = vpop.permute.xlu0 %1251 }
 0x17f   :  { %v1254_v6 = vpop.permute.xlu1 %1253  ;;  %1399 = vst.msk [vmem:[%s3048_s4 + $0x160] sm:$0xff] %vm906_vm1, %v1252_v8 }
 0x180   :  { %1400 = vst.msk [vmem:[%s3048_s4 + $0x168] sm:$0xff] %vm906_vm1, %v1254_v6 }
 0x182   :  { %v1200_v10 = vpop.permute.xlu0 %1199 }
 0x183   :  { %v1202_v9 = vpop.permute.xlu1 %1201  ;;  %1373 = vst.msk [vmem:[%s3048_s4 + $0x90] sm:$0xff] %vm906_vm1, %v1200_v10 }
 0x184   :  { %1374 = vst.msk [vmem:[%s3048_s4 + $0x98] sm:$0xff] %vm906_vm1, %v1202_v9 }
 0x186   :  { %v1264_v12 = vpop.permute.xlu0 %1263 }
 0x187   :  { %v1266_v11 = vpop.permute.xlu1 %1265  ;;  %1405 = vst.msk [vmem:[%s3048_s4 + $0x190] sm:$0xff] %vm906_vm1, %v1264_v12 }
 0x188   :  { %1406 = vst.msk [vmem:[%s3048_s4 + $0x198] sm:$0xff] %vm906_vm1, %v1266_v11 }
 0x18a   :  { %v1196_v14 = vpop.permute.xlu0 %1195 }
 0x18b   :  { %v1198_v13 = vpop.permute.xlu1 %1197  ;;  %1371 = vst.msk [vmem:[%s3048_s4 + $0x80] sm:$0xff] %vm906_vm1, %v1196_v14 }
 0x18c   :  { %1372 = vst.msk [vmem:[%s3048_s4 + $0x88] sm:$0xff] %vm906_vm1, %v1198_v13 }
 0x18e   :  { %v1260_v16 = vpop.permute.xlu0 %1259 }
 0x18f   :  { %v1262_v15 = vpop.permute.xlu1 %1261  ;;  %1403 = vst.msk [vmem:[%s3048_s4 + $0x180] sm:$0xff] %vm906_vm1, %v1260_v16 }
 0x190   :  { %1404 = vst.msk [vmem:[%s3048_s4 + $0x188] sm:$0xff] %vm906_vm1, %v1262_v15 }
 0x192   :  { %v1208_v18 = vpop.permute.xlu0 %1207 }
 0x193   :  { %v1210_v17 = vpop.permute.xlu1 %1209  ;;  %1377 = vst.msk [vmem:[%s3048_s4 + $0xb0] sm:$0xff] %vm906_vm1, %v1208_v18 }
 0x194   :  { %1378 = vst.msk [vmem:[%s3048_s4 + $0xb8] sm:$0xff] %vm906_vm1, %v1210_v17 }
 0x196   :  { %v1272_v19 = vpop.permute.xlu0 %1271 }
 0x197   :  { %v1274_v7 = vpop.permute.xlu1 %1273  ;;  %1409 = vst.msk [vmem:[%s3048_s4 + $0x1b0] sm:$0xff] %vm906_vm1, %v1272_v19 }
 0x198   :  { %1410 = vst.msk [vmem:[%s3048_s4 + $0x1b8] sm:$0xff] %vm906_vm1, %v1274_v7 }
 0x19a   :  { %v1204_v21 = vpop.permute.xlu0 %1203 }
 0x19b   :  { %v1206_v20 = vpop.permute.xlu1 %1205  ;;  %1375 = vst.msk [vmem:[%s3048_s4 + $0xa0] sm:$0xff] %vm906_vm1, %v1204_v21 }
 0x19c   :  { %1376 = vst.msk [vmem:[%s3048_s4 + $0xa8] sm:$0xff] %vm906_vm1, %v1206_v20 }
 0x19e   :  { %v1268_v24 = vpop.permute.xlu0 %1267 }
 0x19f   :  { %v1270_v22 = vpop.permute.xlu1 %1269  ;;  %1407 = vst.msk [vmem:[%s3048_s4 + $0x1a0] sm:$0xff] %vm906_vm1, %v1268_v24 }
 0x1a0   :  { %1408 = vst.msk [vmem:[%s3048_s4 + $0x1a8] sm:$0xff] %vm906_vm1, %v1270_v22 }
 0x1a2   :  { %v1216_v27 = vpop.permute.xlu0 %1215 }
 0x1a3   :  { %v1218_v25 = vpop.permute.xlu1 %1217  ;;  %1381 = vst.msk [vmem:[%s3048_s4 + $0xd0] sm:$0xff] %vm906_vm1, %v1216_v27 }
 0x1a4   :  { %1382 = vst.msk [vmem:[%s3048_s4 + $0xd8] sm:$0xff] %vm906_vm1, %v1218_v25 }
 0x1a6   :  { %v1280_v29 = vpop.permute.xlu0 %1279 }
 0x1a7   :  { %v1282_v28 = vpop.permute.xlu1 %1281  ;;  %1413 = vst.msk [vmem:[%s3048_s4 + $0x1d0] sm:$0xff] %vm906_vm1, %v1280_v29 }
 0x1a8   :  { %1414 = vst.msk [vmem:[%s3048_s4 + $0x1d8] sm:$0xff] %vm906_vm1, %v1282_v28 }
 0x1aa   :  { %v1212_v30 = vpop.permute.xlu0 %1211 }
 0x1ab   :  { %v1214_v23 = vpop.permute.xlu1 %1213  ;;  %1379 = vst.msk [vmem:[%s3048_s4 + $0xc0] sm:$0xff] %vm906_vm1, %v1212_v30 }
 0x1ac   :  { %1380 = vst.msk [vmem:[%s3048_s4 + $0xc8] sm:$0xff] %vm906_vm1, %v1214_v23 }
 0x1ae   :  { %v1276_v32 = vpop.permute.xlu0 %1275 }
 0x1af   :  { %v1278_v31 = vpop.permute.xlu1 %1277  ;;  %1411 = vst.msk [vmem:[%s3048_s4 + $0x1c0] sm:$0xff] %vm906_vm1, %v1276_v32 }
 0x1b0   :  { %1412 = vst.msk [vmem:[%s3048_s4 + $0x1c8] sm:$0xff] %vm906_vm1, %v1278_v31 }
 0x1b2   :  { %v1224_v35 = vpop.permute.xlu0 %1223 }
 0x1b3   :  { %v1226_v33 = vpop.permute.xlu1 %1225  ;;  %1385 = vst.msk [vmem:[%s3048_s4 + $0xf0] sm:$0xff] %vm906_vm1, %v1224_v35 }
 0x1b4   :  { %1386 = vst.msk [vmem:[%s3048_s4 + $0xf8] sm:$0xff] %vm906_vm1, %v1226_v33 }
 0x1b6   :  { %v1220_v37 = vpop.permute.xlu0 %1219 }
 0x1b7   :  { %v1222_v36 = vpop.permute.xlu1 %1221  ;;  %1383 = vst.msk [vmem:[%s3048_s4 + $0xe0] sm:$0xff] %vm906_vm1, %v1220_v37 }
 0x1b8   :  { %1384 = vst.msk [vmem:[%s3048_s4 + $0xe8] sm:$0xff] %vm906_vm1, %v1222_v36 }
 0x1ba   :  { %v1284_v40 = vpop.permute.xlu0 %1283 }
 0x1bb   :  { %v1286_v39 = vpop.permute.xlu1 %1285  ;;  %1415 = vst.msk [vmem:[%s3048_s4 + $0x1e0] sm:$0xff] %vm906_vm1, %v1284_v40 }
 0x1bc   :  { %1416 = vst.msk [vmem:[%s3048_s4 + $0x1e8] sm:$0xff] %vm906_vm1, %v1286_v39 }
 0x1be   :  { %v1288_v38 = vpop.permute.xlu0 %1287 }
 0x1bf   :  { %v1290_v26 = vpop.permute.xlu1 %1289  ;;  %1417 = vst.msk [vmem:[%s3048_s4 + $0x1f0] sm:$0xff] %vm906_vm1, %v1288_v38 }
 0x1c0   :  { %1418 = vst.msk [vmem:[%s3048_s4 + $0x1f8] sm:$0xff] %vm906_vm1, %v1290_v26 }

</bundles_post_ra>
